<compile_context>
chip_gen: v7x
topology: tpu7x:2x2x1
jax: 0.10.0
libtpu: 0.0.40
codegen_flags: <defaults>
</compile_context>

<pallas_src>
import functools

import jax
import jax.numpy as jnp
from jax.experimental import pallas as pl
from jax.experimental.pallas import tpu as pltpu

EMO_CLASSES = 7
PRED_PAD = 128  # lane-dense padded width for the emotion_out output


def emotion_kernel(T_total,
                   text_feat_ref, audio_ref, w_lm_ref, b_lm_ref,
                   w_emo_t_ref, w_emo_a_ref, b_emo_ref,
                   tp_ref, tnorm_ref,
                   pred_ref, sim_ref,
                   acc_ref):
    """grid = (B tiles, T tiles); T (axis 1) is the reduction axis."""
    ti = pl.program_id(1)
    nt = pl.num_programs(1)
    t_tile = audio_ref.shape[1]
    rem = T_total % t_tile            # static Python int

    # ---- init running T-sum for this batch-row tile ----
    @pl.when(ti == 0)
    def _():
        acc_ref[...] = jnp.zeros_like(acc_ref)

    # ---- accumulate sum over this T tile (f32 stream, f32 accumulation, no temp copy) ----
    if rem == 0:
        acc_ref[...] += jnp.sum(audio_ref[...], axis=1)             # [bt, 1024]
    else:
        @pl.when(ti < nt - 1)
        def _():                                                    # steady state: no mask
            acc_ref[...] += jnp.sum(audio_ref[...], axis=1)

        @pl.when(ti == nt - 1)
        def _():                                                    # partial last tile only
            t_ids = jax.lax.broadcasted_iota(jnp.int32, (1, t_tile, 1), 1)
            blk = jnp.where(t_ids < rem, audio_ref[...], 0.0)
            acc_ref[...] += jnp.sum(blk, axis=1)

    # ---- finalize on the last T tile ----
    @pl.when(ti == nt - 1)
    def _():
        # AdaptiveAvgPool2d((1,768)) o lm_head == lm_head o mean_T   (linearity)
        audio_mean = acc_ref[...] * (1.0 / T_total)                 # [bt, 1024] f32
        audio_feat = (jnp.dot(audio_mean.astype(jnp.bfloat16), w_lm_ref[...],
                              preferred_element_type=jnp.float32)
                      + b_lm_ref[...])                              # [bt, 768] f32

        # emotion_out(cat([text, audio])) == split matmul, padded to 128 lanes
        pred = (jnp.dot(text_feat_ref[...], w_emo_t_ref[...],
                        preferred_element_type=jnp.float32)
                + jnp.dot(audio_feat, w_emo_a_ref[...],
                          preferred_element_type=jnp.float32)
                + b_emo_ref[...])                                   # [bt, 128]
        pred_ref[...] = pred

        # CosineSimilarity(dim=2)(audio_feat.unsqueeze(1), text_posneg); tiny epilogue,
        # runs once per B tile -> exact divide, per-norm clamp (matches torch).
        tp = tp_ref[...]                                            # [bt, N, 768]
        dots = jnp.sum(audio_feat[:, None, :] * tp, axis=2)         # [bt, N]
        a_norm = jnp.sqrt(jnp.sum(audio_feat * audio_feat, axis=1, keepdims=True))
        denom = jnp.maximum(a_norm, 1e-8) * jnp.maximum(tnorm_ref[...], 1e-8)
        sim_ref[...] = dots / denom


def _vmem_capacity_bytes():
    try:
        return int(pltpu.get_tpu_info().vmem_capacity_bytes)
    except Exception:
        return 64 * 1024 * 1024        # conservative (v7x-sized) fallback


def _pick_b_tile(B):
    if B % 8 != 0:
        return B                       # small / odd batch: a single full-B block
    # prefer >= 2 batch blocks (keeps both v7x TensorCores busy), tiles up to 32 rows
    for bt in (32, 24, 16, 8):
        if B % bt == 0 and B // bt >= 2:
            return bt
    return B                           # B == 8: single block


def _pick_tiles(B, T, K, t_tile=None):
    phys = _vmem_capacity_bytes()
    # leave headroom under physical VMEM for residents + compiler scratch
    vmem_limit = int(min(phys * 3 // 4, 100 * 2**20))      # ~48 MiB v7x, ~96 MiB v5e/v6e
    # per-buffer cap for the double-buffered f32 audio stream
    audio_buf_cap = (8 * 2**20) if phys <= (64 * 2**20) else (16 * 2**20)
    b_tile = _pick_b_tile(B)
    if t_tile is None:
        max_rows = max(8, (audio_buf_cap // (b_tile * K * 4)) // 8 * 8)
        t_tile = T if T <= max_rows else max_rows
    assert t_tile == T or t_tile % 8 == 0, "t_tile must be a multiple of 8 or the full T"
    return b_tile, t_tile, vmem_limit


@functools.partial(jax.jit, static_argnames=("b_tile", "t_tile", "vmem_limit"))
def _emotion_call(text_feat, audio_hidden, params, text_posneg,
                  *, b_tile, t_tile, vmem_limit):
    B, T, K = audio_hidden.shape
    N = text_posneg.shape[1]
    D = params["w_lm"].shape[1]                                     # 768
    nb, nt = pl.cdiv(B, b_tile), pl.cdiv(T, t_tile)

    # lm_head weight resident in bf16 (MXU-native; f32 accumulation inside the kernel)
    w_lm_bf16 = params["w_lm"].astype(jnp.bfloat16)

    # emotion_out padded to a lane-dense 128-wide output; split text/audio halves (no concat)
    w_emo_t = jnp.zeros((D, PRED_PAD), jnp.float32).at[:, :EMO_CLASSES].set(params["w_emo_t"])
    w_emo_a = jnp.zeros((D, PRED_PAD), jnp.float32).at[:, :EMO_CLASSES].set(params["w_emo_a"])
    b_emo = jnp.zeros((1, PRED_PAD), jnp.float32).at[:, :EMO_CLASSES].set(params["b_emo"])

    # ||text_posneg|| is loop-invariant -> compute once outside the kernel
    t_norm = jnp.sqrt(jnp.sum(text_posneg * text_posneg, axis=2))   # [B, N]

    # TODO(synk): for very large B the (b_tile, N=B, 768) text_posneg tile grows
    # quadratically; tile N / stream it bf16 if B grows beyond ~64.

    kernel = functools.partial(emotion_kernel, T)

    pred_pad, sim = pl.pallas_call(
        kernel,
        out_shape=(jax.ShapeDtypeStruct((B, PRED_PAD), jnp.float32),
                   jax.ShapeDtypeStruct((B, N), jnp.float32)),
        grid_spec=pltpu.PrefetchScalarGridSpec(
            num_scalar_prefetch=0,
            grid=(nb, nt),
            in_specs=[
                pl.BlockSpec((b_tile, D), lambda bi, ti: (bi, 0)),              # text_feat
                pl.BlockSpec((b_tile, t_tile, K), lambda bi, ti: (bi, ti, 0)),  # audio (f32)
                pl.BlockSpec((K, D), lambda bi, ti: (0, 0)),                    # w_lm (bf16)
                pl.BlockSpec((1, D), lambda bi, ti: (0, 0)),                    # b_lm
                pl.BlockSpec((D, PRED_PAD), lambda bi, ti: (0, 0)),             # w_emo_t
                pl.BlockSpec((D, PRED_PAD), lambda bi, ti: (0, 0)),             # w_emo_a
                pl.BlockSpec((1, PRED_PAD), lambda bi, ti: (0, 0)),             # b_emo
                pl.BlockSpec((b_tile, N, D), lambda bi, ti: (bi, 0, 0)),        # text_posneg
                pl.BlockSpec((b_tile, N), lambda bi, ti: (bi, 0)),              # ||text_posneg||
            ],
            out_specs=[
                pl.BlockSpec((b_tile, PRED_PAD), lambda bi, ti: (bi, 0)),       # pred (padded)
                pl.BlockSpec((b_tile, N), lambda bi, ti: (bi, 0)),              # sim
            ],
            scratch_shapes=[pltpu.VMEM((b_tile, K), jnp.float32)],              # running T-sum
        ),
        compiler_params=pltpu.CompilerParams(
            dimension_semantics=("parallel", "arbitrary"),
            vmem_limit_bytes=vmem_limit),
    )(text_feat, audio_hidden, w_lm_bf16, params["b_lm"],
      w_emo_t, w_emo_a, b_emo, text_posneg, t_norm)

    return pred_pad[:, :EMO_CLASSES], sim


def emotion_forward(text_feat, audio_hidden, params, text_posneg, t_tile=None):
    B, T, K = audio_hidden.shape
    b_tile, t_tile, vmem_limit = _pick_tiles(B, T, K, t_tile)
    return _emotion_call(text_feat, audio_hidden, params, text_posneg,
                         b_tile=b_tile, t_tile=t_tile, vmem_limit=vmem_limit)


def init_params(key):
    k1, k2, k3, k4 = jax.random.split(key, 4)
    # lm_head: nn.Linear(1024, 768); stored as [in, out]
    w_lm = jax.random.normal(k1, (1024, 768), jnp.float32) * 0.02
    b_lm = jax.random.normal(k2, (1, 768), jnp.float32) * 0.02
    # emotion_out: nn.Linear(1536, 7); stored as [in, out], split into text/audio halves
    w_emo = jax.random.normal(k3, (1536, 7), jnp.float32) * 0.02
    b_emo = jax.random.normal(k4, (1, 7), jnp.float32) * 0.02
    return {"w_lm": w_lm, "b_lm": b_lm,
            "w_emo_t": w_emo[:768], "w_emo_a": w_emo[768:], "b_emo": b_emo}


def create_negative_samples(text_feat):
    # TODO(synk): exact `create_negative_samples` from the repo is unavailable; deterministic
    # stand-in: position 0 is the positive (self), the rest are rolled batch elements.
    B = text_feat.shape[0]
    text_posneg = jnp.stack([jnp.roll(text_feat, -n, axis=0) for n in range(B)], axis=1)
    contrastive_label = jnp.zeros((B,), jnp.int32)
    return text_posneg, contrastive_label


def reference_forward(text_feat, audio_hidden, params, text_posneg):
    """Original per-timestep formulation (project every t, then pool), full f32 precision."""
    hp = jax.lax.Precision.HIGHEST
    proj = jnp.einsum("btk,kd->btd", audio_hidden, params["w_lm"], precision=hp) + params["b_lm"]
    audio_feat = jnp.mean(proj, axis=1)
    feat = jnp.concatenate([text_feat, audio_feat], axis=1)
    w_emo = jnp.concatenate([params["w_emo_t"], params["w_emo_a"]], axis=0)
    pred = jnp.dot(feat, w_emo, precision=hp) + params["b_emo"]
    a = audio_feat[:, None, :]
    dot = jnp.sum(a * text_posneg, axis=2)
    denom = (jnp.maximum(jnp.linalg.norm(a, axis=2), 1e-8)
             * jnp.maximum(jnp.linalg.norm(text_posneg, axis=2), 1e-8))
    return pred, dot / denom


if __name__ == "__main__":
    B, T = 2, 20            # T deliberately NOT a multiple of the 8-row T tile (tests masking)
    key = jax.random.PRNGKey(0)
    k_text, k_audio, k_params = jax.random.split(key, 3)

    # Stand-ins for the pretrained encoder outputs (see header comment).
    text_feat = jax.random.normal(k_text, (B, 768), jnp.float32)
    audio_hidden = jax.random.normal(k_audio, (B, T, 1024), jnp.float32)
    params = init_params(k_params)

    text_posneg, contrastive_label = create_negative_samples(text_feat)

    # Multi-T-tile path (3 tiles, last one partial -> exercises the masked branch).
    pred_emotion, sim = emotion_forward(text_feat, audio_hidden, params, text_posneg, t_tile=8)
    # Auto-tiled path (single full-T tile at these small shapes).
    pred_auto, sim_auto = emotion_forward(text_feat, audio_hidden, params, text_posneg)
    pred_emotion, sim, pred_auto, sim_auto = jax.block_until_ready(
        (pred_emotion, sim, pred_auto, sim_auto))

    # Full-precision reference in the original project-then-pool formulation.
    ref_pred, ref_sim = reference_forward(text_feat, audio_hidden, params, text_posneg)

    assert pred_emotion.shape == (B, EMO_CLASSES) and sim.shape == (B, B)
    # Tolerance covers the bf16 lm_head weight / pooled-mean MXU operands in the kernel.
    assert jnp.allclose(pred_emotion, ref_pred, atol=5e-3, rtol=5e-3)
    assert jnp.allclose(sim, ref_sim, atol=5e-3, rtol=5e-3)
    assert jnp.allclose(pred_auto, ref_pred, atol=5e-3, rtol=5e-3)
    assert jnp.allclose(sim_auto, ref_sim, atol=5e-3, rtol=5e-3)

    print("KERNEL_OK")
</pallas_src>

<mosaic_0001>
module attributes {stable_mosaic.version = 11 : i64} {
  func.func @emotion_kernel(%arg0: i32, %arg1: i32, %arg2: memref<2x768xf32, #tpu.memory_space<vmem>>, %arg3: memref<2x8x1024xf32, #tpu.memory_space<vmem>>, %arg4: memref<1024x768xbf16, #tpu.memory_space<vmem>>, %arg5: memref<1x768xf32, #tpu.memory_space<vmem>>, %arg6: memref<768x128xf32, #tpu.memory_space<vmem>>, %arg7: memref<768x128xf32, #tpu.memory_space<vmem>>, %arg8: memref<1x128xf32, #tpu.memory_space<vmem>>, %arg9: memref<2x2x768xf32, #tpu.memory_space<vmem>>, %arg10: memref<2x2xf32, #tpu.memory_space<vmem>>, %arg11: memref<2x128xf32, #tpu.memory_space<vmem>>, %arg12: memref<2x2xf32, #tpu.memory_space<vmem>>, %arg13: memref<2x1024xf32, #tpu.memory_space<vmem>>) attributes {dimension_semantics = [#tpu.dimension_semantics<parallel>, #tpu.dimension_semantics<arbitrary>], iteration_bounds = array<i64: 1, 3>, scalar_prefetch = 0 : i64, scratch_operands = 1 : i64, tpu.core_type = #tpu.core_type<tc>, window_params = [{transform_indices = @transform_0, window_bounds = array<i64: 2, 768>}, {transform_indices = @transform_1, window_bounds = array<i64: 2, 8, 1024>}, {pipeline_mode = #tpu.pipeline_mode<synchronous>, transform_indices = @transform_2, window_bounds = array<i64: 1024, 768>}, {pipeline_mode = #tpu.pipeline_mode<synchronous>, transform_indices = @transform_3, window_bounds = array<i64: 1, 768>}, {pipeline_mode = #tpu.pipeline_mode<synchronous>, transform_indices = @transform_4, window_bounds = array<i64: 768, 128>}, {pipeline_mode = #tpu.pipeline_mode<synchronous>, transform_indices = @transform_5, window_bounds = array<i64: 768, 128>}, {pipeline_mode = #tpu.pipeline_mode<synchronous>, transform_indices = @transform_6, window_bounds = array<i64: 1, 128>}, {transform_indices = @transform_7, window_bounds = array<i64: 2, 2, 768>}, {transform_indices = @transform_8, window_bounds = array<i64: 2, 2>}, {transform_indices = @transform_9, window_bounds = array<i64: 2, 128>}, {transform_indices = @transform_10, window_bounds = array<i64: 2, 2>}]} {
    %c0_i32 = arith.constant 0 : i32
    %0 = arith.cmpi eq, %arg1, %c0_i32 : i32
    %1 = arith.extui %0 : i1 to i32
    %c0_i32_0 = arith.constant 0 : i32
    %2 = arith.cmpi ne, %1, %c0_i32_0 : i32
    scf.if %2 {
      %cst = arith.constant 0.000000e+00 : f32
      %12 = vector.broadcast %cst : f32 to vector<2x1024xf32>
      %c0 = arith.constant 0 : index
      %c0_6 = arith.constant 0 : index
      %13 = vector.load %arg13[%c0, %c0_6] : memref<2x1024xf32, #tpu.memory_space<vmem>>, vector<2x1024xf32>
      tpu.vector_store %arg13[%c0, %c0_6], %12 {strides = array<i32>} : memref<2x1024xf32, #tpu.memory_space<vmem>>, vector<2x1024xf32>,
    } else {
    }
    %c2_i32 = arith.constant 2 : i32
    %3 = arith.cmpi slt, %arg1, %c2_i32 : i32
    %4 = arith.extui %3 : i1 to i32
    %c0_i32_1 = arith.constant 0 : i32
    %5 = arith.cmpi ne, %4, %c0_i32_1 : i32
    scf.if %5 {
      %c0 = arith.constant 0 : index
      %c0_6 = arith.constant 0 : index
      %12 = vector.load %arg13[%c0, %c0_6] : memref<2x1024xf32, #tpu.memory_space<vmem>>, vector<2x1024xf32>
      %c0_7 = arith.constant 0 : index
      %c0_8 = arith.constant 0 : index
      %c0_9 = arith.constant 0 : index
      %13 = vector.load %arg3[%c0_7, %c0_8, %c0_9] : memref<2x8x1024xf32, #tpu.memory_space<vmem>>, vector<2x8x1024xf32>
      %cst = arith.constant dense<0.000000e+00> : vector<2x1024xf32>
      %14 = vector.multi_reduction <add>, %13, %cst [1] : vector<2x8x1024xf32> to vector<2x1024xf32>
      %15 = arith.addf %12, %14 : vector<2x1024xf32>
      %c0_10 = arith.constant 0 : index
      %c0_11 = arith.constant 0 : index
      %16 = vector.load %arg13[%c0_10, %c0_11] : memref<2x1024xf32, #tpu.memory_space<vmem>>, vector<2x1024xf32>
      tpu.vector_store %arg13[%c0_10, %c0_11], %15 {strides = array<i32>} : memref<2x1024xf32, #tpu.memory_space<vmem>>, vector<2x1024xf32>,
    } else {
    }
    %c2_i32_2 = arith.constant 2 : i32
    %6 = arith.cmpi eq, %arg1, %c2_i32_2 : i32
    %7 = arith.extui %6 : i1 to i32
    %c0_i32_3 = arith.constant 0 : i32
    %8 = arith.cmpi ne, %7, %c0_i32_3 : i32
    scf.if %8 {
      %12 = tpu.iota {dimensions = array<i32: 1>} : vector<1x8x1xi32>
      %c4_i32 = arith.constant 4 : i32
      %13 = vector.broadcast %c4_i32 : i32 to vector<1x8x1xi32>
      %14 = arith.cmpi slt, %12, %13 : vector<1x8x1xi32>
      %c0 = arith.constant 0 : index
      %c0_6 = arith.constant 0 : index
      %c0_7 = arith.constant 0 : index
      %15 = vector.load %arg3[%c0, %c0_6, %c0_7] : memref<2x8x1024xf32, #tpu.memory_space<vmem>>, vector<2x8x1024xf32>
      %cst = arith.constant 0.000000e+00 : f32
      %16 = vector.shape_cast %14 : vector<1x8x1xi1> to vector<1x8x1xi1>
      %17 = vector.broadcast %16 : vector<1x8x1xi1> to vector<2x8x1024xi1>
      %18 = vector.broadcast %cst : f32 to vector<2x8x1024xf32>
      %19 = arith.select %17, %15, %18 : vector<2x8x1024xi1>, vector<2x8x1024xf32>
      %c0_8 = arith.constant 0 : index
      %c0_9 = arith.constant 0 : index
      %20 = vector.load %arg13[%c0_8, %c0_9] : memref<2x1024xf32, #tpu.memory_space<vmem>>, vector<2x1024xf32>
      %cst_10 = arith.constant dense<0.000000e+00> : vector<2x1024xf32>
      %21 = vector.multi_reduction <add>, %19, %cst_10 [1] : vector<2x8x1024xf32> to vector<2x1024xf32>
      %22 = arith.addf %20, %21 : vector<2x1024xf32>
      %c0_11 = arith.constant 0 : index
      %c0_12 = arith.constant 0 : index
      %23 = vector.load %arg13[%c0_11, %c0_12] : memref<2x1024xf32, #tpu.memory_space<vmem>>, vector<2x1024xf32>
      tpu.vector_store %arg13[%c0_11, %c0_12], %22 {strides = array<i32>} : memref<2x1024xf32, #tpu.memory_space<vmem>>, vector<2x1024xf32>,
    } else {
    }
    %c2_i32_4 = arith.constant 2 : i32
    %9 = arith.cmpi eq, %arg1, %c2_i32_4 : i32
    %10 = arith.extui %9 : i1 to i32
    %c0_i32_5 = arith.constant 0 : i32
    %11 = arith.cmpi ne, %10, %c0_i32_5 : i32
    scf.if %11 {
      %c0 = arith.constant 0 : index
      %c0_6 = arith.constant 0 : index
      %12 = vector.load %arg13[%c0, %c0_6] : memref<2x1024xf32, #tpu.memory_space<vmem>>, vector<2x1024xf32>
      %cst = arith.constant 5.000000e-02 : f32
      %13 = vector.broadcast %cst : f32 to vector<2x1024xf32>
      %14 = arith.mulf %12, %13 : vector<2x1024xf32>
      %15 = arith.truncf %14 : vector<2x1024xf32> to vector<2x1024xbf16>
      %c0_7 = arith.constant 0 : index
      %c0_8 = arith.constant 0 : index
      %16 = vector.load %arg4[%c0_7, %c0_8] : memref<1024x768xbf16, #tpu.memory_space<vmem>>, vector<1024x768xbf16>
      %cst_9 = arith.constant dense<0.000000e+00> : vector<2x768xf32>
      %17 = tpu.matmul %15, %16, %cst_9 {dimension_numbers = #tpu.dot_dimension_numbers<[1], [0], [0], [1], [0, 0, 1, 1], [], []>} : vector<2x1024xbf16>, vector<1024x768xbf16>, vector<2x768xf32> -> vector<2x768xf32>
      %c0_10 = arith.constant 0 : index
      %c0_11 = arith.constant 0 : index
      %18 = vector.load %arg5[%c0_10, %c0_11] : memref<1x768xf32, #tpu.memory_space<vmem>>, vector<1x768xf32>
      %19 = vector.broadcast %18 : vector<1x768xf32> to vector<2x768xf32>
      %20 = arith.addf %17, %19 : vector<2x768xf32>
      %c0_12 = arith.constant 0 : index
      %c0_13 = arith.constant 0 : index
      %21 = vector.load %arg2[%c0_12, %c0_13] : memref<2x768xf32, #tpu.memory_space<vmem>>, vector<2x768xf32>
      %c0_14 = arith.constant 0 : index
      %c0_15 = arith.constant 0 : index
      %22 = vector.load %arg6[%c0_14, %c0_15] : memref<768x128xf32, #tpu.memory_space<vmem>>, vector<768x128xf32>
      %cst_16 = arith.constant dense<0.000000e+00> : vector<2x128xf32>
      %23 = tpu.matmul %21, %22, %cst_16 {dimension_numbers = #tpu.dot_dimension_numbers<[1], [0], [0], [1], [0, 0, 1, 1], [], []>} : vector<2x768xf32>, vector<768x128xf32>, vector<2x128xf32> -> vector<2x128xf32>
      %c0_17 = arith.constant 0 : index
      %c0_18 = arith.constant 0 : index
      %24 = vector.load %arg7[%c0_17, %c0_18] : memref<768x128xf32, #tpu.memory_space<vmem>>, vector<768x128xf32>
      %cst_19 = arith.constant dense<0.000000e+00> : vector<2x128xf32>
      %25 = tpu.matmul %20, %24, %cst_19 {dimension_numbers = #tpu.dot_dimension_numbers<[1], [0], [0], [1], [0, 0, 1, 1], [], []>} : vector<2x768xf32>, vector<768x128xf32>, vector<2x128xf32> -> vector<2x128xf32>
      %26 = arith.addf %23, %25 : vector<2x128xf32>
      %c0_20 = arith.constant 0 : index
      %c0_21 = arith.constant 0 : index
      %27 = vector.load %arg8[%c0_20, %c0_21] : memref<1x128xf32, #tpu.memory_space<vmem>>, vector<1x128xf32>
      %28 = vector.broadcast %27 : vector<1x128xf32> to vector<2x128xf32>
      %29 = arith.addf %26, %28 : vector<2x128xf32>
      %c0_22 = arith.constant 0 : index
      %c0_23 = arith.constant 0 : index
      %30 = vector.load %arg11[%c0_22, %c0_23] : memref<2x128xf32, #tpu.memory_space<vmem>>, vector<2x128xf32>
      tpu.vector_store %arg11[%c0_22, %c0_23], %29 {strides = array<i32>} : memref<2x128xf32, #tpu.memory_space<vmem>>, vector<2x128xf32>,
      %c0_24 = arith.constant 0 : index
      %c0_25 = arith.constant 0 : index
      %c0_26 = arith.constant 0 : index
      %31 = vector.load %arg9[%c0_24, %c0_25, %c0_26] : memref<2x2x768xf32, #tpu.memory_space<vmem>>, vector<2x2x768xf32>
      %32 = vector.shape_cast %20 : vector<2x768xf32> to vector<2x1x768xf32>
      %33 = vector.broadcast %32 : vector<2x1x768xf32> to vector<2x2x768xf32>
      %34 = arith.mulf %33, %31 : vector<2x2x768xf32>
      %cst_27 = arith.constant dense<0.000000e+00> : vector<2x2xf32>
      %35 = vector.multi_reduction <add>, %34, %cst_27 [2] : vector<2x2x768xf32> to vector<2x2xf32>
      %36 = arith.mulf %20, %20 : vector<2x768xf32>
      %cst_28 = arith.constant dense<0.000000e+00> : vector<2xf32>
      %37 = vector.multi_reduction <add>, %36, %cst_28 [1] : vector<2x768xf32> to vector<2xf32>
      %38 = vector.shape_cast %37 : vector<2xf32> to vector<2x1xf32>
      %39 = math.sqrt %38 : vector<2x1xf32>
      %cst_29 = arith.constant 9.99999993E-9 : f32
      %40 = vector.broadcast %cst_29 : f32 to vector<2x1xf32>
      %41 = arith.maximumf %39, %40 : vector<2x1xf32>
      %c0_30 = arith.constant 0 : index
      %c0_31 = arith.constant 0 : index
      %42 = vector.load %arg10[%c0_30, %c0_31] : memref<2x2xf32, #tpu.memory_space<vmem>>, vector<2x2xf32>
      %cst_32 = arith.constant 9.99999993E-9 : f32
      %43 = vector.broadcast %cst_32 : f32 to vector<2x2xf32>
      %44 = arith.maximumf %42, %43 : vector<2x2xf32>
      %45 = vector.broadcast %41 : vector<2x1xf32> to vector<2x2xf32>
      %46 = arith.mulf %45, %44 : vector<2x2xf32>
      %47 = arith.divf %35, %46 : vector<2x2xf32>
      %c0_33 = arith.constant 0 : index
      %c0_34 = arith.constant 0 : index
      %48 = vector.load %arg12[%c0_33, %c0_34] : memref<2x2xf32, #tpu.memory_space<vmem>>, vector<2x2xf32>
      tpu.vector_store %arg12[%c0_33, %c0_34], %47 {strides = array<i32>} : memref<2x2xf32, #tpu.memory_space<vmem>>, vector<2x2xf32>,
    } else {
    }
    return
  }
  func.func @transform_0(%arg0: i32, %arg1: i32) -> (i32, i32) {
    %c0_i32 = arith.constant 0 : i32
    %c0_i32_0 = arith.constant 0 : i32
    return %arg0, %c0_i32 : i32, i32
  }
  func.func @transform_1(%arg0: i32, %arg1: i32) -> (i32, i32, i32) {
    %c0_i32 = arith.constant 0 : i32
    %c0_i32_0 = arith.constant 0 : i32
    return %arg0, %arg1, %c0_i32 : i32, i32, i32
  }
  func.func @transform_2(%arg0: i32, %arg1: i32) -> (i32, i32) {
    %c0_i32 = arith.constant 0 : i32
    %c0_i32_0 = arith.constant 0 : i32
    %c0_i32_1 = arith.constant 0 : i32
    return %c0_i32, %c0_i32_0 : i32, i32
  }
  func.func @transform_3(%arg0: i32, %arg1: i32) -> (i32, i32) {
    %c0_i32 = arith.constant 0 : i32
    %c0_i32_0 = arith.constant 0 : i32
    %c0_i32_1 = arith.constant 0 : i32
    return %c0_i32, %c0_i32_0 : i32, i32
  }
  func.func @transform_4(%arg0: i32, %arg1: i32) -> (i32, i32) {
    %c0_i32 = arith.constant 0 : i32
    %c0_i32_0 = arith.constant 0 : i32
    %c0_i32_1 = arith.constant 0 : i32
    return %c0_i32, %c0_i32_0 : i32, i32
  }
  func.func @transform_5(%arg0: i32, %arg1: i32) -> (i32, i32) {
    %c0_i32 = arith.constant 0 : i32
    %c0_i32_0 = arith.constant 0 : i32
    %c0_i32_1 = arith.constant 0 : i32
    return %c0_i32, %c0_i32_0 : i32, i32
  }
  func.func @transform_6(%arg0: i32, %arg1: i32) -> (i32, i32) {
    %c0_i32 = arith.constant 0 : i32
    %c0_i32_0 = arith.constant 0 : i32
    %c0_i32_1 = arith.constant 0 : i32
    return %c0_i32, %c0_i32_0 : i32, i32
  }
  func.func @transform_7(%arg0: i32, %arg1: i32) -> (i32, i32, i32) {
    %c0_i32 = arith.constant 0 : i32
    %c0_i32_0 = arith.constant 0 : i32
    %c0_i32_1 = arith.constant 0 : i32
    return %arg0, %c0_i32, %c0_i32_0 : i32, i32, i32
  }
  func.func @transform_8(%arg0: i32, %arg1: i32) -> (i32, i32) {
    %c0_i32 = arith.constant 0 : i32
    %c0_i32_0 = arith.constant 0 : i32
    return %arg0, %c0_i32 : i32, i32
  }
  func.func @transform_9(%arg0: i32, %arg1: i32) -> (i32, i32) {
    %c0_i32 = arith.constant 0 : i32
    %c0_i32_0 = arith.constant 0 : i32
    return %arg0, %c0_i32 : i32, i32
  }
  func.func @transform_10(%arg0: i32, %arg1: i32) -> (i32, i32) {
    %c0_i32 = arith.constant 0 : i32
    %c0_i32_0 = arith.constant 0 : i32
    return %arg0, %c0_i32 : i32, i32
  }
}

</mosaic_0001>

<bundles_post_ra>
// kernel: _emotion_call.1
= control target key start
LH: loop header
LB: loop body
LE: loop exit
PB: predicated region body
PF: predicated region fallthrough
CT: control target
= control target key end

     0   :  { %16 = vsyncpa [#allocation5], 0  ;;  %s8822_s0 = inlined_call_operand.vmem [shape: f32[2,768], index: 0, kind: input, shape index: {}]   ;;  %s8823_s1 = inlined_call_operand.vmem [shape: f32[2,20,1024], index: 1, kind: input, shape index: {}]   ;;  %s8824_s2 = inlined_call_operand.vmem [shape: bf16[1024,768], index: 2, kind: input, shape index: {}]   ;;  %s8825_s3 = inlined_call_operand.vmem [shape: f32[1,768], index: 3, kind: input, shape index: {}]   ;;  %s8826_s4 = inlined_call_operand.vmem [shape: f32[768,128], index: 4, kind: input, shape index: {}]   ;;  %s8827_s5 = inlined_call_operand.vmem [shape: f32[768,128], index: 5, kind: input, shape index: {}]   ;;  %s8828_s6 = inlined_call_operand.vmem [shape: f32[1,128], index: 6, kind: input, shape index: {}]   ;;  %s8829_s7 = inlined_call_operand.vmem [shape: f32[2,2,768], index: 7, kind: input, shape index: {}]   ;;  %s8830_s8 = inlined_call_operand.vmem [shape: f32[2,2], index: 8, kind: input, shape index: {}]   ;;  %s8831_s9 = inlined_call_operand.hbm [shape: f32[2,128], index: 9, kind: output, shape index: {0}]   ;;  %s8832_s10 = inlined_call_operand.hbm [shape: f32[2,2], index: 10, kind: output, shape index: {1}]  }
   0x1   :  { %17 = vsyncpa [#allocation7], 0  ;;  %s6611_s13 = smov 0   ;;  %s6613_s14 = smov 0  }
   0x2   :  { %s6615_s15 = smov 0   ;;  %s6617_s16 = smov 0  }
   0x3   :  { %s6619_s17 = smov 0  }
   0x4 LB: > { %s4952_s18 = sadd.s32 4294967295, %s6547_s17   ;;  %s32_s19 = sadd.s32 1, %s6543_s16  ;;  %s6547_s17 = sphi %s6619_s17, %s23_s17   ;;  %s6543_s16 = sphi %s6617_s16, %s8837_s16   ;;  %s6539_s15 = sphi %s6615_s15, %s8836_s15   ;;  %s6535_s14 = sphi %s6613_s14, %s8835_s14   ;;  %s6531_s13 = sphi %s6611_s13, %s8834_s13  }
   0x5   : > { %p33_p0 = scmp.ge.s32.totalorder %s32_s19, 3  ;;  %p77_p1 = scmp.ne.s32.totalorder %s6535_s14, %s6531_s13 }
   0x6   : > { %p78_p2 = scmp.eq.s32.totalorder %s6547_s17, 0  ;;  %s70_s21 = sadd.s32 1, %s6535_s14 }
   0x7   : > { %s8839_s19 = smov (%p33_p0, %s32_s19), 0  ;;  %p4957_p5 = scmp.ge.s32.totalorder %s6547_s17, 3 }
   0x8   : > { %p79_p3 = por %p78_p2, %p77_p1  ;;  %s66_s20 = ssub.s32 %s6543_s16, %s8839_s19 }
   0x9   : > { %p68_p4 = scmp.eq.s32.totalorder %s66_s20, 0  ;;  %352 = sbr.rel (%p4957_p5) target bundleno = 28 (0x1c), region = 48 }
   0xb   : > { %s6647_s22 = scalar_select %p68_p4, %s6535_s14, %s70_s21  }
  0x10   : > { %355 = sbr.rel (!%p79_p3) target bundleno = 28 (0x1c), region = 52  ;;  %s357_s23 = sand.u32 (%p79_p3), 1, %s6535_s14  }
  0x11   : > { %s5360_s24 = sshll.u32 (%p79_p3), %s6543_s16, 6  ;;  %s4958_s25 = sshll.u32 (%p79_p3), %s357_s23, 7 }
  0x12   : > { %s6655_s28 = scalar_lea.vmem (%p79_p3), %s8823_s1, %s5360_s24  ;;  %s359_s29 = scalar_lea.vmem (%p79_p3), [#allocation3], %s4958_s25 }
  0x13   : > { %v378_v0 = vld [vmem:[%s6655_s28] sm:$0xff] (%p79_p3)  ;;  %v380_v1 = vld [vmem:[%s6655_s28 + $0x8] sm:$0xff] (%p79_p3)  ;;  %v382_v2 = vld [vmem:[%s6655_s28 + $0x10] sm:$0xff] (%p79_p3) }
  0x14   : > { %379 = vst [vmem:[%s359_s29] sm:$0xff] (%p79_p3), %v378_v0  ;;  %381 = vst [vmem:[%s359_s29 + $0x8] sm:$0xff] (%p79_p3), %v380_v1  ;;  %v384_v3 = vld [vmem:[%s6655_s28 + $0x18] sm:$0xff] (%p79_p3)  ;;  %v386_v4 = vld [vmem:[%s6655_s28 + $0x20] sm:$0xff] (%p79_p3) }
  0x15   : > { %383 = vst [vmem:[%s359_s29 + $0x10] sm:$0xff] (%p79_p3), %v382_v2  ;;  %v388_v5 = vld [vmem:[%s6655_s28 + $0x28] sm:$0xff] (%p79_p3)  ;;  %385 = vst [vmem:[%s359_s29 + $0x18] sm:$0xff] (%p79_p3), %v384_v3  ;;  %v390_v6 = vld [vmem:[%s6655_s28 + $0x30] sm:$0xff] (%p79_p3) }
  0x16   : > { %387 = vst [vmem:[%s359_s29 + $0x20] sm:$0xff] (%p79_p3), %v386_v4  ;;  %389 = vst [vmem:[%s359_s29 + $0x28] sm:$0xff] (%p79_p3), %v388_v5  ;;  %v392_v7 = vld [vmem:[%s6655_s28 + $0x38] sm:$0xff] (%p79_p3)  ;;  %v394_v8 = vld [vmem:[%s6655_s28 + $0xc0] sm:$0xff] (%p79_p3) }
  0x17   : > { %391 = vst [vmem:[%s359_s29 + $0x30] sm:$0xff] %v390_v6  ;;  %393 = vst [vmem:[%s359_s29 + $0x38] sm:$0xff] %v392_v7  ;;  %v396_v9 = vld [vmem:[%s6655_s28 + $0xc8] sm:$0xff]  ;;  %v398_v10 = vld [vmem:[%s6655_s28 + $0xd0] sm:$0xff] }
  0x18   : > { %395 = vst [vmem:[%s359_s29 + $0x40] sm:$0xff] %v394_v8  ;;  %v400_v11 = vld [vmem:[%s6655_s28 + $0xd8] sm:$0xff]  ;;  %397 = vst [vmem:[%s359_s29 + $0x48] sm:$0xff] %v396_v9  ;;  %v402_v12 = vld [vmem:[%s6655_s28 + $0xe0] sm:$0xff] }
  0x19   : > { %399 = vst [vmem:[%s359_s29 + $0x50] sm:$0xff] %v398_v10  ;;  %401 = vst [vmem:[%s359_s29 + $0x58] sm:$0xff] %v400_v11  ;;  %v404_v13 = vld [vmem:[%s6655_s28 + $0xe8] sm:$0xff]  ;;  %v406_v14 = vld [vmem:[%s6655_s28 + $0xf0] sm:$0xff] }
  0x1a   : > { %403 = vst [vmem:[%s359_s29 + $0x60] sm:$0xff] %v402_v12  ;;  %405 = vst [vmem:[%s359_s29 + $0x68] sm:$0xff] %v404_v13  ;;  %v408_v15 = vld [vmem:[%s6655_s28 + $0xf8] sm:$0xff] }
  0x1b   : > { %407 = vst [vmem:[%s359_s29 + $0x70] sm:$0xff] %v406_v14  ;;  %409 = vst [vmem:[%s359_s29 + $0x78] sm:$0xff] %v408_v15 }
  0x1c PF: > { %p4961_p6 = scmp.ge.s32.totalorder %s6547_s17, 1  ;;  %p414_p7 = scmp.lt.s32.totalorder %s6547_s17, 4 }
  0x1e   : > { %p415_p8 = pnand %p4961_p6, %p414_p7 }
  0x1f   : > { %s421_s30 = sand.u32 (!%p415_p8), 1, %s6531_s13   ;;  %p4963_p9 = scmp.ne.s32.totalorder (!%p415_p8), %s6539_s15, 0 }
  0x20   : > { %418 = sbr.rel (%p415_p8) target bundleno = 1249 (0x4e1), region = 75  ;;  %s4962_s11 = sshll.u32 (!%p415_p8), %s421_s30, 7 }
  0x21   : > { %s6676_s12 = scalar_lea.vmem (!%p415_p8), [#allocation3], %s4962_s11 }
  0x27   : > { %488 = sbr.rel (%p4963_p9) target bundleno = 46 (0x2e), region = 83  ;;  %v6549_v16 = vmov (!%p4963_p9), 0.0  }
  0x28   : > { %489 = vst [vmem:[#allocation2] sm:$0xff] (!%p4963_p9), %v6549_v16  ;;  %490 = vst [vmem:[#allocation2 + $0x8] sm:$0xff] (!%p4963_p9), %v6549_v16 }
  0x2e PF: > { %p4964_p10 = scmp.ge.s32.totalorder %s6539_s15, 2 }
  0x2f   : > { %v497_v17 = vld [vmem:[%s6676_s12] sm:$0xff] (!%p4964_p10)  ;;  %v498_v18 = vld [vmem:[%s6676_s12 + $0x8] sm:$0xff] (!%p4964_p10)  ;;  %v499_v19 = vld [vmem:[%s6676_s12 + $0x10] sm:$0xff] (!%p4964_p10)  ;;  %v630_v22 = vlaneseq (!%p4964_p10)  ;;  %v6550_v29 = vmov (!%p4964_p10), 1983009808   ;;  %vm698_vm0 = vcmask (!%p4964_p10), 1041409  }
  0x30   : > { %494 = sbr.rel (%p4964_p10) target bundleno = 91 (0x5b), region = 87  ;;  %v500_v20 = vld [vmem:[%s6676_s12 + $0x18] sm:$0xff] (!%p4964_p10)  ;;  %v513_v21 = vrot.slane (!%p4964_p10), %v497_v17, 4  ;;  %v501_v23 = vld [vmem:[%s6676_s12 + $0x20] sm:$0xff] (!%p4964_p10)  ;;  %v502_v24 = vld [vmem:[%s6676_s12 + $0x28] sm:$0xff] (!%p4964_p10)  ;;  %v519_v26 = vrot.slane (!%p4964_p10), %v498_v18, 4  ;;  %v6687_v30 = vunpack.c.l.s4 (!%p4964_p10), %v6550_v29 }
  0x31   : > { %v503_v25 = vld [vmem:[%s6676_s12 + $0x30] sm:$0xff] (!%p4964_p10)  ;;  %v525_v27 = vrot.slane (!%p4964_p10), %v499_v19, 4  ;;  %v531_v28 = vrot.slane (!%p4964_p10), %v500_v20, 4  ;;  %v504_v31 = vld [vmem:[%s6676_s12 + $0x38] sm:$0xff] (!%p4964_p10)  ;;  %v537_v33 = vrot.slane (!%p4964_p10), %v501_v23, 4  ;;  %v543_v34 = vrot.slane (!%p4964_p10), %v502_v24, 4 }
  0x32   : > { %v514_v32 = vadd.f32 (!%p4964_p10), %v513_v21, %v497_v17  ;;  %v549_v35 = vrot.slane (!%p4964_p10), %v503_v25, 4  ;;  %v520_v36 = vadd.f32 (!%p4964_p10), %v519_v26, %v498_v18  ;;  %v555_v39 = vrot.slane (!%p4964_p10), %v504_v31, 4  ;;  %v505_v60 = vld [vmem:[%s6676_s12 + $0x40] sm:$0xff] (!%p4964_p10)  ;;  %v506_v1 = vld [vmem:[%s6676_s12 + $0x48] sm:$0xff] (!%p4964_p10)  ;;  %v507_v2 = vld [vmem:[%s6676_s12 + $0x50] sm:$0xff] (!%p4964_p10) }
  0x33   : > { %v526_v37 = vadd.f32 (!%p4964_p10), %v525_v27, %v499_v19  ;;  %v532_v38 = vadd.f32 (!%p4964_p10), %v531_v28, %v500_v20  ;;  %v538_v41 = vadd.f32 (!%p4964_p10), %v537_v33, %v501_v23  ;;  %v544_v42 = vadd.f32 (!%p4964_p10), %v543_v34, %v502_v24  ;;  %v508_v3 = vld [vmem:[%s6676_s12 + $0x58] sm:$0xff] (!%p4964_p10)  ;;  %v509_v8 = vld [vmem:[%s6676_s12 + $0x60] sm:$0xff] (!%p4964_p10)  ;;  %v510_v9 = vld [vmem:[%s6676_s12 + $0x68] sm:$0xff] (!%p4964_p10) }
  0x34   : > { %v515_v40 = vrot.slane (!%p4964_p10), %v514_v32, 2  ;;  %v550_v43 = vadd.f32 (!%p4964_p10), %v549_v35, %v503_v25  ;;  %v521_v44 = vrot.slane (!%p4964_p10), %v520_v36, 2  ;;  %v556_v47 = vadd.f32 (!%p4964_p10), %v555_v39, %v504_v31  ;;  %v511_v10 = vld [vmem:[%s6676_s12 + $0x70] sm:$0xff] (!%p4964_p10)  ;;  %v512_v15 = vld [vmem:[%s6676_s12 + $0x78] sm:$0xff] (!%p4964_p10) }
  0x35   : > { %v527_v45 = vrot.slane (!%p4964_p10), %v526_v37, 2  ;;  %v533_v46 = vrot.slane (!%p4964_p10), %v532_v38, 2  ;;  %v539_v49 = vrot.slane (!%p4964_p10), %v538_v41, 2  ;;  %v545_v50 = vrot.slane (!%p4964_p10), %v544_v42, 2 }
  0x36   : > { %v516_v48 = vadd.f32 (!%p4964_p10), %v515_v40, %v514_v32  ;;  %v551_v51 = vrot.slane (!%p4964_p10), %v550_v43, 2  ;;  %v522_v52 = vadd.f32 (!%p4964_p10), %v521_v44, %v520_v36  ;;  %v557_v55 = vrot.slane (!%p4964_p10), %v556_v47, 2 }
  0x37   : > { %v528_v53 = vadd.f32 %v527_v45, %v526_v37  ;;  %v534_v54 = vadd.f32 %v533_v46, %v532_v38  ;;  %v540_v57 = vadd.f32 %v539_v49, %v538_v41  ;;  %v546_v58 = vadd.f32 %v545_v50, %v544_v42 }
  0x38   : > { %v517_v56 = vrot.slane %v516_v48, 1  ;;  %v552_v59 = vadd.f32 %v551_v51, %v550_v43  ;;  %v523_v61 = vrot.slane %v522_v52, 1  ;;  %v558_v0 = vadd.f32 %v557_v55, %v556_v47 }
  0x39   : > { %v529_v62 = vrot.slane %v528_v53, 1  ;;  %v535_v63 = vrot.slane %v534_v54, 1  ;;  %v541_v5 = vrot.slane %v540_v57, 1  ;;  %v547_v6 = vrot.slane %v546_v58, 1 }
  0x3a   : > { %v6694_v4 = vadd.f32 %v517_v56, %v516_v48  ;;  %v553_v7 = vrot.slane %v552_v59, 1  ;;  %v6699_v11 = vadd.f32 %v523_v61, %v522_v52  ;;  %v559_v14 = vrot.slane %v558_v0, 1 }
  0x3b   : > { %v6701_v12 = vadd.f32 %v529_v62, %v528_v53  ;;  %v6703_v13 = vadd.f32 %v535_v63, %v534_v54  ;;  %v6706_v16 = vadd.f32 %v541_v5, %v540_v57  ;;  %v6708_v17 = vadd.f32 %v547_v6, %v546_v58 }
  0x3c   : > { %v6710_v18 = vadd.f32 %v553_v7, %v552_v59  ;;  %v561_v19 = vrot.slane %v505_v60, 4  ;;  %v6712_v20 = vadd.f32 %v559_v14, %v558_v0  ;;  %v567_v21 = vrot.slane %v506_v1, 4 }
  0x3d   : > { %v573_v23 = vrot.slane %v507_v2, 4  ;;  %v579_v24 = vrot.slane %v508_v3, 4  ;;  %v585_v26 = vrot.slane %v509_v8, 4  ;;  %v591_v27 = vrot.slane %v510_v9, 4 }
  0x3e   : > { %v562_v25 = vadd.f32 %v561_v19, %v505_v60  ;;  %v597_v28 = vrot.slane %v511_v10, 4  ;;  %v568_v29 = vadd.f32 %v567_v21, %v506_v1  ;;  %v603_v33 = vrot.slane %v512_v15, 4 }
  0x3f   : > { %v574_v31 = vadd.f32 %v573_v23, %v507_v2  ;;  %v580_v32 = vadd.f32 %v579_v24, %v508_v3  ;;  %v586_v35 = vadd.f32 %v585_v26, %v509_v8  ;;  %v592_v36 = vadd.f32 %v591_v27, %v510_v9 }
  0x40   : > { %v563_v34 = vrot.slane %v562_v25, 2  ;;  %v598_v37 = vadd.f32 %v597_v28, %v511_v10  ;;  %v569_v38 = vrot.slane %v568_v29, 2  ;;  %v604_v41 = vadd.f32 %v603_v33, %v512_v15  ;;  %v495_v33 = vld [vmem:[#allocation2] sm:$0xff] }
  0x41   : > { %v575_v39 = vrot.slane %v574_v31, 2  ;;  %v581_v40 = vrot.slane %v580_v32, 2  ;;  %v587_v43 = vrot.slane %v586_v35, 2  ;;  %v593_v44 = vrot.slane %v592_v36, 2 }
  0x42   : > { %v564_v42 = vadd.f32 %v563_v34, %v562_v25  ;;  %v599_v45 = vrot.slane %v598_v37, 2  ;;  %v570_v46 = vadd.f32 %v569_v38, %v568_v29  ;;  %v605_v49 = vrot.slane %v604_v41, 2  ;;  %v496_v34 = vld [vmem:[#allocation2 + $0x8] sm:$0xff] }
  0x43   : > { %v576_v47 = vadd.f32 %v575_v39, %v574_v31  ;;  %v582_v48 = vadd.f32 %v581_v40, %v580_v32  ;;  %v588_v51 = vadd.f32 %v587_v43, %v586_v35  ;;  %v594_v52 = vadd.f32 %v593_v44, %v592_v36 }
  0x44   : > { %v565_v50 = vrot.slane %v564_v42, 1  ;;  %v600_v53 = vadd.f32 %v599_v45, %v598_v37  ;;  %v571_v54 = vrot.slane %v570_v46, 1  ;;  %v606_v57 = vadd.f32 %v605_v49, %v604_v41 }
  0x45   : > { %v577_v55 = vrot.slane %v576_v47, 1  ;;  %v583_v56 = vrot.slane %v582_v48, 1  ;;  %v589_v59 = vrot.slane %v588_v51, 1  ;;  %v595_v60 = vrot.slane %v594_v52, 1 }
  0x46   : > { %v566_v58 = vadd.f32 %v565_v50, %v564_v42  ;;  %v601_v61 = vrot.slane %v600_v53, 1  ;;  %v572_v62 = vadd.f32 %v571_v54, %v570_v46  ;;  %v607_v1 = vrot.slane %v606_v57, 1 }
  0x47   : > { %v578_v63 = vadd.f32 %v577_v55, %v576_v47  ;;  %v584_v0 = vadd.f32 %v583_v56, %v582_v48  ;;  %v590_v2 = vadd.f32 %v589_v59, %v588_v51  ;;  %v596_v3 = vadd.f32 %v595_v60, %v594_v52 }
  0x48   : > { %v602_v5 = vadd.f32 %v601_v61, %v600_v53  ;;  %v625_v6 = vcombine.low %v6694_v4, %v6699_v11  ;;  %v608_v7 = vadd.f32 %v607_v1, %v606_v57  ;;  %v626_v8 = vcombine.low %v6701_v12, %v6703_v13 }
  0x49   : > { %v629_v9 = vunpack.c.0.s8 %v6687_v30  ;;  %v631_v10 = vshrl.u32 %v630_v22, 7  ;;  %v642_v14 = vcombine.low %v6706_v16, %v6708_v17  ;;  %v643_v15 = vcombine.low %v6710_v18, %v6712_v20 }
  0x4a   : > { %v659_v19 = vcombine.low %v566_v58, %v572_v62  ;;  %v660_v21 = vcombine.low %v578_v63, %v584_v0  ;;  %v676_v24 = vcombine.low %v590_v2, %v596_v3  ;;  %v677_v25 = vcombine.low %v602_v5, %v608_v7 }
  0x4b   : > { %v632_v23 = vsub.s32 %v629_v9, %v631_v10  ;;  %vm700_vm1 = vcmask 1043459   ;;  %vm702_vm2 = vcmask 1045509   ;;  %vm704_vm3 = vcmask 1047559  }
  0x4d   : > { %v633_v4 = vrot.slane %v625_v6, %v632_v23  ;;  %v640_v11 = vrot.slane %v626_v8, %v632_v23  ;;  %v650_v26 = vrot.slane %v642_v14, %v632_v23  ;;  %v657_v27 = vrot.slane %v643_v15, %v632_v23 }
  0x4e   : > { %v667_v12 = vrot.slane %v659_v19, %v632_v23  ;;  %v674_v13 = vrot.slane %v660_v21, %v632_v23  ;;  %v684_v30 = vrot.slane %v676_v24, %v632_v23  ;;  %v691_v28 = vrot.slane %v677_v25, %v632_v23 }
  0x4f   : > { %v641_v22 = vcombine.low %v633_v4, %v640_v11  ;;  %v658_v29 = vcombine.low %v650_v26, %v657_v27 }
  0x50   : > { %v675_v31 = vcombine.low %v667_v12, %v674_v13  ;;  %v692_v16 = vcombine.low %v684_v30, %v691_v28 }
  0x52   : > { %v697_v17 = vrot.slane %v675_v31, 7  ;;  %v708_v18 = vrot.slane %v692_v16, 7 }
  0x54   : > { %v699_v20 = vsel %vm698_vm0, %v697_v17, %v641_v22  ;;  %v709_v32 = vsel %vm698_vm0, %v708_v18, %v658_v29 }
  0x55   : > { %v701_v35 = vsel %vm700_vm1, %v697_v17, %v699_v20  ;;  %v710_v36 = vsel %vm700_vm1, %v708_v18, %v709_v32 }
  0x56   : > { %v703_v37 = vsel %vm702_vm2, %v697_v17, %v701_v35  ;;  %v711_v38 = vsel %vm702_vm2, %v708_v18, %v710_v36 }
  0x57   : > { %v705_v39 = vsel %vm704_vm3, %v697_v17, %v703_v37  ;;  %v712_v40 = vsel %vm704_vm3, %v708_v18, %v711_v38 }
  0x58   : > { %v715_v41 = vadd.f32 %v705_v39, %v495_v33  ;;  %v716_v42 = vadd.f32 %v712_v40, %v496_v34 }
  0x5a   : > { %717 = vst [vmem:[#allocation2] sm:$0xff] %v715_v41  ;;  %718 = vst [vmem:[#allocation2 + $0x8] sm:$0xff] %v716_v42 }
  0x5b PF: > { %p4965_p11 = scmp.ne.s32.totalorder %s6539_s15, 2 }
  0x5c   : > { %v5864_v43 = vld [vmem:[%s8824_s2 + $0x4] ss:$24 sps:$4 sm:$0xff] (!%p4965_p11)   ;;  %v5868_v45 = vld [vmem:[%s8824_s2] ss:$24 sps:$4 sm:$0xff] (!%p4965_p11)   ;;  %v5870_v47 = vld [vmem:[%s8824_s2 + $0x34] ss:$24 sps:$4 sm:$0xff] (!%p4965_p11)   ;;  %v723_v4 = vlaneseq (!%p4965_p11) }
  0x5d   : > { %722 = sbr.rel (%p4965_p11) target bundleno = 1201 (0x4b1), region = 91  ;;  %v5866_v44 = vld [vmem:[%s8824_s2 + $0x304] ss:$24 sps:$4 sm:$0xff] (!%p4965_p11)   ;;  %3360 = vmatprep.subr.bf16.mxu1 (!%p4965_p11), %v5864_v43  ;;  %v5869_v46 = vld [vmem:[%s8824_s2 + $0x300] ss:$24 sps:$4 sm:$0xff] (!%p4965_p11)   ;;  %v726_v32 = vld [vmem:[%s6676_s12] sm:$0xff] (!%p4965_p11) }
  0x5e   : > { %3401 = vmatprep.subr.bf16.mxu0 (!%p4965_p11), %v5866_v44  ;;  %3361 = vmatpush1.bf16.msra.mxu1 (!%p4965_p11), %v5868_v45  ;;  %v5872_v48 = vld [vmem:[%s8824_s2 + $0x334] ss:$24 sps:$4 sm:$0xff] (!%p4965_p11)   ;;  %v5874_v49 = vld [vmem:[%s8824_s2 + $0x30] ss:$24 sps:$4 sm:$0xff] (!%p4965_p11)   ;;  %v5876_v51 = vld [vmem:[%s8824_s2 + $0x64] ss:$24 sps:$4 sm:$0xff] (!%p4965_p11)  }
  0x5f   : > { %3402 = vmatpush1.bf16.msra.mxu0 (!%p4965_p11), %v5869_v46  ;;  %3362 = vmatprep.subr.bf16.mxu1 (!%p4965_p11), %v5870_v47  ;;  %v5875_v50 = vld [vmem:[%s8824_s2 + $0x330] ss:$24 sps:$4 sm:$0xff] (!%p4965_p11)   ;;  %v5878_v52 = vld [vmem:[%s8824_s2 + $0x364] ss:$24 sps:$4 sm:$0xff] (!%p4965_p11)   ;;  %v5880_v53 = vld [vmem:[%s8824_s2 + $0x60] ss:$24 sps:$4 sm:$0xff] (!%p4965_p11)  }
  0x60   : > { %3403 = vmatprep.subr.bf16.mxu0 (!%p4965_p11), %v5872_v48  ;;  %v5881_v54 = vld [vmem:[%s8824_s2 + $0x360] ss:$24 sps:$4 sm:$0xff] (!%p4965_p11)   ;;  %v5882_v55 = vld [vmem:[%s8824_s2 + $0x94] ss:$24 sps:$4 sm:$0xff] (!%p4965_p11)   ;;  %v5886_v57 = vld [vmem:[%s8824_s2 + $0x90] ss:$24 sps:$4 sm:$0xff] (!%p4965_p11)  }
  0x61   : > { %v5884_v56 = vld [vmem:[%s8824_s2 + $0x394] ss:$24 sps:$4 sm:$0xff] (!%p4965_p11)   ;;  %v5887_v58 = vld [vmem:[%s8824_s2 + $0x390] ss:$24 sps:$4 sm:$0xff] (!%p4965_p11)   ;;  %v5888_v59 = vld [vmem:[%s8824_s2 + $0xc4] ss:$24 sps:$4 sm:$0xff] (!%p4965_p11)  }
  0x62   : > { %3363 = vmatpush1.bf16.msra.mxu1 (!%p4965_p11), %v5874_v49  ;;  %v5890_v60 = vld [vmem:[%s8824_s2 + $0x3c4] ss:$24 sps:$4 sm:$0xff] (!%p4965_p11)   ;;  %v5892_v61 = vld [vmem:[%s8824_s2 + $0xc0] ss:$24 sps:$4 sm:$0xff] (!%p4965_p11)   ;;  %v5894_v63 = vld [vmem:[%s8824_s2 + $0xf4] ss:$24 sps:$4 sm:$0xff] (!%p4965_p11)  }
  0x63   : > { %3404 = vmatpush1.bf16.msra.mxu0 (!%p4965_p11), %v5875_v50  ;;  %3364 = vmatprep.subr.bf16.mxu1 (!%p4965_p11), %v5876_v51  ;;  %v5893_v62 = vld [vmem:[%s8824_s2 + $0x3c0] ss:$24 sps:$4 sm:$0xff] (!%p4965_p11)   ;;  %v5896_v0 = vld [vmem:[%s8824_s2 + $0x3f4] ss:$24 sps:$4 sm:$0xff] (!%p4965_p11)   ;;  %v5898_v1 = vld [vmem:[%s8824_s2 + $0xf0] ss:$24 sps:$4 sm:$0xff] (!%p4965_p11)  }
  0x64   : > { %3405 = vmatprep.subr.bf16.mxu0 %v5878_v52  ;;  %v5899_v2 = vld [vmem:[%s8824_s2 + $0x3f0] ss:$24 sps:$4 sm:$0xff]   ;;  %v5900_v3 = vld [vmem:[%s8824_s2 + $0x124] ss:$24 sps:$4 sm:$0xff]   ;;  %v5904_v6 = vld [vmem:[%s8824_s2 + $0x120] ss:$24 sps:$4 sm:$0xff]  }
  0x65   : > { %v5902_v5 = vld [vmem:[%s8824_s2 + $0x424] ss:$24 sps:$4 sm:$0xff]   ;;  %v5905_v7 = vld [vmem:[%s8824_s2 + $0x420] ss:$24 sps:$4 sm:$0xff]   ;;  %v5906_v8 = vld [vmem:[%s8824_s2 + $0x154] ss:$24 sps:$4 sm:$0xff]  }
  0x66   : > { %3365 = vmatpush1.bf16.msra.mxu1 %v5880_v53  ;;  %v5908_v9 = vld [vmem:[%s8824_s2 + $0x454] ss:$24 sps:$4 sm:$0xff]   ;;  %v5910_v10 = vld [vmem:[%s8824_s2 + $0x150] ss:$24 sps:$4 sm:$0xff]   ;;  %v5912_v15 = vld [vmem:[%s8824_s2 + $0x184] ss:$24 sps:$4 sm:$0xff]  }
  0x67   : > { %3406 = vmatpush1.bf16.msra.mxu0 %v5881_v54  ;;  %3366 = vmatprep.subr.bf16.mxu1 %v5882_v55  ;;  %v5911_v14 = vld [vmem:[%s8824_s2 + $0x450] ss:$24 sps:$4 sm:$0xff]   ;;  %v5914_v19 = vld [vmem:[%s8824_s2 + $0x484] ss:$24 sps:$4 sm:$0xff]   ;;  %v5916_v21 = vld [vmem:[%s8824_s2 + $0x180] ss:$24 sps:$4 sm:$0xff]  }
  0x68   : > { %3407 = vmatprep.subr.bf16.mxu0 %v5884_v56  ;;  %v5917_v23 = vld [vmem:[%s8824_s2 + $0x480] ss:$24 sps:$4 sm:$0xff]   ;;  %v5918_v24 = vld [vmem:[%s8824_s2 + $0x1b4] ss:$24 sps:$4 sm:$0xff]   ;;  %v5922_v11 = vld [vmem:[%s8824_s2 + $0x1b0] ss:$24 sps:$4 sm:$0xff]  }
  0x69   : > { %v5920_v25 = vld [vmem:[%s8824_s2 + $0x4b4] ss:$24 sps:$4 sm:$0xff]   ;;  %v5923_v26 = vld [vmem:[%s8824_s2 + $0x4b0] ss:$24 sps:$4 sm:$0xff]   ;;  %v5924_v27 = vld [vmem:[%s8824_s2 + $0x1e4] ss:$24 sps:$4 sm:$0xff]  }
  0x6a   : > { %3367 = vmatpush1.bf16.msra.mxu1 %v5886_v57  ;;  %v6551_v12 = vmov 1983009808   ;;  %v5926_v30 = vld [vmem:[%s8824_s2 + $0x4e4] ss:$24 sps:$4 sm:$0xff]   ;;  %v6852_v28 = vshrl.u32 %v723_v4, 7  ;;  %v729_v37 = vld [vmem:[%s6676_s12 + $0x18] sm:$0xff] }
  0x6b   : > { %3408 = vmatpush1.bf16.msra.mxu0 %v5887_v58  ;;  %3368 = vmatprep.subr.bf16.mxu1 %v5888_v59  ;;  %v877_v13 = vunpack.c.l.s4 %v6551_v12  ;;  %v5928_v22 = vld [vmem:[%s8824_s2 + $0x1e0] ss:$24 sps:$4 sm:$0xff]   ;;  %v5930_v31 = vld [vmem:[%s8824_s2 + $0x214] ss:$24 sps:$4 sm:$0xff]   ;;  %v5934_v18 = vld [vmem:[%s8824_s2 + $0x210] ss:$24 sps:$4 sm:$0xff]  }
  0x6c   : > { %3409 = vmatprep.subr.bf16.mxu0 %v5890_v60  ;;  %v5929_v29 = vld [vmem:[%s8824_s2 + $0x4e0] ss:$24 sps:$4 sm:$0xff]   ;;  %v5932_v17 = vld [vmem:[%s8824_s2 + $0x514] ss:$24 sps:$4 sm:$0xff]   ;;  %v5935_v20 = vld [vmem:[%s8824_s2 + $0x510] ss:$24 sps:$4 sm:$0xff]  }
  0x6d   : > { %v878_v16 = vunpack.c.0.s8 %v877_v13  ;;  %vm725_vm4 = vcmp.lt.s32.totalorder %v6852_v28, 4  ;;  %v5936_v33 = vld [vmem:[%s8824_s2 + $0x244] ss:$24 sps:$4 sm:$0xff]   ;;  %v734_v39 = vld [vmem:[%s6676_s12 + $0x40] sm:$0xff]  ;;  %v737_v46 = vld [vmem:[%s6676_s12 + $0x58] sm:$0xff]  ;;  %vm947_vm5 = vcmask 1041409  }
  0x6e   : > { %3369 = vmatpush1.bf16.msra.mxu1 %v5892_v61  ;;  %v5938_v34 = vld [vmem:[%s8824_s2 + $0x544] ss:$24 sps:$4 sm:$0xff]   ;;  %v744_v38 = vsel %vm725_vm4, %v726_v32, 0.0  ;;  %v747_v44 = vsel %vm725_vm4, %v729_v37, 0.0  ;;  %v752_v47 = vsel %vm725_vm4, %v734_v39, 0.0  ;;  %v755_v51 = vsel %vm725_vm4, %v737_v46, 0.0 }
  0x6f   : > { %3410 = vmatpush1.bf16.msra.mxu0 %v5893_v62  ;;  %3370 = vmatprep.subr.bf16.mxu1 %v5894_v63  ;;  %v727_v35 = vld [vmem:[%s6676_s12 + $0x8] sm:$0xff]  ;;  %v728_v36 = vld [vmem:[%s6676_s12 + $0x10] sm:$0xff]  ;;  %v6895_v45 = vsub.s32 %v878_v16, %v6852_v28  ;;  %v762_v50 = vrot.slane %v744_v38, 4  ;;  %v780_v54 = vrot.slane %v747_v44, 4  ;;  %v810_v57 = vrot.slane %v752_v47, 4 }
  0x70   : > { %3411 = vmatprep.subr.bf16.mxu0 %v5896_v0  ;;  %v735_v40 = vld [vmem:[%s6676_s12 + $0x48] sm:$0xff]  ;;  %v736_v41 = vld [vmem:[%s6676_s12 + $0x50] sm:$0xff]  ;;  %v745_v42 = vsel %vm725_vm4, %v727_v35, 0.0  ;;  %v746_v43 = vsel %vm725_vm4, %v728_v36, 0.0  ;;  %v5942_v61 = vld [vmem:[%s8824_s2 + $0x274] ss:$24 sps:$4 sm:$0xff]  }
  0x71   : > { %v753_v48 = vsel %vm725_vm4, %v735_v40, 0.0  ;;  %v754_v49 = vsel %vm725_vm4, %v736_v41, 0.0  ;;  %v768_v52 = vrot.slane %v745_v42, 4  ;;  %v774_v53 = vrot.slane %v746_v43, 4  ;;  %v5940_v55 = vld [vmem:[%s8824_s2 + $0x240] ss:$24 sps:$4 sm:$0xff]  }
  0x72   : > { %3371 = vmatpush1.bf16.msra.mxu1 %v5898_v1  ;;  %v763_v56 = vadd.f32 %v762_v50, %v744_v38  ;;  %v816_v58 = vrot.slane %v753_v48, 4  ;;  %v822_v59 = vrot.slane %v754_v49, 4  ;;  %v5941_v60 = vld [vmem:[%s8824_s2 + $0x540] ss:$24 sps:$4 sm:$0xff]   ;;  %v781_v0 = vadd.f32 %v780_v54, %v747_v44  ;;  %v5948_v13 = vld [vmem:[%s8824_s2 + $0x2a4] ss:$24 sps:$4 sm:$0xff]  }
  0x73   : > { %3412 = vmatpush1.bf16.msra.mxu0 %v5899_v2  ;;  %3372 = vmatprep.subr.bf16.mxu1 %v5900_v3  ;;  %v769_v62 = vadd.f32 %v768_v52, %v745_v42  ;;  %v775_v63 = vadd.f32 %v774_v53, %v746_v43  ;;  %v828_v1 = vrot.slane %v755_v51, 4  ;;  %v5944_v2 = vld [vmem:[%s8824_s2 + $0x574] ss:$24 sps:$4 sm:$0xff]   ;;  %v5952_v37 = vld [vmem:[%s8824_s2 + $0x2a0] ss:$24 sps:$4 sm:$0xff]   ;;  %vm949_vm6 = vcmask 1043459  }
  0x74   : > { %3413 = vmatprep.subr.bf16.mxu0 %v5902_v5  ;;  %v764_v3 = vrot.slane %v763_v56, 2  ;;  %v811_v5 = vadd.f32 %v810_v57, %v752_v47  ;;  %v5953_v38 = vld [vmem:[%s8824_s2 + $0x5a0] ss:$24 sps:$4 sm:$0xff]   ;;  %v5954_v43 = vld [vmem:[%s8824_s2 + $0x2d4] ss:$24 sps:$4 sm:$0xff]   ;;  %vm951_vm7 = vcmask 1045509  }
  0x75   : > { %v5956_v44 = vld [vmem:[%s8824_s2 + $0x5d4] ss:$24 sps:$4 sm:$0xff]   ;;  %v5958_v52 = vld [vmem:[%s8824_s2 + $0x2d0] ss:$24 sps:$4 sm:$0xff]   ;;  %vm953_vm8 = vcmask 1047559   ;;  %vm4713_vm9 = vcmask 1041408  }
  0x76   : > { %3373 = vmatpush1.bf16.msra.mxu1 %v5904_v6  ;;  %v817_v6 = vadd.f32 %v816_v58, %v753_v48  ;;  %v5959_v54 = vld [vmem:[%s8824_s2 + $0x5d0] ss:$24 sps:$4 sm:$0xff]   ;;  %v5962_v58 = vld [vmem:[%s8824_s2 + $0x604] ss:$24 sps:$4 sm:$0xff]   ;;  %vm4811_vm12 = vcmask 9216  }
  0x77   : > { %3414 = vmatpush1.bf16.msra.mxu0 %v5905_v7  ;;  %3374 = vmatprep.subr.bf16.mxu1 %v5906_v8  ;;  %v823_v7 = vadd.f32 %v822_v59, %v754_v49  ;;  %v770_v8 = vrot.slane %v769_v62, 2 }
  0x78   : > { %3415 = vmatprep.subr.bf16.mxu0 %v5908_v9  ;;  %v776_v9 = vrot.slane %v775_v63, 2 }
  0x7a   : > { %3375 = vmatpush1.bf16.msra.mxu1 %v5910_v10  ;;  %v782_v10 = vrot.slane %v781_v0, 2 }
  0x7b   : > { %3416 = vmatpush1.bf16.msra.mxu0 %v5911_v14  ;;  %3376 = vmatprep.subr.bf16.mxu1 %v5912_v15  ;;  %v829_v14 = vadd.f32 %v828_v1, %v755_v51  ;;  %v765_v15 = vadd.f32 %v764_v3, %v763_v56 }
  0x7c   : > { %3417 = vmatprep.subr.bf16.mxu0 %v5914_v19  ;;  %v812_v19 = vrot.slane %v811_v5, 2 }
  0x7d   : > { %v830_v12 = vrot.slane %v829_v14, 2 }
  0x7e   : > { %3377 = vmatpush1.bf16.msra.mxu1 %v5916_v21  ;;  %v818_v21 = vrot.slane %v817_v6, 2 }
  0x7f   : > { %3418 = vmatpush1.bf16.msra.mxu0 %v5917_v23  ;;  %3378 = vmatprep.subr.bf16.mxu1 %v5918_v24  ;;  %v824_v23 = vrot.slane %v823_v7, 2  ;;  %v5946_v24 = vld [vmem:[%s8824_s2 + $0x270] ss:$24 sps:$4 sm:$0xff]   ;;  %v831_v32 = vadd.f32 %v830_v12, %v829_v14  ;;  %v5968_v12 = vld [vmem:[%s8824_s2 + $0x634] ss:$24 sps:$4 sm:$0xff]  }
  0x80   : > { %3419 = vmatprep.subr.bf16.mxu0 %v5920_v25  ;;  %v5947_v25 = vld [vmem:[%s8824_s2 + $0x570] ss:$24 sps:$4 sm:$0xff]  }
  0x81   : > { %v825_v16 = vadd.f32 %v824_v23, %v823_v7  ;;  %v832_v42 = vrot.slane %v831_v32, 1 }
  0x82   : > { %3379 = vmatpush1.bf16.msra.mxu1 %v5922_v11  ;;  %v771_v11 = vadd.f32 %v770_v8, %v769_v62 }
  0x83   : > { %3420 = vmatpush1.bf16.msra.mxu0 %v5923_v26  ;;  %3380 = vmatprep.subr.bf16.mxu1 %v5924_v27  ;;  %v777_v26 = vadd.f32 %v776_v9, %v775_v63  ;;  %v783_v27 = vadd.f32 %v782_v10, %v781_v0  ;;  %v826_v36 = vrot.slane %v825_v16, 1  ;;  %v833_v49 = vadd.f32 %v832_v42, %v831_v32  ;;  %v730_v32 = vld [vmem:[%s6676_s12 + $0x20] sm:$0xff]  ;;  %v740_v42 = vld [vmem:[%s6676_s12 + $0x70] sm:$0xff] }
  0x84   : > { %3421 = vmatprep.subr.bf16.mxu0 %v5926_v30  ;;  %v5950_v30 = vld [vmem:[%s8824_s2 + $0x5a4] ss:$24 sps:$4 sm:$0xff]  }
  0x85   : > { %v827_v48 = vadd.f32 %v826_v36, %v825_v16  ;;  %v5975_v16 = vld [vmem:[%s8824_s2 + $0x68] ss:$24 sps:$4 sm:$0xff]  }
  0x86   : > { %3381 = vmatpush1.bf16.msra.mxu1 %v5928_v22  ;;  %v766_v22 = vrot.slane %v765_v15, 1  ;;  %v733_v36 = vld [vmem:[%s6676_s12 + $0x38] sm:$0xff] }
  0x87   : > { %3422 = vmatpush1.bf16.msra.mxu0 %v5929_v29  ;;  %3382 = vmatprep.subr.bf16.mxu1 %v5930_v31  ;;  %v813_v29 = vadd.f32 %v812_v19, %v811_v5  ;;  %v819_v31 = vadd.f32 %v818_v21, %v817_v6  ;;  %v909_v57 = vcombine.low %v827_v48, %v833_v49  ;;  %v758_v49 = vsel %vm725_vm4, %v740_v42, 0.0 }
  0x88   : > { %3423 = vmatprep.subr.bf16.mxu0 %v5932_v17  ;;  %v772_v17 = vrot.slane %v771_v11, 1 }
  0x89   : > { %v820_v35 = vrot.slane %v819_v31, 1 }
  0x8a   : > { %3383 = vmatpush1.bf16.msra.mxu1 %v5934_v18  ;;  %v778_v18 = vrot.slane %v777_v26, 1  ;;  %v773_v39 = vadd.f32 %v772_v17, %v771_v11  ;;  %v5971_v11 = vld [vmem:[%s8824_s2 + $0x3c] ss:$24 sps:$4 sm:$0xff]  }
  0x8b   : > { %3424 = vmatpush1.bf16.msra.mxu0 %v5935_v20  ;;  %3384 = vmatprep.subr.bf16.mxu1 %v5936_v33  ;;  %v784_v20 = vrot.slane %v783_v27, 1  ;;  %v767_v33 = vadd.f32 %v766_v22, %v765_v15  ;;  %v821_v47 = vadd.f32 %v820_v35, %v819_v31  ;;  %v5966_v22 = vld [vmem:[%s8824_s2 + $0x630] ss:$24 sps:$4 sm:$0xff]   ;;  %v5972_v31 = vld [vmem:[%s8824_s2 + $0x660] ss:$24 sps:$4 sm:$0xff]  }
  0x8c   : > { %3425 = vmatprep.subr.bf16.mxu0 %v5938_v34  ;;  %v814_v34 = vrot.slane %v813_v29, 1  ;;  %v779_v40 = vadd.f32 %v778_v18, %v777_v26  ;;  %v5980_v17 = vld [vmem:[%s8824_s2 + $0x694] ss:$24 sps:$4 sm:$0xff]   ;;  %v732_v35 = vld [vmem:[%s6676_s12 + $0x30] sm:$0xff] }
  0x8d   : > { %v785_v41 = vadd.f32 %v784_v20, %v783_v27  ;;  %v874_v50 = vcombine.low %v767_v33, %v773_v39  ;;  %v5960_v27 = vld [vmem:[%s8824_s2 + $0x600] ss:$24 sps:$4 sm:$0xff]   ;;  %v5983_v18 = vld [vmem:[%s8824_s2 + $0x9c] ss:$24 sps:$4 sm:$0xff]  }
  0x8e   : > { %3385 = vmatpush1.bf16.msra.mxu1 %v5940_v55  ;;  %v815_v46 = vadd.f32 %v814_v34, %v813_v29  ;;  %v5974_v29 = vld [vmem:[%s8824_s2 + $0x664] ss:$24 sps:$4 sm:$0xff]   ;;  %v5981_v20 = vld [vmem:[%s8824_s2 + $0x98] ss:$24 sps:$4 sm:$0xff]  }
  0x8f   : > { %3426 = vmatpush1.bf16.msra.mxu0 %v5941_v60  ;;  %3386 = vmatprep.subr.bf16.mxu1 %v5942_v61  ;;  %v875_v51 = vcombine.low %v779_v40, %v785_v41  ;;  %v882_v55 = vrot.slane %v874_v50, %v6895_v45  ;;  %v5965_v60 = vld [vmem:[%s8824_s2 + $0xc] ss:$24 sps:$4 sm:$0xff]   ;;  %v923_v61 = vrot.slane %v909_v57, %v6895_v45  ;;  %v731_v33 = vld [vmem:[%s6676_s12 + $0x28] sm:$0xff]  ;;  %v5978_v40 = vld [vmem:[%s8824_s2 + $0x690] ss:$24 sps:$4 sm:$0xff]  }
  0x90   : > { %3427 = vmatprep.subr.bf16.mxu0 %v5944_v2  ;;  %v908_v53 = vcombine.low %v815_v46, %v821_v47  ;;  %v760_v2 = vld [vmem:[#allocation2] sm:$0xff]  ;;  %v749_v39 = vsel %vm725_vm4, %v731_v33, 0.0  ;;  %v739_v41 = vld [vmem:[%s6676_s12 + $0x68] sm:$0xff]  ;;  %v751_v46 = vsel %vm725_vm4, %v733_v36, 0.0 }
  0x91   : > { %v889_v56 = vrot.slane %v875_v51, %v6895_v45  ;;  %v5989_v34 = vld [vmem:[%s8824_s2 + $0xcc] ss:$24 sps:$4 sm:$0xff]   ;;  %v757_v48 = vsel %vm725_vm4, %v739_v41, 0.0 }
  0x92   : > { %3387 = vmatpush1.bf16.msra.mxu1 %v5946_v24  ;;  %v916_v59 = vrot.slane %v908_v53, %v6895_v45  ;;  %v5963_v24 = vld [vmem:[%s8824_s2 + $0x8] ss:$24 sps:$4 sm:$0xff]  }
  0x93   : > { %3428 = vmatpush1.bf16.msra.mxu0 %v5947_v25  ;;  %3388 = vmatprep.subr.bf16.mxu1 %v5948_v13  ;;  %v890_v62 = vcombine.low %v882_v55, %v889_v56  ;;  %v5969_v13 = vld [vmem:[%s8824_s2 + $0x38] ss:$24 sps:$4 sm:$0xff]   ;;  %v5986_v56 = vld [vmem:[%s8824_s2 + $0x6c4] ss:$24 sps:$4 sm:$0xff]  }
  0x94   : > { %3429 = vmatprep.subr.bf16.mxu0 %v5950_v30  ;;  %v924_v63 = vcombine.low %v916_v59, %v923_v61  ;;  %v5977_v30 = vld [vmem:[%s8824_s2 + $0x6c] ss:$24 sps:$4 sm:$0xff]   ;;  %v846_v59 = vrot.slane %v758_v49, 4  ;;  %v5984_v61 = vld [vmem:[%s8824_s2 + $0x6c0] ss:$24 sps:$4 sm:$0xff]  }
  0x96   : > { %3389 = vmatpush1.bf16.msra.mxu1 %v5952_v37  ;;  %v946_v0 = vrot.slane %v924_v63, 7  ;;  %v738_v37 = vld [vmem:[%s6676_s12 + $0x60] sm:$0xff] }
  0x97   : > { %3430 = vmatpush1.bf16.msra.mxu0 %v5953_v38  ;;  %3390 = vmatprep.subr.bf16.mxu1 %v5954_v43  ;;  %v748_v38 = vsel %vm725_vm4, %v730_v32, 0.0  ;;  %v741_v43 = vld [vmem:[%s6676_s12 + $0x78] sm:$0xff]  ;;  %v756_v47 = vsel %vm725_vm4, %v738_v37, 0.0 }
  0x98   : > { %3431 = vmatprep.subr.bf16.mxu0 %v5956_v44  ;;  %v948_v1 = vsel %vm947_vm5, %v946_v0, %v890_v62  ;;  %v750_v44 = vsel %vm725_vm4, %v732_v35, 0.0  ;;  %v759_v50 = vsel %vm725_vm4, %v741_v43, 0.0  ;;  %v786_v51 = vrot.slane %v748_v38, 4  ;;  %v5987_v62 = vld [vmem:[%s8824_s2 + $0xc8] ss:$24 sps:$4 sm:$0xff]  }
  0x99   : > { %v950_v3 = vsel %vm949_vm6, %v946_v0, %v948_v1  ;;  %v798_v53 = vrot.slane %v750_v44, 4  ;;  %v834_v55 = vrot.slane %v756_v47, 4  ;;  %v5999_v43 = vld [vmem:[%s8824_s2 + $0x128] ss:$24 sps:$4 sm:$0xff]  }
  0x9a   : > { %3391 = vmatpush1.bf16.msra.mxu1 %v5958_v52  ;;  %v952_v5 = vsel %vm951_vm7, %v946_v0, %v950_v3  ;;  %v792_v52 = vrot.slane %v749_v39, 4  ;;  %v787_v57 = vadd.f32 %v786_v51, %v748_v38  ;;  %v5995_v3 = vld [vmem:[%s8824_s2 + $0xfc] ss:$24 sps:$4 sm:$0xff]  }
  0x9b   : > { %3432 = vmatpush1.bf16.msra.mxu0 %v5959_v54  ;;  %3524 = vmatprep.subr.bf16.mxu1 %v5965_v60  ;;  %v954_v6 = vsel %vm953_vm8, %v946_v0, %v952_v5  ;;  %v804_v54 = vrot.slane %v751_v46, 4  ;;  %v852_v60 = vrot.slane %v759_v50, 4  ;;  %v799_v0 = vadd.f32 %v798_v53, %v750_v44  ;;  %v5998_v38 = vld [vmem:[%s8824_s2 + $0x724] ss:$24 sps:$4 sm:$0xff]   ;;  %v5996_v53 = vld [vmem:[%s8824_s2 + $0x720] ss:$24 sps:$4 sm:$0xff]  }
  0x9c   : > { %3442 = vmatprep.subr.bf16.mxu0 %v5962_v58  ;;  %v964_v7 = vadd.f32 %v954_v6, %v760_v2  ;;  %v840_v58 = vrot.slane %v757_v48, 4  ;;  %v793_v63 = vadd.f32 %v792_v52, %v749_v39  ;;  %v835_v2 = vadd.f32 %v834_v55, %v756_v47 }
  0x9d   : > { %v805_v1 = vadd.f32 %v804_v54, %v751_v46  ;;  %v788_v5 = vrot.slane %v787_v57, 2 }
  0x9e   : > { %966 = vst [vmem:[#allocation2] sm:$0xff] %v964_v7  ;;  %v970_v8 = vmul.f32 0.05, %v964_v7  ;;  %v841_v6 = vadd.f32 %v840_v58, %v757_v48  ;;  %v847_v7 = vadd.f32 %v846_v59, %v758_v49  ;;  %v6007_v49 = vld [vmem:[%s8824_s2 + $0x15c] ss:$24 sps:$4 sm:$0xff]  }
  0x9f   : > { %v6005_v59 = vld [vmem:[%s8824_s2 + $0x158] ss:$24 sps:$4 sm:$0xff]  }
  0xa0   : > { %v981_v9 = vrot.slane %v970_v8, %v6895_v45  ;;  %v974_v10 = vcombine.high %v970_v8, %v970_v8  ;;  %v853_v8 = vadd.f32 %v852_v60, %v759_v50 }
  0xa2   : > { %v989_v14 = vcombine.high %v981_v9, %v981_v9  ;;  %v988_v15 = vrot.slane %v974_v10, %v6895_v45  ;;  %v6964_v19 = vpack.c.bf16 %v981_v9, %v981_v9  ;;  %v5992_v9 = vld [vmem:[%s8824_s2 + $0x6f4] ss:$24 sps:$4 sm:$0xff]   ;;  %v794_v10 = vrot.slane %v793_v63, 2 }
  0xa4   : > { %v6966_v21 = vpack.c.bf16 %v989_v14, %v989_v14  ;;  %v990_v23 = vcombine.high %v988_v15, %v988_v15  ;;  %v6971_v25 = vpack.c.bf16 %v988_v15, %v988_v15  ;;  %v800_v14 = vrot.slane %v799_v0, 2 }
  0xa5   : > { %v806_v15 = vrot.slane %v805_v1, 2 }
  0xa6   : > { %3392 = vmatprep.mubr.bf16.mxu1 %v6966_v21  ;;  %v6977_v26 = vpack.c.bf16 %v990_v23, %v990_v23  ;;  %v836_v23 = vrot.slane %v835_v2, 2 }
  0xa7   : > { %3393 = vmatmul.mubr.bf16.vlgmr.msra.gmra.mrb[0].mxu1 %v6964_v19 }
  0xa8   : > { %3433 = vmatprep.mubr.bf16.mxu0 %v6977_v26  ;;  %3525 = vmatpush1.bf16.msra.mxu1 %v5963_v24  ;;  %v789_v24 = vadd.f32 %v788_v5, %v787_v57 }
  0xa9   : > { %3434 = vmatmul.mubr.bf16.vlgmr.msra.gmra.mrb[0].mxu0 %v6971_v25  ;;  %3526 = vmatprep.subr.bf16.mxu1 %v5971_v11  ;;  %v842_v11 = vrot.slane %v841_v6, 2 }
  0xaa   : > { %3443 = vmatpush1.bf16.msra.mxu0 %v5960_v27  ;;  %3556 = vmatprep.mubr.bf16.mxu1 %v6966_v21  ;;  %v848_v27 = vrot.slane %v847_v7, 2 }
  0xab   : > { %3444 = vmatprep.subr.bf16.mxu0 %v5968_v12  ;;  %v854_v12 = vrot.slane %v853_v8, 2 }
  0xac   : > { %3527 = vmatpush1.bf16.msra.mxu1 %v5969_v13  ;;  %v5993_v13 = vld [vmem:[%s8824_s2 + $0xf8] ss:$24 sps:$4 sm:$0xff]   ;;  %v849_v32 = vadd.f32 %v848_v27, %v847_v7  ;;  %v6019_v7 = vld [vmem:[%s8824_s2 + $0x1bc] ss:$24 sps:$4 sm:$0xff]  }
  0xad   : > { %3528 = vmatprep.subr.bf16.mxu1 %v5977_v30  ;;  %v795_v30 = vadd.f32 %v794_v10, %v793_v63  ;;  %v855_v33 = vadd.f32 %v854_v12, %v853_v8  ;;  %v6016_v10 = vld [vmem:[%s8824_s2 + $0x7b4] ss:$24 sps:$4 sm:$0xff]   ;;  %v6014_v12 = vld [vmem:[%s8824_s2 + $0x7b0] ss:$24 sps:$4 sm:$0xff]  }
  0xae   : > { %3445 = vmatpush1.bf16.msra.mxu0 %v5966_v22  ;;  %v801_v22 = vadd.f32 %v800_v14, %v799_v0  ;;  %v850_v41 = vrot.slane %v849_v32, 1 }
  0xaf   : > { %3446 = vmatprep.subr.bf16.mxu0 %v5974_v29  ;;  %v807_v29 = vadd.f32 %v806_v15, %v805_v1  ;;  %v856_v42 = vrot.slane %v855_v33, 1  ;;  %v6002_v1 = vld [vmem:[%s8824_s2 + $0x750] ss:$24 sps:$4 sm:$0xff]  }
  0xb0   : > { %3529 = vmatpush1.bf16.msra.mxu1 %v5975_v16  ;;  %v5990_v16 = vld [vmem:[%s8824_s2 + $0x6f0] ss:$24 sps:$4 sm:$0xff]   ;;  %v802_v35 = vrot.slane %v801_v22, 1  ;;  %v851_v51 = vadd.f32 %v850_v41, %v849_v32  ;;  %v6040_v41 = vld [vmem:[%s8824_s2 + $0x874] ss:$24 sps:$4 sm:$0xff]  }
  0xb1   : > { %3530 = vmatprep.subr.bf16.mxu1 %v5983_v18  ;;  %v790_v18 = vrot.slane %v789_v24, 1  ;;  %v808_v36 = vrot.slane %v807_v29, 1  ;;  %v857_v52 = vadd.f32 %v856_v42, %v855_v33  ;;  %v6017_v15 = vld [vmem:[%s8824_s2 + $0x1b8] ss:$24 sps:$4 sm:$0xff]   ;;  %v6037_v33 = vld [vmem:[%s8824_s2 + $0x24c] ss:$24 sps:$4 sm:$0xff]  }
  0xb2   : > { %3447 = vmatpush1.bf16.msra.mxu0 %v5972_v31  ;;  %v837_v31 = vadd.f32 %v836_v23, %v835_v2  ;;  %v803_v46 = vadd.f32 %v802_v35, %v801_v22  ;;  %v6010_v2 = vld [vmem:[%s8824_s2 + $0x784] ss:$24 sps:$4 sm:$0xff]   ;;  %v761_v23 = vld [vmem:[#allocation2 + $0x8] sm:$0xff]  ;;  %v6029_v32 = vld [vmem:[%s8824_s2 + $0x218] ss:$24 sps:$4 sm:$0xff]  }
  0xb3   : > { %3448 = vmatprep.subr.bf16.mxu0 %v5980_v17  ;;  %v6001_v17 = vld [vmem:[%s8824_s2 + $0x12c] ss:$24 sps:$4 sm:$0xff]   ;;  %v791_v39 = vadd.f32 %v790_v18, %v789_v24  ;;  %v809_v47 = vadd.f32 %v808_v36, %v807_v29  ;;  %v926_v58 = vcombine.low %v851_v51, %v857_v52  ;;  %v6023_v29 = vld [vmem:[%s8824_s2 + $0x1e8] ss:$24 sps:$4 sm:$0xff]   ;;  %v6041_v42 = vld [vmem:[%s8824_s2 + $0x278] ss:$24 sps:$4 sm:$0xff]  }
  0xb4   : > { %3531 = vmatpush1.bf16.msra.mxu1 %v5981_v20  ;;  %v843_v20 = vadd.f32 %v842_v11, %v841_v6  ;;  %v838_v37 = vrot.slane %v837_v31, 1  ;;  %v6011_v6 = vld [vmem:[%s8824_s2 + $0x188] ss:$24 sps:$4 sm:$0xff]   ;;  %v6025_v11 = vld [vmem:[%s8824_s2 + $0x1ec] ss:$24 sps:$4 sm:$0xff]  }
  0xb5   : > { %3532 = vmatprep.subr.bf16.mxu1 %v5989_v34  ;;  %v796_v34 = vrot.slane %v795_v30, 1  ;;  %v892_v55 = vcombine.low %v803_v46, %v809_v47  ;;  %v940_v0 = vrot.slane %v926_v58, %v6895_v45  ;;  %v6028_v18 = vld [vmem:[%s8824_s2 + $0x814] ss:$24 sps:$4 sm:$0xff]   ;;  %v6026_v35 = vld [vmem:[%s8824_s2 + $0x810] ss:$24 sps:$4 sm:$0xff]  }
  0xb6   : > { %3449 = vmatpush1.bf16.msra.mxu0 %v5978_v40  ;;  %v844_v40 = vrot.slane %v843_v20, 1  ;;  %v839_v48 = vadd.f32 %v838_v37, %v837_v31  ;;  %v6031_v31 = vld [vmem:[%s8824_s2 + $0x21c] ss:$24 sps:$4 sm:$0xff]   ;;  %v6059_v58 = vld [vmem:[%s8824_s2 + $0x308] ss:$24 sps:$4 sm:$0xff]  }
  0xb7   : > { %3450 = vmatprep.subr.bf16.mxu0 %v5986_v56  ;;  %v797_v44 = vadd.f32 %v796_v34, %v795_v30  ;;  %v6004_v56 = vld [vmem:[%s8824_s2 + $0x754] ss:$24 sps:$4 sm:$0xff]   ;;  %v6022_v30 = vld [vmem:[%s8824_s2 + $0x7e4] ss:$24 sps:$4 sm:$0xff]  }
  0xb8   : > { %3533 = vmatpush1.bf16.msra.mxu1 %v5987_v62  ;;  %v845_v50 = vadd.f32 %v844_v40, %v843_v20  ;;  %v6013_v62 = vld [vmem:[%s8824_s2 + $0x18c] ss:$24 sps:$4 sm:$0xff]   ;;  %v6032_v40 = vld [vmem:[%s8824_s2 + $0x840] ss:$24 sps:$4 sm:$0xff]  }
  0xb9   : > { %3534 = vmatprep.subr.bf16.mxu1 %v5995_v3  ;;  %v891_v54 = vcombine.low %v791_v39, %v797_v44  ;;  %v6034_v36 = vld [vmem:[%s8824_s2 + $0x844] ss:$24 sps:$4 sm:$0xff]   ;;  %v6038_v44 = vld [vmem:[%s8824_s2 + $0x870] ss:$24 sps:$4 sm:$0xff]   ;;  %v6052_v52 = vld [vmem:[%s8824_s2 + $0x8d4] ss:$24 sps:$4 sm:$0xff]  }
  0xba   : > { %3451 = vmatpush1.bf16.msra.mxu0 %v5984_v61  ;;  %v925_v57 = vcombine.low %v839_v48, %v845_v50  ;;  %v906_v61 = vrot.slane %v892_v55, %v6895_v45  ;;  %v6043_v39 = vld [vmem:[%s8824_s2 + $0x27c] ss:$24 sps:$4 sm:$0xff]   ;;  %v6047_v48 = vld [vmem:[%s8824_s2 + $0x2a8] ss:$24 sps:$4 sm:$0xff]  }
  0xbb   : > { %3452 = vmatprep.subr.bf16.mxu0 %v5992_v9  ;;  %v899_v60 = vrot.slane %v891_v54, %v6895_v45  ;;  %v6008_v9 = vld [vmem:[%s8824_s2 + $0x780] ss:$24 sps:$4 sm:$0xff]   ;;  %v6046_v47 = vld [vmem:[%s8824_s2 + $0x8a4] ss:$24 sps:$4 sm:$0xff]   ;;  %v6050_v55 = vld [vmem:[%s8824_s2 + $0x8d0] ss:$24 sps:$4 sm:$0xff]  }
  0xbc   : > { %3535 = vmatpush1.bf16.msra.mxu1 %v5993_v13  ;;  %v933_v63 = vrot.slane %v925_v57, %v6895_v45  ;;  %v6044_v50 = vld [vmem:[%s8824_s2 + $0x8a0] ss:$24 sps:$4 sm:$0xff]   ;;  %v6061_v54 = vld [vmem:[%s8824_s2 + $0x30c] ss:$24 sps:$4 sm:$0xff]  }
  0xbd   : > { %3536 = vmatprep.subr.bf16.mxu1 %v6001_v17  ;;  %v907_v3 = vcombine.low %v899_v60, %v906_v61  ;;  %v6020_v17 = vld [vmem:[%s8824_s2 + $0x7e0] ss:$24 sps:$4 sm:$0xff]   ;;  %v6058_v57 = vld [vmem:[%s8824_s2 + $0x904] ss:$24 sps:$4 sm:$0xff]  }
  0xbe   : > { %3453 = vmatpush1.bf16.msra.mxu0 %v5990_v16  ;;  %v941_v5 = vcombine.low %v933_v63, %v940_v0  ;;  %v6067_v60 = vld [vmem:[%s8824_s2 + $0x33c] ss:$24 sps:$4 sm:$0xff]   ;;  %v6056_v61 = vld [vmem:[%s8824_s2 + $0x900] ss:$24 sps:$4 sm:$0xff]  }
  0xbf   : > { %3454 = vmatprep.subr.bf16.mxu0 %v5998_v38  ;;  %v6035_v38 = vld [vmem:[%s8824_s2 + $0x248] ss:$24 sps:$4 sm:$0xff]   ;;  %v6064_v63 = vld [vmem:[%s8824_s2 + $0x934] ss:$24 sps:$4 sm:$0xff]   ;;  %v6065_v0 = vld [vmem:[%s8824_s2 + $0x338] ss:$24 sps:$4 sm:$0xff]  }
  0xc0   : > { %3537 = vmatpush1.bf16.msra.mxu1 %v5999_v43  ;;  %v957_v8 = vrot.slane %v941_v5, 7  ;;  %v6049_v43 = vld [vmem:[%s8824_s2 + $0x2ac] ss:$24 sps:$4 sm:$0xff]   ;;  %v6071_v5 = vld [vmem:[%s8824_s2 + $0x368] ss:$24 sps:$4 sm:$0xff]  }
  0xc1   : > { %3538 = vmatprep.subr.bf16.mxu1 %v6007_v49  ;;  %v6055_v49 = vld [vmem:[%s8824_s2 + $0x2dc] ss:$24 sps:$4 sm:$0xff]  }
  0xc2   : > { %3455 = vmatpush1.bf16.msra.mxu0 %v5996_v53  ;;  %v958_v14 = vsel %vm947_vm5, %v957_v8, %v907_v3  ;;  %v6053_v53 = vld [vmem:[%s8824_s2 + $0x2d8] ss:$24 sps:$4 sm:$0xff]   ;;  %v6070_v3 = vld [vmem:[%s8824_s2 + $0x964] ss:$24 sps:$4 sm:$0xff]  }
  0xc3   : > { %3456 = vmatprep.subr.bf16.mxu0 %v6004_v56  ;;  %v959_v24 = vsel %vm949_vm6, %v957_v8, %v958_v14  ;;  %v6074_v14 = vld [vmem:[%s8824_s2 + $0x990] ss:$24 sps:$4 sm:$0xff]  }
  0xc4   : > { %3539 = vmatpush1.bf16.msra.mxu1 %v6005_v59  ;;  %v960_v27 = vsel %vm951_vm7, %v957_v8, %v959_v24  ;;  %v6091_v24 = vld [vmem:[%s8824_s2 + $0x3fc] ss:$24 sps:$4 sm:$0xff]  }
  0xc5   : > { %3540 = vmatprep.subr.bf16.mxu1 %v6013_v62  ;;  %v961_v13 = vsel %vm953_vm8, %v957_v8, %v960_v27  ;;  %v6076_v8 = vld [vmem:[%s8824_s2 + $0x994] ss:$24 sps:$4 sm:$0xff]  }
  0xc6   : > { %3457 = vmatpush1.bf16.msra.mxu0 %v6002_v1  ;;  %v965_v22 = vadd.f32 %v961_v13, %v761_v23  ;;  %v6073_v1 = vld [vmem:[%s8824_s2 + $0x36c] ss:$24 sps:$4 sm:$0xff]   ;;  %v6083_v23 = vld [vmem:[%s8824_s2 + $0x3c8] ss:$24 sps:$4 sm:$0xff]  }
  0xc7   : > { %3458 = vmatprep.subr.bf16.mxu0 %v6010_v2  ;;  %v6062_v2 = vld [vmem:[%s8824_s2 + $0x930] ss:$24 sps:$4 sm:$0xff]   ;;  %v6088_v27 = vld [vmem:[%s8824_s2 + $0x9f4] ss:$24 sps:$4 sm:$0xff]  }
  0xc8   : > { %3541 = vmatpush1.bf16.msra.mxu1 %v6011_v6  ;;  %967 = vst [vmem:[#allocation2 + $0x8] sm:$0xff] %v965_v22  ;;  %v971_v16 = vmul.f32 0.05, %v965_v22  ;;  %v6079_v6 = vld [vmem:[%s8824_s2 + $0x39c] ss:$24 sps:$4 sm:$0xff]  }
  0xc9   : > { %3542 = vmatprep.subr.bf16.mxu1 %v6019_v7  ;;  %v6068_v7 = vld [vmem:[%s8824_s2 + $0x960] ss:$24 sps:$4 sm:$0xff]   ;;  %v6097_v13 = vld [vmem:[%s8824_s2 + $0x42c] ss:$24 sps:$4 sm:$0xff]  }
  0xca   : > { %3459 = vmatpush1.bf16.msra.mxu0 %v6008_v9  ;;  %v998_v20 = vrot.slane %v971_v16, %v6895_v45  ;;  %v991_v46 = vcombine.high %v971_v16, %v971_v16  ;;  %v6077_v9 = vld [vmem:[%s8824_s2 + $0x398] ss:$24 sps:$4 sm:$0xff]   ;;  %v6094_v22 = vld [vmem:[%s8824_s2 + $0xa24] ss:$24 sps:$4 sm:$0xff]  }
  0xcb   : > { %3460 = vmatprep.subr.bf16.mxu0 %v6016_v10  ;;  %v6085_v10 = vld [vmem:[%s8824_s2 + $0x3cc] ss:$24 sps:$4 sm:$0xff]   ;;  %v6092_v16 = vld [vmem:[%s8824_s2 + $0xa20] ss:$24 sps:$4 sm:$0xff]  }
  0xcc   : > { %3543 = vmatpush1.bf16.msra.mxu1 %v6017_v15  ;;  %v1006_v34 = vcombine.high %v998_v20, %v998_v20  ;;  %v7191_v51 = vrot.slane %v991_v46, %v6895_v45  ;;  %v7213_v59 = vpack.c.bf16 %v998_v20, %v998_v20  ;;  %v6082_v15 = vld [vmem:[%s8824_s2 + $0x9c4] ss:$24 sps:$4 sm:$0xff]   ;;  %v6116_v46 = vld [vmem:[%s8824_s2 + $0xae0] ss:$24 sps:$4 sm:$0xff]  }
  0xcd   : > { %3544 = vmatprep.subr.bf16.mxu1 %v6025_v11  ;;  %v6080_v11 = vld [vmem:[%s8824_s2 + $0x9c0] ss:$24 sps:$4 sm:$0xff]   ;;  %v6109_v20 = vld [vmem:[%s8824_s2 + $0x48c] ss:$24 sps:$4 sm:$0xff]  }
  0xce   : > { %3461 = vmatpush1.bf16.msra.mxu0 %v6014_v12  ;;  %v7154_v37 = vpack.c.bf16 %v1006_v34, %v1006_v34  ;;  %v1007_v56 = vcombine.high %v7191_v51, %v7191_v51  ;;  %v6089_v12 = vld [vmem:[%s8824_s2 + $0x3f8] ss:$24 sps:$4 sm:$0xff]   ;;  %v6107_v34 = vld [vmem:[%s8824_s2 + $0x488] ss:$24 sps:$4 sm:$0xff]  }
  0xcf   : > { %3462 = vmatprep.subr.bf16.mxu0 %v6022_v30  ;;  %v6086_v30 = vld [vmem:[%s8824_s2 + $0x9f0] ss:$24 sps:$4 sm:$0xff]  }
  0xd0   : > { %3545 = vmatpush1.bf16.msra.mxu1 %v6023_v29  ;;  %3474 = vmatprep.mubr.bf16.mxu0 %v7154_v37  ;;  %v7221_v62 = vpack.c.bf16 %v1007_v56, %v1007_v56  ;;  %v6095_v29 = vld [vmem:[%s8824_s2 + $0x428] ss:$24 sps:$4 sm:$0xff]   ;;  %v6136_v56 = vld [vmem:[%s8824_s2 + $0xb74] ss:$24 sps:$4 sm:$0xff]  }
  0xd1   : > { %3546 = vmatprep.subr.bf16.mxu1 %v6031_v31  ;;  %v6103_v31 = vld [vmem:[%s8824_s2 + $0x45c] ss:$24 sps:$4 sm:$0xff]  }
  0xd2   : > { %3463 = vmatpush1.bf16.msra.mxu0 %v6020_v17  ;;  %v6100_v17 = vld [vmem:[%s8824_s2 + $0xa54] ss:$24 sps:$4 sm:$0xff]  }
  0xd3   : > { %3464 = vmatprep.subr.bf16.mxu0 %v6028_v18  ;;  %v6101_v18 = vld [vmem:[%s8824_s2 + $0x458] ss:$24 sps:$4 sm:$0xff]  }
  0xd4   : > { %3547 = vmatpush1.bf16.msra.mxu1 %v6029_v32  ;;  %v6098_v32 = vld [vmem:[%s8824_s2 + $0xa50] ss:$24 sps:$4 sm:$0xff]  }
  0xd5   : > { %3548 = vmatprep.subr.bf16.mxu1 %v6037_v33  ;;  %v6106_v33 = vld [vmem:[%s8824_s2 + $0xa84] ss:$24 sps:$4 sm:$0xff]  }
  0xd6   : > { %3465 = vmatpush1.bf16.msra.mxu0 %v6026_v35  ;;  %v6115_v35 = vld [vmem:[%s8824_s2 + $0x4bc] ss:$24 sps:$4 sm:$0xff]  }
  0xd7   : > { %3466 = vmatprep.subr.bf16.mxu0 %v6034_v36  ;;  %v6104_v36 = vld [vmem:[%s8824_s2 + $0xa80] ss:$24 sps:$4 sm:$0xff]  }
  0xd8   : > { %3549 = vmatpush1.bf16.msra.mxu1 %v6035_v38  ;;  %v6112_v38 = vld [vmem:[%s8824_s2 + $0xab4] ss:$24 sps:$4 sm:$0xff]  }
  0xd9   : > { %3550 = vmatprep.subr.bf16.mxu1 %v6043_v39  ;;  %v6113_v39 = vld [vmem:[%s8824_s2 + $0x4b8] ss:$24 sps:$4 sm:$0xff]  }
  0xda   : > { %3467 = vmatpush1.bf16.msra.mxu0 %v6032_v40  ;;  %v6121_v40 = vld [vmem:[%s8824_s2 + $0x4ec] ss:$24 sps:$4 sm:$0xff]  }
  0xdb   : > { %3468 = vmatprep.subr.bf16.mxu0 %v6040_v41  ;;  %v6110_v41 = vld [vmem:[%s8824_s2 + $0xab0] ss:$24 sps:$4 sm:$0xff]  }
  0xdc   : > { %3551 = vmatpush1.bf16.msra.mxu1 %v6041_v42  ;;  %v6118_v42 = vld [vmem:[%s8824_s2 + $0xae4] ss:$24 sps:$4 sm:$0xff]  }
  0xdd   : > { %3552 = vmatprep.subr.bf16.mxu1 %v6049_v43  ;;  %v6119_v43 = vld [vmem:[%s8824_s2 + $0x4e8] ss:$24 sps:$4 sm:$0xff]  }
  0xde   : > { %3469 = vmatpush1.bf16.msra.mxu0 %v6038_v44  ;;  %v6127_v44 = vld [vmem:[%s8824_s2 + $0x51c] ss:$24 sps:$4 sm:$0xff]  }
  0xdf   : > { %3470 = vmatprep.subr.bf16.mxu0 %v6046_v47  ;;  %v6124_v47 = vld [vmem:[%s8824_s2 + $0xb14] ss:$24 sps:$4 sm:$0xff]  }
  0xe0   : > { %3553 = vmatpush1.bf16.msra.mxu1 %v6047_v48  ;;  %v6125_v48 = vld [vmem:[%s8824_s2 + $0x518] ss:$24 sps:$4 sm:$0xff]  }
  0xe1   : > { %3554 = vmatprep.subr.bf16.mxu1 %v6055_v49  ;;  %v6133_v49 = vld [vmem:[%s8824_s2 + $0x54c] ss:$24 sps:$4 sm:$0xff]  }
  0xe2   : > { %3471 = vmatpush1.bf16.msra.mxu0 %v6044_v50  ;;  %v6122_v50 = vld [vmem:[%s8824_s2 + $0xb10] ss:$24 sps:$4 sm:$0xff]  }
  0xe3   : > { %3472 = vmatprep.subr.bf16.mxu0 %v6052_v52  ;;  %v6130_v52 = vld [vmem:[%s8824_s2 + $0xb44] ss:$24 sps:$4 sm:$0xff]  }
  0xe4   : > { %3555 = vmatpush1.bf16.msra.mxu1 %v6053_v53  ;;  %v6131_v53 = vld [vmem:[%s8824_s2 + $0x548] ss:$24 sps:$4 sm:$0xff]  }
  0xe5   : > { %3565 = vmatprep.subr.bf16.mxu1 %v6061_v54  ;;  %v6139_v54 = vld [vmem:[%s8824_s2 + $0x57c] ss:$24 sps:$4 sm:$0xff]  }
  0xe6   : > { %3473 = vmatpush1.bf16.msra.mxu0 %v6050_v55  ;;  %v6128_v55 = vld [vmem:[%s8824_s2 + $0xb40] ss:$24 sps:$4 sm:$0xff]  }
  0xe7   : > { %3483 = vmatprep.subr.bf16.mxu0 %v6058_v57  ;;  %3557 = vmatmul.mubr.bf16.vlgmr.msra.gmra.mrb[4].mxu1 %v6964_v19  ;;  %v6137_v57 = vld [vmem:[%s8824_s2 + $0x578] ss:$24 sps:$4 sm:$0xff]  }
  0xe8   : > { %3566 = vmatpush1.bf16.msra.mxu1 %v6059_v58  ;;  %3597 = vmatprep.mubr.bf16.mxu1 %v6977_v26  ;;  %v6145_v58 = vld [vmem:[%s8824_s2 + $0x5ac] ss:$24 sps:$4 sm:$0xff]  }
  0xe9   : > { %3475 = vmatmul.mubr.bf16.vlgmr.msra.gmra.mrb[0].mxu0 %v7213_v59  ;;  %3567 = vmatprep.subr.bf16.mxu1 %v6067_v60  ;;  %v6134_v60 = vld [vmem:[%s8824_s2 + $0xb70] ss:$24 sps:$4 sm:$0xff]  }
  0xea   : > { %3484 = vmatpush1.bf16.msra.mxu0 %v6056_v61  ;;  %3515 = vmatprep.mubr.bf16.mxu0 %v7221_v62  ;;  %v6142_v61 = vld [vmem:[%s8824_s2 + $0xba4] ss:$24 sps:$4 sm:$0xff]  }
  0xeb   : > { %3485 = vmatprep.subr.bf16.mxu0 %v6064_v63  ;;  %v6143_v63 = vld [vmem:[%s8824_s2 + $0x5a8] ss:$24 sps:$4 sm:$0xff]  }
  0xec   : > { %3568 = vmatpush1.bf16.msra.mxu1 %v6065_v0  ;;  %v6151_v0 = vld [vmem:[%s8824_s2 + $0x5dc] ss:$24 sps:$4 sm:$0xff]  }
  0xed   : > { %3569 = vmatprep.subr.bf16.mxu1 %v6073_v1  ;;  %v6140_v1 = vld [vmem:[%s8824_s2 + $0xba0] ss:$24 sps:$4 sm:$0xff]  }
  0xee   : > { %3486 = vmatpush1.bf16.msra.mxu0 %v6062_v2  ;;  %v6148_v2 = vld [vmem:[%s8824_s2 + $0xbd4] ss:$24 sps:$4 sm:$0xff]  }
  0xef   : > { %3487 = vmatprep.subr.bf16.mxu0 %v6070_v3  ;;  %v6149_v3 = vld [vmem:[%s8824_s2 + $0x5d8] ss:$24 sps:$4 sm:$0xff]  }
  0xf0   : > { %3570 = vmatpush1.bf16.msra.mxu1 %v6071_v5  ;;  %v6154_v5 = vld [vmem:[%s8824_s2 + $0x60c] ss:$24 sps:$4 sm:$0xff]  }
  0xf1   : > { %3571 = vmatprep.subr.bf16.mxu1 %v6079_v6  ;;  %v6146_v6 = vld [vmem:[%s8824_s2 + $0xbd0] ss:$24 sps:$4 sm:$0xff]  }
  0xf2   : > { %3488 = vmatpush1.bf16.msra.mxu0 %v6068_v7  ;;  %v6157_v7 = vld [vmem:[%s8824_s2 + $0x14] ss:$24 sps:$4 sm:$0xff]  }
  0xf3   : > { %3489 = vmatprep.subr.bf16.mxu0 %v6076_v8  ;;  %v6152_v8 = vld [vmem:[%s8824_s2 + $0x608] ss:$24 sps:$4 sm:$0xff]  }
  0xf4   : > { %3572 = vmatpush1.bf16.msra.mxu1 %v6077_v9  ;;  %v7415_v9 = vpack.c.bf16 %v7191_v51, %v7191_v51  ;;  %v6158_v51 = vld [vmem:[%s8824_s2 + $0x638] ss:$24 sps:$4 sm:$0xff]  }
  0xf5   : > { %3573 = vmatprep.subr.bf16.mxu1 %v6085_v10  ;;  %v6160_v10 = vld [vmem:[%s8824_s2 + $0x63c] ss:$24 sps:$4 sm:$0xff]  }
  0xf6   : > { %3490 = vmatpush1.bf16.msra.mxu0 %v6074_v14  ;;  %v6155_v14 = vld [vmem:[%s8824_s2 + $0x10] ss:$24 sps:$4 sm:$0xff]  }
  0xf7   : > { %3491 = vmatprep.subr.bf16.mxu0 %v6082_v15  ;;  %v6163_v15 = vld [vmem:[%s8824_s2 + $0x44] ss:$24 sps:$4 sm:$0xff]  }
  0xf8   : > { %3574 = vmatpush1.bf16.msra.mxu1 %v6083_v23  ;;  %v6166_v23 = vld [vmem:[%s8824_s2 + $0x66c] ss:$24 sps:$4 sm:$0xff]  }
  0xf9   : > { %3575 = vmatprep.subr.bf16.mxu1 %v6091_v24  ;;  %v6161_v24 = vld [vmem:[%s8824_s2 + $0x40] ss:$24 sps:$4 sm:$0xff]  }
  0xfa   : > { %3492 = vmatpush1.bf16.msra.mxu0 %v6080_v11  ;;  %v6169_v11 = vld [vmem:[%s8824_s2 + $0x74] ss:$24 sps:$4 sm:$0xff]  }
  0xfb   : > { %3493 = vmatprep.subr.bf16.mxu0 %v6088_v27  ;;  %v6164_v27 = vld [vmem:[%s8824_s2 + $0x668] ss:$24 sps:$4 sm:$0xff]  }
  0xfc   : > { %3576 = vmatpush1.bf16.msra.mxu1 %v6089_v12  ;;  %v6172_v12 = vld [vmem:[%s8824_s2 + $0x69c] ss:$24 sps:$4 sm:$0xff]  }
  0xfd   : > { %3577 = vmatprep.subr.bf16.mxu1 %v6097_v13  ;;  %v6175_v13 = vld [vmem:[%s8824_s2 + $0xa4] ss:$24 sps:$4 sm:$0xff]  }
  0xfe   : > { %3494 = vmatpush1.bf16.msra.mxu0 %v6086_v30  ;;  %v6170_v30 = vld [vmem:[%s8824_s2 + $0x698] ss:$24 sps:$4 sm:$0xff]  }
  0xff   : > { %3495 = vmatprep.subr.bf16.mxu0 %v6094_v22  ;;  %v6178_v22 = vld [vmem:[%s8824_s2 + $0x6cc] ss:$24 sps:$4 sm:$0xff]  }
 0x100   : > { %3578 = vmatpush1.bf16.msra.mxu1 %v6095_v29  ;;  %v6173_v29 = vld [vmem:[%s8824_s2 + $0xa0] ss:$24 sps:$4 sm:$0xff]  }
 0x101   : > { %3579 = vmatprep.subr.bf16.mxu1 %v6103_v31  ;;  %v6181_v31 = vld [vmem:[%s8824_s2 + $0xd4] ss:$24 sps:$4 sm:$0xff]  }
 0x102   : > { %3496 = vmatpush1.bf16.msra.mxu0 %v6092_v16  ;;  %v6176_v16 = vld [vmem:[%s8824_s2 + $0x6c8] ss:$24 sps:$4 sm:$0xff]  }
 0x103   : > { %3497 = vmatprep.subr.bf16.mxu0 %v6100_v17  ;;  %v6184_v17 = vld [vmem:[%s8824_s2 + $0x6fc] ss:$24 sps:$4 sm:$0xff]  }
 0x104   : > { %3580 = vmatpush1.bf16.msra.mxu1 %v6101_v18  ;;  %v6179_v18 = vld [vmem:[%s8824_s2 + $0xd0] ss:$24 sps:$4 sm:$0xff]  }
 0x105   : > { %3581 = vmatprep.subr.bf16.mxu1 %v6109_v20  ;;  %v6187_v20 = vld [vmem:[%s8824_s2 + $0x104] ss:$24 sps:$4 sm:$0xff]  }
 0x106   : > { %3498 = vmatpush1.bf16.msra.mxu0 %v6098_v32  ;;  %v6182_v32 = vld [vmem:[%s8824_s2 + $0x6f8] ss:$24 sps:$4 sm:$0xff]  }
 0x107   : > { %3499 = vmatprep.subr.bf16.mxu0 %v6106_v33  ;;  %v6185_v33 = vld [vmem:[%s8824_s2 + $0x100] ss:$24 sps:$4 sm:$0xff]  }
 0x108   : > { %3582 = vmatpush1.bf16.msra.mxu1 %v6107_v34  ;;  %v6190_v34 = vld [vmem:[%s8824_s2 + $0x72c] ss:$24 sps:$4 sm:$0xff]  }
 0x109   : > { %3583 = vmatprep.subr.bf16.mxu1 %v6115_v35  ;;  %v6188_v35 = vld [vmem:[%s8824_s2 + $0x728] ss:$24 sps:$4 sm:$0xff]  }
 0x10a   : > { %3500 = vmatpush1.bf16.msra.mxu0 %v6104_v36  ;;  %v6193_v36 = vld [vmem:[%s8824_s2 + $0x134] ss:$24 sps:$4 sm:$0xff]  }
 0x10b   : > { %3501 = vmatprep.subr.bf16.mxu0 %v6112_v38  ;;  %v6196_v38 = vld [vmem:[%s8824_s2 + $0x75c] ss:$24 sps:$4 sm:$0xff]  }
 0x10c   : > { %3584 = vmatpush1.bf16.msra.mxu1 %v6113_v39  ;;  %v6191_v39 = vld [vmem:[%s8824_s2 + $0x130] ss:$24 sps:$4 sm:$0xff]  }
 0x10d   : > { %3585 = vmatprep.subr.bf16.mxu1 %v6121_v40  ;;  %v6194_v40 = vld [vmem:[%s8824_s2 + $0x758] ss:$24 sps:$4 sm:$0xff]  }
 0x10e   : > { %3502 = vmatpush1.bf16.msra.mxu0 %v6110_v41  ;;  %v6199_v41 = vld [vmem:[%s8824_s2 + $0x164] ss:$24 sps:$4 sm:$0xff]  }
 0x10f   : > { %3503 = vmatprep.subr.bf16.mxu0 %v6118_v42  ;;  %v6202_v42 = vld [vmem:[%s8824_s2 + $0x78c] ss:$24 sps:$4 sm:$0xff]  }
 0x110   : > { %3586 = vmatpush1.bf16.msra.mxu1 %v6119_v43  ;;  %v6197_v43 = vld [vmem:[%s8824_s2 + $0x160] ss:$24 sps:$4 sm:$0xff]  }
 0x111   : > { %3587 = vmatprep.subr.bf16.mxu1 %v6127_v44  ;;  %v6200_v44 = vld [vmem:[%s8824_s2 + $0x788] ss:$24 sps:$4 sm:$0xff]  }
 0x112   : > { %3504 = vmatpush1.bf16.msra.mxu0 %v6116_v46  ;;  %v6205_v46 = vld [vmem:[%s8824_s2 + $0x194] ss:$24 sps:$4 sm:$0xff]  }
 0x113   : > { %3505 = vmatprep.subr.bf16.mxu0 %v6124_v47  ;;  %v6208_v47 = vld [vmem:[%s8824_s2 + $0x7bc] ss:$24 sps:$4 sm:$0xff]  }
 0x114   : > { %3588 = vmatpush1.bf16.msra.mxu1 %v6125_v48  ;;  %v6203_v48 = vld [vmem:[%s8824_s2 + $0x190] ss:$24 sps:$4 sm:$0xff]  }
 0x115   : > { %3589 = vmatprep.subr.bf16.mxu1 %v6133_v49  ;;  %v6206_v49 = vld [vmem:[%s8824_s2 + $0x7b8] ss:$24 sps:$4 sm:$0xff]  }
 0x116   : > { %3506 = vmatpush1.bf16.msra.mxu0 %v6122_v50  ;;  %v6211_v50 = vld [vmem:[%s8824_s2 + $0x1c4] ss:$24 sps:$4 sm:$0xff]  }
 0x117   : > { %3507 = vmatprep.subr.bf16.mxu0 %v6130_v52  ;;  %v6214_v52 = vld [vmem:[%s8824_s2 + $0x7ec] ss:$24 sps:$4 sm:$0xff]  }
 0x118   : > { %3590 = vmatpush1.bf16.msra.mxu1 %v6131_v53  ;;  %v6209_v53 = vld [vmem:[%s8824_s2 + $0x1c0] ss:$24 sps:$4 sm:$0xff]  }
 0x119   : > { %3591 = vmatprep.subr.bf16.mxu1 %v6139_v54  ;;  %v6212_v54 = vld [vmem:[%s8824_s2 + $0x7e8] ss:$24 sps:$4 sm:$0xff]  }
 0x11a   : > { %3508 = vmatpush1.bf16.msra.mxu0 %v6128_v55  ;;  %v6217_v55 = vld [vmem:[%s8824_s2 + $0x1f4] ss:$24 sps:$4 sm:$0xff]  }
 0x11b   : > { %3509 = vmatprep.subr.bf16.mxu0 %v6136_v56  ;;  %v6220_v56 = vld [vmem:[%s8824_s2 + $0x81c] ss:$24 sps:$4 sm:$0xff]  }
 0x11c   : > { %3592 = vmatpush1.bf16.msra.mxu1 %v6137_v57  ;;  %v6215_v57 = vld [vmem:[%s8824_s2 + $0x1f0] ss:$24 sps:$4 sm:$0xff]  }
 0x11d   : > { %3593 = vmatprep.subr.bf16.mxu1 %v6145_v58  ;;  %v6223_v58 = vld [vmem:[%s8824_s2 + $0x224] ss:$24 sps:$4 sm:$0xff]  }
 0x11e   : > { %3510 = vmatpush1.bf16.msra.mxu0 %v6134_v60  ;;  %v6218_v60 = vld [vmem:[%s8824_s2 + $0x818] ss:$24 sps:$4 sm:$0xff]  }
 0x11f   : > { %3511 = vmatprep.subr.bf16.mxu0 %v6142_v61  ;;  %v6226_v61 = vld [vmem:[%s8824_s2 + $0x84c] ss:$24 sps:$4 sm:$0xff]  }
 0x120   : > { %3594 = vmatpush1.bf16.msra.mxu1 %v6143_v63  ;;  %v6221_v63 = vld [vmem:[%s8824_s2 + $0x220] ss:$24 sps:$4 sm:$0xff]  }
 0x121   : > { %3595 = vmatprep.subr.bf16.mxu1 %v6151_v0  ;;  %v6229_v0 = vld [vmem:[%s8824_s2 + $0x254] ss:$24 sps:$4 sm:$0xff]  }
 0x122   : > { %3512 = vmatpush1.bf16.msra.mxu0 %v6140_v1  ;;  %v6224_v1 = vld [vmem:[%s8824_s2 + $0x848] ss:$24 sps:$4 sm:$0xff]  }
 0x123   : > { %3513 = vmatprep.subr.bf16.mxu0 %v6148_v2  ;;  %v6232_v2 = vld [vmem:[%s8824_s2 + $0x87c] ss:$24 sps:$4 sm:$0xff]  }
 0x124   : > { %3596 = vmatpush1.bf16.msra.mxu1 %v6149_v3  ;;  %v6227_v3 = vld [vmem:[%s8824_s2 + $0x250] ss:$24 sps:$4 sm:$0xff]  }
 0x125   : > { %3606 = vmatprep.subr.bf16.mxu1 %v6154_v5  ;;  %v6235_v5 = vld [vmem:[%s8824_s2 + $0x284] ss:$24 sps:$4 sm:$0xff]  }
 0x126   : > { %3514 = vmatpush1.bf16.msra.mxu0 %v6146_v6  ;;  %v6230_v6 = vld [vmem:[%s8824_s2 + $0x878] ss:$24 sps:$4 sm:$0xff]  }
 0x127   : > { %3688 = vmatprep.subr.bf16.mxu0 %v6157_v7  ;;  %3598 = vmatmul.mubr.bf16.vlgmr.msra.gmra.mrb[4].mxu1 %v6971_v25  ;;  %v6238_v7 = vld [vmem:[%s8824_s2 + $0x8ac] ss:$24 sps:$4 sm:$0xff]  }
 0x128   : > { %3607 = vmatpush1.bf16.msra.mxu1 %v6152_v8  ;;  %3638 = vmatprep.mubr.bf16.mxu1 %v7154_v37  ;;  %v6233_v8 = vld [vmem:[%s8824_s2 + $0x280] ss:$24 sps:$4 sm:$0xff]  }
 0x129   : > { %3516 = vmatmul.mubr.bf16.vlgmr.msra.gmra.mrb[0].mxu0 %v7415_v9  ;;  %3608 = vmatprep.subr.bf16.mxu1 %v6160_v10  ;;  %v6241_v10 = vld [vmem:[%s8824_s2 + $0x2b4] ss:$24 sps:$4 sm:$0xff]  }
 0x12a   : > { %3689 = vmatpush1.bf16.msra.mxu0 %v6155_v14  ;;  %3720 = vmatprep.mubr.bf16.mxu0 %v6966_v21  ;;  %v6167_v21 = vld [vmem:[%s8824_s2 + $0x70] ss:$24 sps:$4 sm:$0xff]  }
 0x12b   : > { %3690 = vmatprep.subr.bf16.mxu0 %v6163_v15  ;;  %v6236_v14 = vld [vmem:[%s8824_s2 + $0x8a8] ss:$24 sps:$4 sm:$0xff]   ;;  %v6244_v15 = vld [vmem:[%s8824_s2 + $0x8dc] ss:$24 sps:$4 sm:$0xff]  }
 0x12c   : > { %3609 = vmatpush1.bf16.msra.mxu1 %v6158_v51  ;;  %v6239_v51 = vld [vmem:[%s8824_s2 + $0x2b0] ss:$24 sps:$4 sm:$0xff]  }
 0x12d   : > { %3610 = vmatprep.subr.bf16.mxu1 %v6166_v23  ;;  %v6247_v23 = vld [vmem:[%s8824_s2 + $0x2e4] ss:$24 sps:$4 sm:$0xff]  }
 0x12e   : > { %3691 = vmatpush1.bf16.msra.mxu0 %v6161_v24  ;;  %v6242_v24 = vld [vmem:[%s8824_s2 + $0x8d8] ss:$24 sps:$4 sm:$0xff]  }
 0x12f   : > { %3692 = vmatprep.subr.bf16.mxu0 %v6169_v11  ;;  %v6250_v11 = vld [vmem:[%s8824_s2 + $0x90c] ss:$24 sps:$4 sm:$0xff]  }
 0x130   : > { %3611 = vmatpush1.bf16.msra.mxu1 %v6164_v27  ;;  %v6245_v27 = vld [vmem:[%s8824_s2 + $0x2e0] ss:$24 sps:$4 sm:$0xff]  }
 0x131   : > { %3612 = vmatprep.subr.bf16.mxu1 %v6172_v12  ;;  %v6253_v12 = vld [vmem:[%s8824_s2 + $0x314] ss:$24 sps:$4 sm:$0xff]  }
 0x132   : > { %3693 = vmatpush1.bf16.msra.mxu0 %v6167_v21  ;;  %v6248_v21 = vld [vmem:[%s8824_s2 + $0x908] ss:$24 sps:$4 sm:$0xff]  }
 0x133   : > { %3694 = vmatprep.subr.bf16.mxu0 %v6175_v13  ;;  %v6256_v13 = vld [vmem:[%s8824_s2 + $0x93c] ss:$24 sps:$4 sm:$0xff]  }
 0x134   : > { %3613 = vmatpush1.bf16.msra.mxu1 %v6170_v30  ;;  %v6251_v30 = vld [vmem:[%s8824_s2 + $0x310] ss:$24 sps:$4 sm:$0xff]  }
 0x135   : > { %3614 = vmatprep.subr.bf16.mxu1 %v6178_v22  ;;  %v6259_v22 = vld [vmem:[%s8824_s2 + $0x344] ss:$24 sps:$4 sm:$0xff]  }
 0x136   : > { %3695 = vmatpush1.bf16.msra.mxu0 %v6173_v29  ;;  %v6254_v29 = vld [vmem:[%s8824_s2 + $0x938] ss:$24 sps:$4 sm:$0xff]  }
 0x137   : > { %3696 = vmatprep.subr.bf16.mxu0 %v6181_v31  ;;  %v6262_v31 = vld [vmem:[%s8824_s2 + $0x96c] ss:$24 sps:$4 sm:$0xff]  }
 0x138   : > { %3615 = vmatpush1.bf16.msra.mxu1 %v6176_v16  ;;  %v6257_v16 = vld [vmem:[%s8824_s2 + $0x340] ss:$24 sps:$4 sm:$0xff]  }
 0x139   : > { %3616 = vmatprep.subr.bf16.mxu1 %v6184_v17  ;;  %v6265_v17 = vld [vmem:[%s8824_s2 + $0x374] ss:$24 sps:$4 sm:$0xff]  }
 0x13a   : > { %3697 = vmatpush1.bf16.msra.mxu0 %v6179_v18  ;;  %v6268_v18 = vld [vmem:[%s8824_s2 + $0x99c] ss:$24 sps:$4 sm:$0xff]  }
 0x13b   : > { %3698 = vmatprep.subr.bf16.mxu0 %v6187_v20  ;;  %v6271_v20 = vld [vmem:[%s8824_s2 + $0x3a4] ss:$24 sps:$4 sm:$0xff]  }
 0x13c   : > { %3617 = vmatpush1.bf16.msra.mxu1 %v6182_v32  ;;  %v6266_v32 = vld [vmem:[%s8824_s2 + $0x998] ss:$24 sps:$4 sm:$0xff]  }
 0x13d   : > { %3618 = vmatprep.subr.bf16.mxu1 %v6190_v34  ;;  %v6269_v34 = vld [vmem:[%s8824_s2 + $0x3a0] ss:$24 sps:$4 sm:$0xff]  }
 0x13e   : > { %3699 = vmatpush1.bf16.msra.mxu0 %v6185_v33  ;;  %v6274_v33 = vld [vmem:[%s8824_s2 + $0x9cc] ss:$24 sps:$4 sm:$0xff]  }
 0x13f   : > { %3700 = vmatprep.subr.bf16.mxu0 %v6193_v36  ;;  %v6272_v36 = vld [vmem:[%s8824_s2 + $0x9c8] ss:$24 sps:$4 sm:$0xff]  }
 0x140   : > { %3619 = vmatpush1.bf16.msra.mxu1 %v6188_v35  ;;  %v6277_v35 = vld [vmem:[%s8824_s2 + $0x3d4] ss:$24 sps:$4 sm:$0xff]  }
 0x141   : > { %3620 = vmatprep.subr.bf16.mxu1 %v6196_v38  ;;  %v6280_v38 = vld [vmem:[%s8824_s2 + $0x9fc] ss:$24 sps:$4 sm:$0xff]  }
 0x142   : > { %3701 = vmatpush1.bf16.msra.mxu0 %v6191_v39  ;;  %v6275_v39 = vld [vmem:[%s8824_s2 + $0x3d0] ss:$24 sps:$4 sm:$0xff]  }
 0x143   : > { %3702 = vmatprep.subr.bf16.mxu0 %v6199_v41  ;;  %v6278_v41 = vld [vmem:[%s8824_s2 + $0x9f8] ss:$24 sps:$4 sm:$0xff]  }
 0x144   : > { %3621 = vmatpush1.bf16.msra.mxu1 %v6194_v40  ;;  %v6283_v40 = vld [vmem:[%s8824_s2 + $0x404] ss:$24 sps:$4 sm:$0xff]  }
 0x145   : > { %3622 = vmatprep.subr.bf16.mxu1 %v6202_v42  ;;  %v6286_v42 = vld [vmem:[%s8824_s2 + $0xa2c] ss:$24 sps:$4 sm:$0xff]  }
 0x146   : > { %3703 = vmatpush1.bf16.msra.mxu0 %v6197_v43  ;;  %v6281_v43 = vld [vmem:[%s8824_s2 + $0x400] ss:$24 sps:$4 sm:$0xff]  }
 0x147   : > { %3704 = vmatprep.subr.bf16.mxu0 %v6205_v46  ;;  %v6289_v46 = vld [vmem:[%s8824_s2 + $0x434] ss:$24 sps:$4 sm:$0xff]  }
 0x148   : > { %3623 = vmatpush1.bf16.msra.mxu1 %v6200_v44 }
 0x149   : > { %3624 = vmatprep.subr.bf16.mxu1 %v6208_v47 }
 0x14a   : > { %3705 = vmatpush1.bf16.msra.mxu0 %v6203_v48  ;;  %v6284_v48 = vld [vmem:[%s8824_s2 + $0xa28] ss:$24 sps:$4 sm:$0xff]  }
 0x14b   : > { %3706 = vmatprep.subr.bf16.mxu0 %v6211_v50  ;;  %v6292_v50 = vld [vmem:[%s8824_s2 + $0xa5c] ss:$24 sps:$4 sm:$0xff]  }
 0x14c   : > { %3625 = vmatpush1.bf16.msra.mxu1 %v6206_v49 }
 0x14d   : > { %3626 = vmatprep.subr.bf16.mxu1 %v6214_v52 }
 0x14e   : > { %3707 = vmatpush1.bf16.msra.mxu0 %v6209_v53  ;;  %v6287_v53 = vld [vmem:[%s8824_s2 + $0x430] ss:$24 sps:$4 sm:$0xff]  }
 0x14f   : > { %3708 = vmatprep.subr.bf16.mxu0 %v6217_v55  ;;  %v6290_v55 = vld [vmem:[%s8824_s2 + $0xa58] ss:$24 sps:$4 sm:$0xff]  }
 0x150   : > { %3627 = vmatpush1.bf16.msra.mxu1 %v6212_v54  ;;  %v6295_v54 = vld [vmem:[%s8824_s2 + $0x464] ss:$24 sps:$4 sm:$0xff]  }
 0x151   : > { %3628 = vmatprep.subr.bf16.mxu1 %v6220_v56  ;;  %v6298_v56 = vld [vmem:[%s8824_s2 + $0xa8c] ss:$24 sps:$4 sm:$0xff]  }
 0x152   : > { %3709 = vmatpush1.bf16.msra.mxu0 %v6215_v57  ;;  %v6293_v57 = vld [vmem:[%s8824_s2 + $0x460] ss:$24 sps:$4 sm:$0xff]  }
 0x153   : > { %3710 = vmatprep.subr.bf16.mxu0 %v6223_v58  ;;  %v6301_v58 = vld [vmem:[%s8824_s2 + $0x494] ss:$24 sps:$4 sm:$0xff]  }
 0x154   : > { %3629 = vmatpush1.bf16.msra.mxu1 %v6218_v60  ;;  %v6296_v60 = vld [vmem:[%s8824_s2 + $0xa88] ss:$24 sps:$4 sm:$0xff]  }
 0x155   : > { %3630 = vmatprep.subr.bf16.mxu1 %v6226_v61  ;;  %v6304_v61 = vld [vmem:[%s8824_s2 + $0xabc] ss:$24 sps:$4 sm:$0xff]  }
 0x156   : > { %3711 = vmatpush1.bf16.msra.mxu0 %v6221_v63  ;;  %v6299_v63 = vld [vmem:[%s8824_s2 + $0x490] ss:$24 sps:$4 sm:$0xff]  }
 0x157   : > { %3712 = vmatprep.subr.bf16.mxu0 %v6229_v0  ;;  %v6307_v0 = vld [vmem:[%s8824_s2 + $0x4c4] ss:$24 sps:$4 sm:$0xff]  }
 0x158   : > { %3631 = vmatpush1.bf16.msra.mxu1 %v6224_v1  ;;  %v6302_v1 = vld [vmem:[%s8824_s2 + $0xab8] ss:$24 sps:$4 sm:$0xff]  }
 0x159   : > { %3632 = vmatprep.subr.bf16.mxu1 %v6232_v2  ;;  %v6310_v2 = vld [vmem:[%s8824_s2 + $0xaec] ss:$24 sps:$4 sm:$0xff]  }
 0x15a   : > { %3713 = vmatpush1.bf16.msra.mxu0 %v6227_v3  ;;  %v6305_v3 = vld [vmem:[%s8824_s2 + $0x4c0] ss:$24 sps:$4 sm:$0xff]  }
 0x15b   : > { %3714 = vmatprep.subr.bf16.mxu0 %v6235_v5  ;;  %v6313_v5 = vld [vmem:[%s8824_s2 + $0x4f4] ss:$24 sps:$4 sm:$0xff]  }
 0x15c   : > { %3633 = vmatpush1.bf16.msra.mxu1 %v6230_v6  ;;  %v6308_v6 = vld [vmem:[%s8824_s2 + $0xae8] ss:$24 sps:$4 sm:$0xff]  }
 0x15d   : > { %3634 = vmatprep.subr.bf16.mxu1 %v6238_v7  ;;  %v6316_v7 = vld [vmem:[%s8824_s2 + $0xb1c] ss:$24 sps:$4 sm:$0xff]  }
 0x15e   : > { %3715 = vmatpush1.bf16.msra.mxu0 %v6233_v8  ;;  %v6311_v8 = vld [vmem:[%s8824_s2 + $0x4f0] ss:$24 sps:$4 sm:$0xff]  }
 0x15f   : > { %3716 = vmatprep.subr.bf16.mxu0 %v6241_v10  ;;  %v6319_v10 = vld [vmem:[%s8824_s2 + $0x524] ss:$24 sps:$4 sm:$0xff]  }
 0x160   : > { %3635 = vmatpush1.bf16.msra.mxu1 %v6236_v14  ;;  %v6314_v14 = vld [vmem:[%s8824_s2 + $0xb18] ss:$24 sps:$4 sm:$0xff]  }
 0x161   : > { %3636 = vmatprep.subr.bf16.mxu1 %v6244_v15  ;;  %v6322_v15 = vld [vmem:[%s8824_s2 + $0xb4c] ss:$24 sps:$4 sm:$0xff]  }
 0x162   : > { %3717 = vmatpush1.bf16.msra.mxu0 %v6239_v51  ;;  %v6317_v51 = vld [vmem:[%s8824_s2 + $0x520] ss:$24 sps:$4 sm:$0xff]  }
 0x163   : > { %3718 = vmatprep.subr.bf16.mxu0 %v6247_v23  ;;  %v6325_v23 = vld [vmem:[%s8824_s2 + $0x554] ss:$24 sps:$4 sm:$0xff]  }
 0x164   : > { %3637 = vmatpush1.bf16.msra.mxu1 %v6242_v24  ;;  %v6320_v24 = vld [vmem:[%s8824_s2 + $0xb48] ss:$24 sps:$4 sm:$0xff]  }
 0x165   : > { %3647 = vmatprep.subr.bf16.mxu1 %v6250_v11  ;;  %v6328_v11 = vld [vmem:[%s8824_s2 + $0xb7c] ss:$24 sps:$4 sm:$0xff]  }
 0x166   : > { %3719 = vmatpush1.bf16.msra.mxu0 %v6245_v27  ;;  %v6323_v27 = vld [vmem:[%s8824_s2 + $0x550] ss:$24 sps:$4 sm:$0xff]  }
 0x167   : > { %3729 = vmatprep.subr.bf16.mxu0 %v6253_v12  ;;  %3639 = vmatmul.mubr.bf16.vlgmr.msra.gmra.mrb[4].mxu1 %v7213_v59  ;;  %v6331_v12 = vld [vmem:[%s8824_s2 + $0x584] ss:$24 sps:$4 sm:$0xff]  }
 0x168   : > { %3648 = vmatpush1.bf16.msra.mxu1 %v6248_v21  ;;  %3679 = vmatprep.mubr.bf16.mxu1 %v7221_v62  ;;  %v6326_v21 = vld [vmem:[%s8824_s2 + $0xb78] ss:$24 sps:$4 sm:$0xff]  }
 0x169   : > { %3721 = vmatmul.mubr.bf16.vlgmr.msra.gmra.mrb[4].mxu0 %v6964_v19  ;;  %3649 = vmatprep.subr.bf16.mxu1 %v6256_v13  ;;  %v6260_v19 = vld [vmem:[%s8824_s2 + $0x968] ss:$24 sps:$4 sm:$0xff]   ;;  %v6334_v13 = vld [vmem:[%s8824_s2 + $0xbac] ss:$24 sps:$4 sm:$0xff]  }
 0x16a   : > { %3730 = vmatpush1.bf16.msra.mxu0 %v6251_v30  ;;  %3761 = vmatprep.mubr.bf16.mxu0 %v6977_v26  ;;  %v6263_v26 = vld [vmem:[%s8824_s2 + $0x370] ss:$24 sps:$4 sm:$0xff]   ;;  %v6329_v30 = vld [vmem:[%s8824_s2 + $0x580] ss:$24 sps:$4 sm:$0xff]  }
 0x16b   : > { %3731 = vmatprep.subr.bf16.mxu0 %v6259_v22  ;;  %v6337_v22 = vld [vmem:[%s8824_s2 + $0x5b4] ss:$24 sps:$4 sm:$0xff]  }
 0x16c   : > { %3650 = vmatpush1.bf16.msra.mxu1 %v6254_v29  ;;  %v6332_v29 = vld [vmem:[%s8824_s2 + $0xba8] ss:$24 sps:$4 sm:$0xff]  }
 0x16d   : > { %3651 = vmatprep.subr.bf16.mxu1 %v6262_v31  ;;  %v6340_v31 = vld [vmem:[%s8824_s2 + $0xbdc] ss:$24 sps:$4 sm:$0xff]  }
 0x16e   : > { %3732 = vmatpush1.bf16.msra.mxu0 %v6257_v16  ;;  %v6335_v16 = vld [vmem:[%s8824_s2 + $0x5b0] ss:$24 sps:$4 sm:$0xff]  }
 0x16f   : > { %3733 = vmatprep.subr.bf16.mxu0 %v6265_v17  ;;  %v6343_v17 = vld [vmem:[%s8824_s2 + $0x5e4] ss:$24 sps:$4 sm:$0xff]  }
 0x170   : > { %3652 = vmatpush1.bf16.msra.mxu1 %v6260_v19  ;;  %v6338_v19 = vld [vmem:[%s8824_s2 + $0xbd8] ss:$24 sps:$4 sm:$0xff]  }
 0x171   : > { %3653 = vmatprep.subr.bf16.mxu1 %v6268_v18  ;;  %v6341_v18 = vld [vmem:[%s8824_s2 + $0x5e0] ss:$24 sps:$4 sm:$0xff]  }
 0x172   : > { %3734 = vmatpush1.bf16.msra.mxu0 %v6263_v26  ;;  %v6346_v26 = vld [vmem:[%s8824_s2 + $0x614] ss:$24 sps:$4 sm:$0xff]  }
 0x173   : > { %3735 = vmatprep.subr.bf16.mxu0 %v6271_v20  ;;  %v6344_v20 = vld [vmem:[%s8824_s2 + $0x610] ss:$24 sps:$4 sm:$0xff]  }
 0x174   : > { %3654 = vmatpush1.bf16.msra.mxu1 %v6266_v32  ;;  %v6349_v32 = vld [vmem:[%s8824_s2 + $0x644] ss:$24 sps:$4 sm:$0xff]  }
 0x175   : > { %3655 = vmatprep.subr.bf16.mxu1 %v6274_v33  ;;  %v6347_v33 = vld [vmem:[%s8824_s2 + $0x640] ss:$24 sps:$4 sm:$0xff]  }
 0x176   : > { %3736 = vmatpush1.bf16.msra.mxu0 %v6269_v34  ;;  %v6352_v34 = vld [vmem:[%s8824_s2 + $0x674] ss:$24 sps:$4 sm:$0xff]  }
 0x177   : > { %3737 = vmatprep.subr.bf16.mxu0 %v6277_v35  ;;  %v6350_v35 = vld [vmem:[%s8824_s2 + $0x670] ss:$24 sps:$4 sm:$0xff]  }
 0x178   : > { %3656 = vmatpush1.bf16.msra.mxu1 %v6272_v36  ;;  %v6358_v36 = vld [vmem:[%s8824_s2 + $0x6d4] ss:$24 sps:$4 sm:$0xff]  }
 0x179   : > { %3657 = vmatprep.subr.bf16.mxu1 %v6280_v38  ;;  %v6356_v38 = vld [vmem:[%s8824_s2 + $0x6d0] ss:$24 sps:$4 sm:$0xff]  }
 0x17a   : > { %3738 = vmatpush1.bf16.msra.mxu0 %v6275_v39  ;;  %v7683_v44 = vpop.f32.mrb[0].mxu1  ;;  %v6361_v39 = vld [vmem:[%s8824_s2 + $0x704] ss:$24 sps:$4 sm:$0xff]  }
 0x17b   : > { %3739 = vmatprep.subr.bf16.mxu0 %v6283_v40  ;;  %v7688_v47 = vpop.f32.mrb[1].mxu1  ;;  %v6359_v40 = vld [vmem:[%s8824_s2 + $0x700] ss:$24 sps:$4 sm:$0xff]  }
 0x17c   : > { %3658 = vmatpush1.bf16.msra.mxu1 %v6278_v41  ;;  %v3398_v49 = vpop.f32.mrb[2].mxu1  ;;  %v6364_v41 = vld [vmem:[%s8824_s2 + $0x734] ss:$24 sps:$4 sm:$0xff]  }
 0x17d   : > { %3659 = vmatprep.subr.bf16.mxu1 %v6286_v42  ;;  %v3399_v52 = vpop.f32.mrb[3].mxu1  ;;  %v6362_v42 = vld [vmem:[%s8824_s2 + $0x730] ss:$24 sps:$4 sm:$0xff]  }
 0x17e   : > { %3740 = vmatpush1.bf16.msra.mxu0 %v6281_v43  ;;  %v6367_v43 = vld [vmem:[%s8824_s2 + $0x764] ss:$24 sps:$4 sm:$0xff]   ;;  %v6368_v49 = vld [vmem:[%s8824_s2 + $0x790] ss:$24 sps:$4 sm:$0xff]   ;;  %v6371_v52 = vld [vmem:[%s8824_s2 + $0x7c0] ss:$24 sps:$4 sm:$0xff]  }
 0x17f   : > { %3741 = vmatprep.subr.bf16.mxu0 %v6289_v46  ;;  %v6365_v46 = vld [vmem:[%s8824_s2 + $0x760] ss:$24 sps:$4 sm:$0xff]  }
 0x180   : > { %3660 = vmatpush1.bf16.msra.mxu1 %v6284_v48  ;;  %v6370_v48 = vld [vmem:[%s8824_s2 + $0x794] ss:$24 sps:$4 sm:$0xff]  }
 0x181   : > { %3661 = vmatprep.subr.bf16.mxu1 %v6292_v50  ;;  %v6373_v50 = vld [vmem:[%s8824_s2 + $0x7c4] ss:$24 sps:$4 sm:$0xff]  }
 0x182   : > { %3742 = vmatpush1.bf16.msra.mxu0 %v6287_v53  ;;  %v6376_v53 = vld [vmem:[%s8824_s2 + $0x7f4] ss:$24 sps:$4 sm:$0xff]  }
 0x183   : > { %3743 = vmatprep.subr.bf16.mxu0 %v6295_v54  ;;  %v3998_v54 = vld [vmem:[%s8827_s5 + $0x180] sm:$0xff] }
 0x184   : > { %3662 = vmatpush1.bf16.msra.mxu1 %v6290_v55  ;;  %v3999_v55 = vld [vmem:[%s8827_s5 + $0x188] sm:$0xff] }
 0x185   : > { %3663 = vmatprep.subr.bf16.mxu1 %v6298_v56  ;;  %v3982_v56 = vld [vmem:[%s8827_s5 + $0x100] sm:$0xff] }
 0x186   : > { %3744 = vmatpush1.bf16.msra.mxu0 %v6293_v57  ;;  %v5603_v57 = vpack.c.bf16 %v3999_v55, %v3998_v54  ;;  %v6395_v54 = vld [vmem:[%s8824_s2 + $0x940] ss:$24 sps:$4 sm:$0xff]   ;;  %v6400_v55 = vld [vmem:[%s8824_s2 + $0x974] ss:$24 sps:$4 sm:$0xff]  }
 0x187   : > { %3745 = vmatprep.subr.bf16.mxu0 %v6301_v58  ;;  %v3983_v58 = vld [vmem:[%s8827_s5 + $0x108] sm:$0xff] }
 0x188   : > { %3664 = vmatpush1.bf16.msra.mxu1 %v6296_v60  ;;  %v4000_v60 = vld [vmem:[%s8827_s5 + $0x190] sm:$0xff] }
 0x189   : > { %3665 = vmatprep.subr.bf16.mxu1 %v6304_v61  ;;  %v4001_v61 = vld [vmem:[%s8827_s5 + $0x198] sm:$0xff] }
 0x18a   : > { %3746 = vmatpush1.bf16.msra.mxu0 %v6299_v63  ;;  %v5605_v63 = vpack.c.bf16 %v3983_v58, %v3982_v56  ;;  %v6398_v56 = vld [vmem:[%s8824_s2 + $0x970] ss:$24 sps:$4 sm:$0xff]   ;;  %v8019_v58 = vld [vmem:[%s8825_s3] sm:$0x3f] }
 0x18b   : > { %3747 = vmatprep.subr.bf16.mxu0 %v6307_v0  ;;  %v5607_v0 = vpack.c.bf16 %v4001_v61, %v4000_v60  ;;  %v6406_v60 = vld [vmem:[%s8824_s2 + $0x9d4] ss:$24 sps:$4 sm:$0xff]   ;;  %v8025_v61 = vsub.s32 1, %v6852_v28 }
 0x18c   : > { %3666 = vmatpush1.bf16.msra.mxu1 %v6302_v1  ;;  %v3984_v1 = vld [vmem:[%s8827_s5 + $0x110] sm:$0xff] }
 0x18d   : > { %3667 = vmatprep.subr.bf16.mxu1 %v6310_v2  ;;  %v3985_v2 = vld [vmem:[%s8827_s5 + $0x118] sm:$0xff] }
 0x18e   : > { %3748 = vmatpush1.bf16.msra.mxu0 %v6305_v3  ;;  %v4002_v3 = vld [vmem:[%s8827_s5 + $0x1a0] sm:$0xff] }
 0x18f   : > { %3749 = vmatprep.subr.bf16.mxu0 %v6313_v5  ;;  %v4003_v5 = vld [vmem:[%s8827_s5 + $0x1a8] sm:$0xff] }
 0x190   : > { %3668 = vmatpush1.bf16.msra.mxu1 %v6308_v6  ;;  %v5609_v6 = vpack.c.bf16 %v3985_v2, %v3984_v1  ;;  %v6409_v1 = vld [vmem:[%s8824_s2 + $0xa04] ss:$24 sps:$4 sm:$0xff]   ;;  %v1417_v2 = vrot.slane %v8019_v58, %v8025_v61 }
 0x191   : > { %3669 = vmatprep.subr.bf16.mxu1 %v6316_v7  ;;  %v6374_v7 = vld [vmem:[%s8824_s2 + $0x7f0] ss:$24 sps:$4 sm:$0xff]  }
 0x192   : > { %3750 = vmatpush1.bf16.msra.mxu0 %v6311_v8  ;;  %v5611_v8 = vpack.c.bf16 %v4003_v5, %v4002_v3  ;;  %v6407_v5 = vld [vmem:[%s8824_s2 + $0xa00] ss:$24 sps:$4 sm:$0xff]  }
 0x193   : > { %3751 = vmatprep.subr.bf16.mxu0 %v6319_v10  ;;  %v3986_v10 = vld [vmem:[%s8827_s5 + $0x120] sm:$0xff] }
 0x194   : > { %3670 = vmatpush1.bf16.msra.mxu1 %v6314_v14  ;;  %v3987_v14 = vld [vmem:[%s8827_s5 + $0x128] sm:$0xff] }
 0x195   : > { %3671 = vmatprep.subr.bf16.mxu1 %v6322_v15  ;;  %v6379_v15 = vld [vmem:[%s8824_s2 + $0x824] ss:$24 sps:$4 sm:$0xff]  }
 0x196   : > { %3752 = vmatpush1.bf16.msra.mxu0 %v6317_v51  ;;  %v4004_v51 = vld [vmem:[%s8827_s5 + $0x1b0] sm:$0xff] }
 0x197   : > { %3753 = vmatprep.subr.bf16.mxu0 %v6325_v23  ;;  %v4005_v23 = vld [vmem:[%s8827_s5 + $0x1b8] sm:$0xff] }
 0x198   : > { %3672 = vmatpush1.bf16.msra.mxu1 %v6320_v24  ;;  %v5613_v24 = vpack.c.bf16 %v3987_v14, %v3986_v10  ;;  %v3997_v14 = vld [vmem:[%s8827_s5 + $0x178] sm:$0xff] }
 0x199   : > { %3673 = vmatprep.subr.bf16.mxu1 %v6328_v11  ;;  %v6377_v11 = vld [vmem:[%s8824_s2 + $0x820] ss:$24 sps:$4 sm:$0xff]  }
 0x19a   : > { %3754 = vmatpush1.bf16.msra.mxu0 %v6323_v27  ;;  %v5615_v27 = vpack.c.bf16 %v4005_v23, %v4004_v51 }
 0x19b   : > { %3755 = vmatprep.subr.bf16.mxu0 %v6331_v12  ;;  %v3988_v12 = vld [vmem:[%s8827_s5 + $0x130] sm:$0xff] }
 0x19c   : > { %3674 = vmatpush1.bf16.msra.mxu1 %v6326_v21  ;;  %v3989_v21 = vld [vmem:[%s8827_s5 + $0x138] sm:$0xff] }
 0x19d   : > { %3675 = vmatprep.subr.bf16.mxu1 %v6334_v13  ;;  %v6382_v13 = vld [vmem:[%s8824_s2 + $0x854] ss:$24 sps:$4 sm:$0xff]  }
 0x19e   : > { %3756 = vmatpush1.bf16.msra.mxu0 %v6329_v30  ;;  %v4006_v30 = vld [vmem:[%s8827_s5 + $0x1c0] sm:$0xff] }
 0x19f   : > { %3757 = vmatprep.subr.bf16.mxu0 %v6337_v22  ;;  %v4007_v22 = vld [vmem:[%s8827_s5 + $0x1c8] sm:$0xff] }
 0x1a0   : > { %3676 = vmatpush1.bf16.msra.mxu1 %v6332_v29  ;;  %v5617_v29 = vpack.c.bf16 %v3989_v21, %v3988_v12  ;;  %v6410_v21 = vld [vmem:[%s8824_s2 + $0xa30] ss:$24 sps:$4 sm:$0xff]  }
 0x1a1   : > { %3677 = vmatprep.subr.bf16.mxu1 %v6340_v31  ;;  %v6380_v31 = vld [vmem:[%s8824_s2 + $0x850] ss:$24 sps:$4 sm:$0xff]  }
 0x1a2   : > { %3758 = vmatpush1.bf16.msra.mxu0 %v6335_v16  ;;  %v5619_v16 = vpack.c.bf16 %v4007_v22, %v4006_v30  ;;  %v6413_v30 = vld [vmem:[%s8824_s2 + $0xa60] ss:$24 sps:$4 sm:$0xff]   ;;  %v6418_v22 = vld [vmem:[%s8824_s2 + $0xa94] ss:$24 sps:$4 sm:$0xff]  }
 0x1a3   : > { %3759 = vmatprep.subr.bf16.mxu0 %v6343_v17  ;;  %v3990_v17 = vld [vmem:[%s8827_s5 + $0x140] sm:$0xff] }
 0x1a4   : > { %3678 = vmatpush1.bf16.msra.mxu1 %v6338_v19  ;;  %v3991_v19 = vld [vmem:[%s8827_s5 + $0x148] sm:$0xff] }
 0x1a5   : > { %5604 = vmatprep.subr.bf16.mxu1 %v5603_v57  ;;  %v8011_v57 = vsub.s32 0, %v6852_v28 }
 0x1a6   : > { %3760 = vmatpush1.bf16.msra.mxu0 %v6341_v18  ;;  %v6385_v18 = vld [vmem:[%s8824_s2 + $0x884] ss:$24 sps:$4 sm:$0xff]  }
 0x1a7   : > { %3680 = vmatmul.mubr.bf16.vlgmr.msra.gmra.mrb[4].mxu1 %v7415_v9  ;;  %3770 = vmatprep.subr.bf16.mxu0 %v6346_v26  ;;  %v4008_v26 = vld [vmem:[%s8827_s5 + $0x1d0] sm:$0xff] }
 0x1a8   : > { %5606 = vmatpush3.bf16.msra.mxu1 %v5605_v63  ;;  %v1413_v63 = vrot.slane %v8019_v58, %v8011_v57 }
 0x1a9   : > { %3762 = vmatmul.mubr.bf16.vlgmr.msra.gmra.mrb[4].mxu0 %v6971_v25  ;;  %v6355_v25 = vld [vmem:[%s8824_s2 + $0x6a4] ss:$24 sps:$4 sm:$0xff]   ;;  %5608 = vmatprep.subr.bf16.mxu1 %v5607_v0  ;;  %v6404_v0 = vld [vmem:[%s8824_s2 + $0x9d0] ss:$24 sps:$4 sm:$0xff]  }
 0x1aa   : > { %3771 = vmatpush1.bf16.msra.mxu0 %v6344_v20  ;;  %3802 = vmatprep.mubr.bf16.mxu0 %v7154_v37  ;;  %v6353_v37 = vld [vmem:[%s8824_s2 + $0x6a0] ss:$24 sps:$4 sm:$0xff]   ;;  %v3395_v3 = vadd.f32 %v7683_v44, %v1413_v63  ;;  %v3996_v44 = vld [vmem:[%s8827_s5 + $0x170] sm:$0xff] }
 0x1ab   : > { %3772 = vmatprep.subr.bf16.mxu0 %v6349_v32  ;;  %v4009_v20 = vld [vmem:[%s8827_s5 + $0x1d8] sm:$0xff]  ;;  %v5621_v32 = vpack.c.bf16 %v3991_v19, %v3990_v17  ;;  %v5633_v23 = vpack.c.bf16 %v3997_v14, %v3996_v44  ;;  %v6416_v17 = vld [vmem:[%s8824_s2 + $0xa90] ss:$24 sps:$4 sm:$0xff]   ;;  %v3954_v63 = vld [vmem:[%s8827_s5 + $0x20] sm:$0xff] }
 0x1ac   : > { %5610 = vmatpush3.bf16.msra.mxu1 %v5609_v6  ;;  %v4012_v6 = vld [vmem:[%s8827_s5 + $0x1f0] sm:$0xff]  ;;  %v6421_v19 = vld [vmem:[%s8824_s2 + $0xac4] ss:$24 sps:$4 sm:$0xff]  }
 0x1ad   : > { %5612 = vmatprep.subr.bf16.mxu1 %v5611_v8  ;;  %v6412_v8 = vld [vmem:[%s8824_s2 + $0xa34] ss:$24 sps:$4 sm:$0xff]   ;;  %v3958_v14 = vld [vmem:[%s8827_s5 + $0x40] sm:$0xff] }
 0x1ae   : > { %3773 = vmatpush1.bf16.msra.mxu0 %v6347_v33  ;;  %v6383_v33 = vld [vmem:[%s8824_s2 + $0x880] ss:$24 sps:$4 sm:$0xff]  }
 0x1af   : > { %3774 = vmatprep.subr.bf16.mxu0 %v6352_v34  ;;  %v5623_v34 = vpack.c.bf16 %v4009_v20, %v4008_v26  ;;  %v6424_v26 = vld [vmem:[%s8824_s2 + $0xaf4] ss:$24 sps:$4 sm:$0xff]   ;;  %v6422_v20 = vld [vmem:[%s8824_s2 + $0xaf0] ss:$24 sps:$4 sm:$0xff]  }
 0x1b0   : > { %5614 = vmatpush3.bf16.msra.mxu1 %v5613_v24 }
 0x1b1   : > { %5616 = vmatprep.subr.bf16.mxu1 %v5615_v27 }
 0x1b2   : > { %3775 = vmatpush1.bf16.msra.mxu0 %v6350_v35  ;;  %v3992_v35 = vld [vmem:[%s8827_s5 + $0x150] sm:$0xff] }
 0x1b3   : > { %3776 = vmatprep.subr.bf16.mxu0 %v6355_v25  ;;  %v3993_v25 = vld [vmem:[%s8827_s5 + $0x158] sm:$0xff] }
 0x1b4   : > { %5618 = vmatpush3.bf16.msra.mxu1 %v5617_v29  ;;  %v4030_v29 = vld [vmem:[%s8827_s5 + $0x280] sm:$0xff] }
 0x1b5   : > { %5620 = vmatprep.subr.bf16.mxu1 %v5619_v16 }
 0x1b6   : > { %3777 = vmatpush1.bf16.msra.mxu0 %v6353_v37  ;;  %v6388_v37 = vld [vmem:[%s8824_s2 + $0x8b4] ss:$24 sps:$4 sm:$0xff]  }
 0x1b7   : > { %3778 = vmatprep.subr.bf16.mxu0 %v6358_v36  ;;  %v4010_v36 = vld [vmem:[%s8827_s5 + $0x1e0] sm:$0xff] }
 0x1b8   : > { %5622 = vmatpush3.bf16.msra.mxu1 %v5621_v32  ;;  %v6427_v32 = vld [vmem:[%s8824_s2 + $0xb24] ss:$24 sps:$4 sm:$0xff]  }
 0x1b9   : > { %5624 = vmatprep.subr.bf16.mxu1 %v5623_v34  ;;  %v6430_v34 = vld [vmem:[%s8824_s2 + $0xb54] ss:$24 sps:$4 sm:$0xff]  }
 0x1ba   : > { %3779 = vmatpush1.bf16.msra.mxu0 %v6356_v38  ;;  %v4011_v38 = vld [vmem:[%s8827_s5 + $0x1e8] sm:$0xff] }
 0x1bb   : > { %3780 = vmatprep.subr.bf16.mxu0 %v6361_v39  ;;  %v5625_v39 = vpack.c.bf16 %v3993_v25, %v3992_v35  ;;  %v6428_v35 = vld [vmem:[%s8824_s2 + $0xb50] ss:$24 sps:$4 sm:$0xff]   ;;  %v6433_v25 = vld [vmem:[%s8824_s2 + $0xb84] ss:$24 sps:$4 sm:$0xff]  }
 0x1bd   : > { %5626 = vmatpush3.bf16.msra.mxu1 %v5625_v39  ;;  %v6439_v39 = vld [vmem:[%s8824_s2 + $0xbe4] ss:$24 sps:$4 sm:$0xff]  }
 0x1be   : > { %3781 = vmatpush1.bf16.msra.mxu0 %v6359_v40  ;;  %v6386_v40 = vld [vmem:[%s8824_s2 + $0x8b0] ss:$24 sps:$4 sm:$0xff]  }
 0x1bf   : > { %3782 = vmatprep.subr.bf16.mxu0 %v6364_v41  ;;  %v5627_v41 = vpack.c.bf16 %v4011_v38, %v4010_v36  ;;  %v6436_v36 = vld [vmem:[%s8824_s2 + $0xbb4] ss:$24 sps:$4 sm:$0xff]   ;;  %v6434_v38 = vld [vmem:[%s8824_s2 + $0xbb0] ss:$24 sps:$4 sm:$0xff]  }
 0x1c1   : > { %5628 = vmatprep.subr.bf16.mxu1 %v5627_v41  ;;  %v3967_v41 = vld [vmem:[%s8827_s5 + $0x88] sm:$0xff] }
 0x1c2   : > { %3783 = vmatpush1.bf16.msra.mxu0 %v6362_v42  ;;  %v3994_v42 = vld [vmem:[%s8827_s5 + $0x160] sm:$0xff] }
 0x1c3   : > { %3784 = vmatprep.subr.bf16.mxu0 %v6367_v43  ;;  %v3995_v43 = vld [vmem:[%s8827_s5 + $0x168] sm:$0xff] }
 0x1c6   : > { %3785 = vmatpush1.bf16.msra.mxu0 %v6365_v46  ;;  %v6391_v46 = vld [vmem:[%s8824_s2 + $0x8e4] ss:$24 sps:$4 sm:$0xff]  }
 0x1c7   : > { %3786 = vmatprep.subr.bf16.mxu0 %v6370_v48  ;;  %v5629_v48 = vpack.c.bf16 %v3995_v43, %v3994_v42  ;;  %v6437_v42 = vld [vmem:[%s8824_s2 + $0xbe0] ss:$24 sps:$4 sm:$0xff]  }
 0x1c9   : > { %5630 = vmatpush3.bf16.msra.mxu1 %v5629_v48  ;;  %v3951_v48 = vld [vmem:[%s8827_s5 + $0x8] sm:$0xff] }
 0x1ca   : > { %3787 = vmatpush1.bf16.msra.mxu0 %v6368_v49  ;;  %v6389_v49 = vld [vmem:[%s8824_s2 + $0x8e0] ss:$24 sps:$4 sm:$0xff]  }
 0x1cb   : > { %3788 = vmatprep.subr.bf16.mxu0 %v6373_v50  ;;  %v6394_v50 = vld [vmem:[%s8824_s2 + $0x914] ss:$24 sps:$4 sm:$0xff]  }
 0x1ce   : > { %3789 = vmatpush1.bf16.msra.mxu0 %v6371_v52  ;;  %v6392_v52 = vld [vmem:[%s8824_s2 + $0x910] ss:$24 sps:$4 sm:$0xff]  }
 0x1cf   : > { %3790 = vmatprep.subr.bf16.mxu0 %v6376_v53  ;;  %v6397_v53 = vld [vmem:[%s8824_s2 + $0x944] ss:$24 sps:$4 sm:$0xff]  }
 0x1d2   : > { %3791 = vmatpush1.bf16.msra.mxu0 %v6374_v7  ;;  %v4013_v7 = vld [vmem:[%s8827_s5 + $0x1f8] sm:$0xff] }
 0x1d3   : > { %3792 = vmatprep.subr.bf16.mxu0 %v6379_v15  ;;  %v5631_v10 = vpack.c.bf16 %v4013_v7, %v4012_v6  ;;  %v3397_v15 = vadd.f32 %v7688_v47, %v1417_v2  ;;  %v6415_v47 = vld [vmem:[%s8824_s2 + $0xa64] ss:$24 sps:$4 sm:$0xff]  }
 0x1d4   : > { %v3957_v6 = vld [vmem:[%s8827_s5 + $0x38] sm:$0xff]  ;;  %v3974_v7 = vld [vmem:[%s8827_s5 + $0xc0] sm:$0xff] }
 0x1d5   : > { %5632 = vmatprep.subr.bf16.mxu1 %v5631_v10 }
 0x1d6   : > { %3793 = vmatpush1.bf16.msra.mxu0 %v6377_v11  ;;  %5634 = vmatpush3.bf16.msra.mxu1 %v5633_v23  ;;  %v3977_v23 = vld [vmem:[%s8827_s5 + $0xd8] sm:$0xff] }
 0x1d7   : > { %3794 = vmatprep.subr.bf16.mxu0 %v6382_v13 }
 0x1da   : > { %3795 = vmatpush1.bf16.msra.mxu0 %v6380_v31  ;;  %v4031_v31 = vld [vmem:[%s8827_s5 + $0x288] sm:$0xff] }
 0x1db   : > { %3796 = vmatprep.subr.bf16.mxu0 %v6385_v18  ;;  %v5635_v16 = vpack.c.bf16 %v4031_v31, %v4030_v29  ;;  %v6419_v18 = vld [vmem:[%s8824_s2 + $0xac0] ss:$24 sps:$4 sm:$0xff]  }
 0x1dc   : > { %v3962_v31 = vld [vmem:[%s8827_s5 + $0x60] sm:$0xff] }
 0x1dd   : > { %5636 = vmatprep.subr.bf16.mxu1 %v5635_v16  ;;  %v3963_v16 = vld [vmem:[%s8827_s5 + $0x68] sm:$0xff] }
 0x1de   : > { %3797 = vmatpush1.bf16.msra.mxu0 %v6383_v33  ;;  %v6425_v33 = vld [vmem:[%s8824_s2 + $0xb20] ss:$24 sps:$4 sm:$0xff]  }
 0x1df   : > { %3798 = vmatprep.subr.bf16.mxu0 %v6388_v37  ;;  %v6431_v37 = vld [vmem:[%s8824_s2 + $0xb80] ss:$24 sps:$4 sm:$0xff]  }
 0x1e2   : > { %3799 = vmatpush1.bf16.msra.mxu0 %v6386_v40  ;;  %v3966_v40 = vld [vmem:[%s8827_s5 + $0x80] sm:$0xff] }
 0x1e3   : > { %3800 = vmatprep.subr.bf16.mxu0 %v6391_v46  ;;  %v5571_v43 = vpack.c.bf16 %v3967_v41, %v3966_v40  ;;  %v3950_v46 = vld [vmem:[%s8827_s5] sm:$0xff] }
 0x1e6   : > { %3801 = vmatpush1.bf16.msra.mxu0 %v6389_v49  ;;  %v3968_v49 = vld [vmem:[%s8827_s5 + $0x90] sm:$0xff] }
 0x1e7   : > { %3811 = vmatprep.subr.bf16.mxu0 %v6394_v50  ;;  %v3969_v50 = vld [vmem:[%s8827_s5 + $0x98] sm:$0xff] }
 0x1e9   : > { %3803 = vmatmul.mubr.bf16.vlgmr.msra.gmra.mrb[4].mxu0 %v7213_v59  ;;  %v6403_v59 = vld [vmem:[%s8824_s2 + $0x9a4] ss:$24 sps:$4 sm:$0xff]  }
 0x1ea   : > { %3812 = vmatpush1.bf16.msra.mxu0 %v6392_v52  ;;  %3843 = vmatprep.mubr.bf16.mxu0 %v7221_v62  ;;  %v6401_v62 = vld [vmem:[%s8824_s2 + $0x9a0] ss:$24 sps:$4 sm:$0xff]   ;;  %v5573_v52 = vpack.c.bf16 %v3951_v48, %v3950_v46 }
 0x1eb   : > { %3813 = vmatprep.subr.bf16.mxu0 %v6397_v53  ;;  %v5575_v53 = vpack.c.bf16 %v3969_v50, %v3968_v49  ;;  %v4032_v49 = vld [vmem:[%s8827_s5 + $0x290] sm:$0xff]  ;;  %v4033_v50 = vld [vmem:[%s8827_s5 + $0x298] sm:$0xff] }
 0x1ee   : > { %3814 = vmatpush1.bf16.msra.mxu0 %v6395_v54  ;;  %v3952_v54 = vld [vmem:[%s8827_s5 + $0x10] sm:$0xff] }
 0x1ef   : > { %3815 = vmatprep.subr.bf16.mxu0 %v6400_v55  ;;  %v3953_v55 = vld [vmem:[%s8827_s5 + $0x18] sm:$0xff] }
 0x1f2   : > { %3816 = vmatpush1.bf16.msra.mxu0 %v6398_v56  ;;  %v3970_v56 = vld [vmem:[%s8827_s5 + $0xa0] sm:$0xff] }
 0x1f3   : > { %3817 = vmatprep.subr.bf16.mxu0 %v6403_v59  ;;  %v3971_v59 = vld [vmem:[%s8827_s5 + $0xa8] sm:$0xff] }
 0x1f6   : > { %3818 = vmatpush1.bf16.msra.mxu0 %v6401_v62  ;;  %v5577_v62 = vpack.c.bf16 %v3953_v55, %v3952_v54 }
 0x1f7   : > { %3819 = vmatprep.subr.bf16.mxu0 %v6406_v60  ;;  %v5579_v60 = vpack.c.bf16 %v3971_v59, %v3970_v56 }
 0x1fa   : > { %3820 = vmatpush1.bf16.msra.mxu0 %v6404_v0  ;;  %v3955_v0 = vld [vmem:[%s8827_s5 + $0x28] sm:$0xff] }
 0x1fb   : > { %3821 = vmatprep.subr.bf16.mxu0 %v6409_v1  ;;  %v3972_v1 = vld [vmem:[%s8827_s5 + $0xb0] sm:$0xff]  ;;  %v5581_v2 = vpack.c.bf16 %v3955_v0, %v3954_v63 }
 0x1fc   : > { %v3517_v51 = vpop.f32.mrb[0].mxu0 }
 0x1fd   : > { %v8057_v24 = vadd.f32 %v3517_v51, %v3395_v3  ;;  %v3519_v11 = vpop.f32.mrb[1].mxu0  ;;  %v3976_v51 = vld [vmem:[%s8827_s5 + $0xd0] sm:$0xff] }
 0x1fe   : > { %v8059_v27 = vadd.f32 %v3519_v11, %v3397_v15  ;;  %v3521_v12 = vpop.f32.mrb[2].mxu0  ;;  %3822 = vmatpush1.bf16.msra.mxu0 %v6407_v5  ;;  %v3956_v5 = vld [vmem:[%s8827_s5 + $0x30] sm:$0xff]  ;;  %v3959_v15 = vld [vmem:[%s8827_s5 + $0x48] sm:$0xff] }
 0x1ff   : > { %v3522_v13 = vpop.f32.mrb[3].mxu0  ;;  %3823 = vmatprep.subr.bf16.mxu0 %v6412_v8  ;;  %v3975_v8 = vld [vmem:[%s8827_s5 + $0xc8] sm:$0xff]  ;;  %v5585_v10 = vpack.c.bf16 %v3957_v6, %v3956_v5  ;;  %v5589_v11 = vpack.c.bf16 %v3959_v15, %v3958_v14  ;;  %v5591_v12 = vpack.c.bf16 %v3977_v23, %v3976_v51  ;;  %v4018_v23 = vld [vmem:[%s8827_s5 + $0x220] sm:$0xff] }
 0x200   : > { %v5587_v44 = vpack.c.bf16 %v3975_v8, %v3974_v7  ;;  %v3961_v13 = vld [vmem:[%s8827_s5 + $0x58] sm:$0xff]  ;;  %v4035_v5 = vld [vmem:[%s8827_s5 + $0x2a8] sm:$0xff] }
 0x202   : > { %3824 = vmatpush1.bf16.msra.mxu0 %v6410_v21  ;;  %v3960_v21 = vld [vmem:[%s8827_s5 + $0x50] sm:$0xff] }
 0x203   : > { %3825 = vmatprep.subr.bf16.mxu0 %v6415_v47  ;;  %v3978_v47 = vld [vmem:[%s8827_s5 + $0xe0] sm:$0xff] }
 0x206   : > { %3826 = vmatpush1.bf16.msra.mxu0 %v6413_v30  ;;  %v3979_v30 = vld [vmem:[%s8827_s5 + $0xe8] sm:$0xff] }
 0x207   : > { %3827 = vmatprep.subr.bf16.mxu0 %v6418_v22  ;;  %v5593_v22 = vpack.c.bf16 %v3961_v13, %v3960_v21  ;;  %v5595_v29 = vpack.c.bf16 %v3979_v30, %v3978_v47  ;;  %v4036_v13 = vld [vmem:[%s8827_s5 + $0x2b0] sm:$0xff]  ;;  %v4037_v47 = vld [vmem:[%s8827_s5 + $0x2b8] sm:$0xff] }
 0x20a   : > { %3828 = vmatpush1.bf16.msra.mxu0 %v6416_v17  ;;  %v3980_v17 = vld [vmem:[%s8827_s5 + $0xf0] sm:$0xff] }
 0x20b   : > { %3829 = vmatprep.subr.bf16.mxu0 %v6421_v19  ;;  %v3981_v19 = vld [vmem:[%s8827_s5 + $0xf8] sm:$0xff] }
 0x20e   : > { %3830 = vmatpush1.bf16.msra.mxu0 %v6419_v18  ;;  %v5597_v18 = vpack.c.bf16 %v3963_v16, %v3962_v31  ;;  %v4020_v31 = vld [vmem:[%s8827_s5 + $0x230] sm:$0xff]  ;;  %v4021_v16 = vld [vmem:[%s8827_s5 + $0x238] sm:$0xff] }
 0x20f   : > { %3831 = vmatprep.subr.bf16.mxu0 %v6424_v26  ;;  %v5599_v26 = vpack.c.bf16 %v3981_v19, %v3980_v17  ;;  %v4038_v17 = vld [vmem:[%s8827_s5 + $0x2c0] sm:$0xff]  ;;  %v4039_v19 = vld [vmem:[%s8827_s5 + $0x2c8] sm:$0xff] }
 0x212   : > { %3832 = vmatpush1.bf16.msra.mxu0 %v6422_v20  ;;  %v3964_v20 = vld [vmem:[%s8827_s5 + $0x70] sm:$0xff] }
 0x213   : > { %3833 = vmatprep.subr.bf16.mxu0 %v6427_v32  ;;  %v3965_v32 = vld [vmem:[%s8827_s5 + $0x78] sm:$0xff] }
 0x216   : > { %3834 = vmatpush1.bf16.msra.mxu0 %v6425_v33  ;;  %v5601_v33 = vpack.c.bf16 %v3965_v32, %v3964_v20  ;;  %v4022_v20 = vld [vmem:[%s8827_s5 + $0x240] sm:$0xff]  ;;  %v4023_v32 = vld [vmem:[%s8827_s5 + $0x248] sm:$0xff] }
 0x217   : > { %3835 = vmatprep.subr.bf16.mxu0 %v6430_v34  ;;  %v6552_v34 = vmov 1966171168  }
 0x21a   : > { %3836 = vmatpush1.bf16.msra.mxu0 %v6428_v35  ;;  %v4522_v35 = vunpack.c.l.s4 %v6552_v34  ;;  %v4041_v34 = vld [vmem:[%s8827_s5 + $0x2d8] sm:$0xff] }
 0x21b   : > { %3837 = vmatprep.subr.bf16.mxu0 %v6433_v25  ;;  %v8224_v25 = vsub.s32 2, %v6852_v28 }
 0x21d   : > { %v1421_v40 = vrot.slane %v8019_v58, %v8224_v25 }
 0x21e   : > { %3838 = vmatpush1.bf16.msra.mxu0 %v6431_v37  ;;  %v8227_v37 = vsub.s32 3, %v6852_v28 }
 0x21f   : > { %3839 = vmatprep.subr.bf16.mxu0 %v6436_v36  ;;  %v4523_v36 = vunpack.c.0.s8 %v4522_v35  ;;  %v5653_v35 = vpack.c.bf16 %v4023_v32, %v4022_v20  ;;  %v3875_v20 = vld [vmem:[%s8826_s4 + $0xa8] sm:$0xff] }
 0x220   : > { %v1425_v41 = vrot.slane %v8019_v58, %v8227_v37 }
 0x221   : > { %v8244_v46 = vsub.s32 %v4523_v36, %v6852_v28 }
 0x222   : > { %3840 = vmatpush1.bf16.msra.mxu0 %v6434_v38  ;;  %v4740_v38 = vmul.f32 %v8057_v24, %v8057_v24 }
 0x223   : > { %3841 = vmatprep.subr.bf16.mxu0 %v6439_v39  ;;  %v4741_v39 = vmul.f32 %v8059_v27, %v8059_v27 }
 0x225   : > { %v4747_v54 = vsel %vm4713_vm9, %v4741_v39, 0.0  ;;  %v4025_v39 = vld [vmem:[%s8827_s5 + $0x258] sm:$0xff] }
 0x226   : > { %3842 = vmatpush1.bf16.msra.mxu0 %v6437_v42  ;;  %v4014_v42 = vld [vmem:[%s8827_s5 + $0x200] sm:$0xff] }
 0x227   : > { %5572 = vmatprep.subr.bf16.mxu0 %v5571_v43  ;;  %v4015_v43 = vld [vmem:[%s8827_s5 + $0x208] sm:$0xff] }
 0x229   : > { %3844 = vmatmul.mubr.bf16.vlgmr.msra.gmra.mrb[4].mxu0 %v7415_v9  ;;  %v3973_v9 = vld [vmem:[%s8827_s5 + $0xb8] sm:$0xff] }
 0x22a   : > { %5574 = vmatpush3.bf16.msra.mxu0 %v5573_v52  ;;  %4110 = vmatprep.mubr.f32.mxu0 %v8059_v27  ;;  %v5583_v3 = vpack.c.bf16 %v3973_v9, %v3972_v1  ;;  %v4746_v52 = vsel %vm4713_vm9, %v4740_v38, 0.0  ;;  %v5639_v1 = vpack.c.bf16 %v4033_v50, %v4032_v49  ;;  %v4016_v9 = vld [vmem:[%s8827_s5 + $0x210] sm:$0xff]  ;;  %v4027_v49 = vld [vmem:[%s8827_s5 + $0x268] sm:$0xff] }
 0x22b   : > { %5576 = vmatprep.subr.bf16.mxu0 %v5575_v53  ;;  %v4518_v53 = vcombine.low %v8057_v24, %v8059_v27  ;;  %v4034_v27 = vld [vmem:[%s8827_s5 + $0x2a0] sm:$0xff]  ;;  %v4748_v6 = vadd.f32 %v4747_v54, %v4746_v52  ;;  %v4024_v38 = vld [vmem:[%s8827_s5 + $0x250] sm:$0xff]  ;;  %v4045_v52 = vld [vmem:[%s8827_s5 + $0x2f8] sm:$0xff] }
 0x22c   : > { %v5643_v51 = vpack.c.bf16 %v4035_v5, %v4034_v27  ;;  %v4044_v50 = vld [vmem:[%s8827_s5 + $0x2f0] sm:$0xff]  ;;  %v3854_v27 = vld [vmem:[%s8826_s4] sm:$0xff]  ;;  %v3855_v5 = vld [vmem:[%s8826_s4 + $0x8] sm:$0xff] }
 0x22d   : > { %v8269_v7 = vrot.slane %v4518_v53, %v8244_v46  ;;  %v5663_v54 = vpack.c.bf16 %v4045_v52, %v4044_v50  ;;  %v3876_v52 = vld [vmem:[%s8826_s4 + $0xb0] sm:$0xff] }
 0x22e   : > { %5578 = vmatpush3.bf16.msra.mxu0 %v5577_v62 }
 0x22f   : > { %5580 = vmatprep.subr.bf16.mxu0 %v5579_v60  ;;  %v5637_v60 = vpack.c.bf16 %v4015_v43, %v4014_v42  ;;  %v5657_v42 = vpack.c.bf16 %v4025_v39, %v4024_v38  ;;  %v3858_v38 = vld [vmem:[%s8826_s4 + $0x20] sm:$0xff]  ;;  %v3859_v39 = vld [vmem:[%s8826_s4 + $0x28] sm:$0xff] }
 0x232   : > { %5582 = vmatpush3.bf16.msra.mxu0 %v5581_v2  ;;  %v4017_v2 = vld [vmem:[%s8827_s5 + $0x218] sm:$0xff] }
 0x233   : > { %5584 = vmatprep.subr.bf16.mxu0 %v5583_v3 }
 0x236   : > { %5586 = vmatpush3.bf16.msra.mxu0 %v5585_v10 }
 0x237   : > { %5588 = vmatprep.subr.bf16.mxu0 %v5587_v44  ;;  %v5641_v44 = vpack.c.bf16 %v4017_v2, %v4016_v9  ;;  %v8363_v9 = vld [vmem:[%s8822_s0] sm:$0xff] }
 0x23a   : > { %5590 = vmatpush3.bf16.msra.mxu0 %v5589_v11  ;;  %v4019_v11 = vld [vmem:[%s8827_s5 + $0x228] sm:$0xff] }
 0x23b   : > { %5592 = vmatprep.subr.bf16.mxu0 %v5591_v12 }
 0x23e   : > { %5594 = vmatpush3.bf16.msra.mxu0 %v5593_v22  ;;  %v5645_v22 = vpack.c.bf16 %v4019_v11, %v4018_v23  ;;  %v5669_v11 = vpack.c.bf16 %v3855_v5, %v3854_v27  ;;  %v3879_v5 = vld [vmem:[%s8826_s4 + $0xc8] sm:$0xff] }
 0x23f   : > { %5596 = vmatprep.subr.bf16.mxu0 %v5595_v29  ;;  %v5647_v29 = vpack.c.bf16 %v4037_v47, %v4036_v13  ;;  %v3856_v13 = vld [vmem:[%s8826_s4 + $0x10] sm:$0xff]  ;;  %v3857_v47 = vld [vmem:[%s8826_s4 + $0x18] sm:$0xff] }
 0x240   : > { %v5673_v32 = vpack.c.bf16 %v3857_v47, %v3856_v13  ;;  %v3880_v13 = vld [vmem:[%s8826_s4 + $0xd0] sm:$0xff]  ;;  %v3881_v47 = vld [vmem:[%s8826_s4 + $0xd8] sm:$0xff] }
 0x242   : > { %5598 = vmatpush3.bf16.msra.mxu0 %v5597_v18  ;;  %v5649_v18 = vpack.c.bf16 %v4021_v16, %v4020_v31 }
 0x243   : > { %5600 = vmatprep.subr.bf16.mxu0 %v5599_v26  ;;  %v5651_v26 = vpack.c.bf16 %v4039_v19, %v4038_v17 }
 0x246   : > { %5602 = vmatpush3.bf16.msra.mxu0 %v5601_v33  ;;  %v4040_v33 = vld [vmem:[%s8827_s5 + $0x2d0] sm:$0xff] }
 0x247   : > { %v5655_v36 = vpack.c.bf16 %v4041_v34, %v4040_v33 }
 0x249   : > { %4111 = vmatmul.mubr.f32.vlgmr.msra.gmra.mrb[8].mxu0 %v8057_v24 }
 0x27a   : > { %v3681_v48 = vpop.f32.mrb[4].mxu1 }
 0x27b   : > { %v5767_v55 = vadd.f32 %v3681_v48, %v1421_v40  ;;  %v3683_v56 = vpop.f32.mrb[5].mxu1  ;;  %v4042_v40 = vld [vmem:[%s8827_s5 + $0x2e0] sm:$0xff] }
 0x27c   : > { %v5768_v59 = vadd.f32 %v3683_v56, %v1425_v41  ;;  %v3685_v62 = vpop.f32.mrb[6].mxu1  ;;  %v4043_v41 = vld [vmem:[%s8827_s5 + $0x2e8] sm:$0xff]  ;;  %v4026_v48 = vld [vmem:[%s8827_s5 + $0x260] sm:$0xff]  ;;  %v4029_v56 = vld [vmem:[%s8827_s5 + $0x278] sm:$0xff] }
 0x27d   : > { %v4742_v63 = vmul.f32 %v5767_v55, %v5767_v55  ;;  %v3686_v0 = vpop.f32.mrb[7].mxu1  ;;  %v5659_v43 = vpack.c.bf16 %v4043_v41, %v4042_v40  ;;  %v5661_v53 = vpack.c.bf16 %v4027_v49, %v4026_v48  ;;  %v3871_v62 = vld [vmem:[%s8826_s4 + $0x88] sm:$0xff] }
 0x27e   : > { %v4519_v3 = vcombine.low %v5767_v55, %v5768_v59  ;;  %v4743_v24 = vmul.f32 %v5768_v59, %v5768_v59  ;;  %4180 = vmatprep.mubr.f32.mxu1 %v5768_v59  ;;  %v3870_v59 = vld [vmem:[%s8826_s4 + $0x80] sm:$0xff]  ;;  %v8355_v0 = vsub.s32 4, %v6852_v28  ;;  %v4510_v41 = vld [vmem:[%s8829_s7 + $0xc] sm:$0xff] }
 0x27f   : > { %4181 = vmatmul.mubr.f32.vlgmr.msra.gmra.mrb[8].mxu1 %v5767_v55  ;;  %v4749_v8 = vsel %vm4713_vm9, %v4742_v63, 0.0  ;;  %v4028_v55 = vld [vmem:[%s8827_s5 + $0x270] sm:$0xff]  ;;  %v5667_v63 = vpack.c.bf16 %v3871_v62, %v3870_v59 }
 0x280   : > { %v8273_v10 = vrot.slane %v4519_v3, %v8244_v46  ;;  %5638 = vmatpush3.bf16.msra.mxu1 %v5637_v60  ;;  %v4750_v14 = vadd.f32 %v4749_v8, %v4748_v6  ;;  %v4751_v15 = vsel %vm4713_vm9, %v4743_v24, 0.0  ;;  %v5665_v60 = vpack.c.bf16 %v4029_v56, %v4028_v55  ;;  %v3872_v8 = vld [vmem:[%s8826_s4 + $0x90] sm:$0xff] }
 0x281   : > { %5640 = vmatprep.subr.bf16.mxu1 %v5639_v1  ;;  %v8358_v1 = vsub.s32 5, %v6852_v28  ;;  %v1429_v2 = vrot.slane %v8019_v58, %v8355_v0  ;;  %v8371_v24 = vrot.slane %v8363_v9, %v6895_v45  ;;  %v5677_v55 = vpack.c.bf16 %v3859_v39, %v3858_v38  ;;  %v5353_v39 = vld.sshfl [vmem:[%s8829_s7 + $0x14] sm:$0x33 pattern:$0x76325410] }
 0x282   : > { %v4542_v12 = vcombine.low %v8269_v7, %v8273_v10  ;;  %v4543_v21 = vcombine.high %v8269_v7, %v8273_v10  ;;  %v8292_v30 = vadd.f32 %v4751_v15, %v4750_v14  ;;  %v4664_v56 = vcombine.high %v4510_v41, %v4510_v41 }
 0x283   : > { %v1433_v3 = vrot.slane %v8019_v58, %v8358_v1  ;;  %v3873_v58 = vld [vmem:[%s8826_s4 + $0x98] sm:$0xff] }
 0x284   : > { %5642 = vmatpush3.bf16.msra.mxu1 %v5641_v44  ;;  %v4508_v44 = vld [vmem:[%s8829_s7] sm:$0xff]  ;;  %v5671_v31 = vpack.c.bf16 %v3873_v58, %v3872_v8 }
 0x285   : > { %5644 = vmatprep.subr.bf16.mxu1 %v5643_v51  ;;  %v4639_v17 = vcombine.high %v4508_v44, %v4508_v44  ;;  %v4646_v40 = vrot.slane %v4508_v44, %v6895_v45 }
 0x288   : > { %5646 = vmatpush3.bf16.msra.mxu1 %v5645_v22  ;;  %v4273_v22 = vcombine.high %v8371_v24, %v8371_v24 }
 0x289   : > { %5648 = vmatprep.subr.bf16.mxu1 %v5647_v29 }
 0x28c   : > { %5650 = vmatpush3.bf16.msra.mxu1 %v5649_v18 }
 0x28d   : > { %5652 = vmatprep.subr.bf16.mxu1 %v5651_v26  ;;  %v3874_v26 = vld [vmem:[%s8826_s4 + $0xa0] sm:$0xff] }
 0x290   : > { %5654 = vmatpush3.bf16.msra.mxu1 %v5653_v35 }
 0x291   : > { %5656 = vmatprep.subr.bf16.mxu1 %v5655_v36 }
 0x294   : > { %5658 = vmatpush3.bf16.msra.mxu1 %v5657_v42  ;;  %v5675_v42 = vpack.c.bf16 %v3875_v20, %v3874_v26 }
 0x295   : > { %5660 = vmatprep.subr.bf16.mxu1 %v5659_v43  ;;  %v4551_v43 = vrot.slane %v4542_v12, %v8244_v46  ;;  %v4558_v12 = vrot.slane %v4543_v21, %v8244_v46  ;;  %v4671_v21 = vrot.slane %v4510_v41, %v6895_v45 }
 0x297   : > { %v4679_v26 = vcombine.high %v4671_v21, %v4671_v21 }
 0x298   : > { %5662 = vmatpush3.bf16.msra.mxu1 %v5661_v53  ;;  %v3877_v53 = vld [vmem:[%s8826_s4 + $0xb8] sm:$0xff] }
 0x299   : > { %5664 = vmatprep.subr.bf16.mxu1 %v5663_v54  ;;  %v5352_v54 = vld.sshfl [vmem:[%s8829_s7 + $0x8] sm:$0x33 pattern:$0x76325410] }
 0x29a   : > { %v4663_v10 = vcombine.high %v5352_v54, %v5352_v54 }
 0x29c   : > { %5666 = vmatpush3.bf16.msra.mxu1 %v5665_v60  ;;  %v3860_v60 = vld [vmem:[%s8826_s4 + $0x30] sm:$0xff] }
 0x29d   : > { %5668 = vmatprep.subr.bf16.mxu1 %v5667_v63  ;;  %v3861_v63 = vld [vmem:[%s8826_s4 + $0x38] sm:$0xff] }
 0x29e   : > { %v5681_v44 = vpack.c.bf16 %v3861_v63, %v3860_v60 }
 0x2fc   : > { %v3845_v6 = vpop.f32.mrb[4].mxu0 }
 0x2fd   : > { %v5769_v14 = vadd.f32 %v3845_v6, %v1429_v2  ;;  %v3847_v15 = vpop.f32.mrb[5].mxu0  ;;  %v4654_v2 = vcombine.high %v4646_v40, %v4646_v40 }
 0x2fe   : > { %v5770_v51 = vadd.f32 %v3847_v15, %v1433_v3  ;;  %v3849_v23 = vpop.f32.mrb[6].mxu0  ;;  %v5679_v3 = vpack.c.bf16 %v3877_v53, %v3876_v52 }
 0x2ff   : > { %v3850_v29 = vpop.f32.mrb[7].mxu0  ;;  %v4744_v16 = vmul.f32 %v5769_v14, %v5769_v14  ;;  %v4678_v23 = vrot.slane %v4664_v56, %v6895_v45  ;;  %v4688_v56 = vcombine.high %v5353_v39, %v5353_v39 }
 0x300   : > { %v4520_v19 = vcombine.low %v5769_v14, %v5770_v51  ;;  %4250 = vmatprep.mubr.f32.mxu1 %v5770_v51  ;;  %v4745_v18 = vmul.f32 %v5770_v51, %v5770_v51 }
 0x301   : > { %4251 = vmatmul.mubr.f32.vlgmr.msra.gmra.mrb[10].mxu1 %v5769_v14  ;;  %v4753_v33 = vsel %vm4713_vm9, %v4744_v16, 0.0  ;;  %v3862_v14 = vld [vmem:[%s8826_s4 + $0x40] sm:$0xff] }
 0x302   : > { %v4541_v34 = vrot.slane %v4520_v19, %v8244_v46  ;;  %5670 = vmatpush3.bf16.msra.mxu1 %v5669_v11  ;;  %v4754_v35 = vadd.f32 %v4753_v33, %v8292_v30  ;;  %v4755_v36 = vsel %vm4713_vm9, %v4745_v18, 0.0  ;;  %4353 = vmatprep.mubr.f32.mxu1 %v4273_v22  ;;  %v4653_v30 = vrot.slane %v4639_v17, %v6895_v45  ;;  %v3863_v11 = vld [vmem:[%s8826_s4 + $0x48] sm:$0xff] }
 0x303   : > { %5672 = vmatprep.subr.bf16.mxu1 %v5671_v31 }
 0x304   : > { %v4544_v48 = vcombine.high %v4541_v34, %v4541_v34  ;;  %v4565_v49 = vrot.slane %v4541_v34, %v8244_v46  ;;  %v4756_v50 = vadd.f32 %v4755_v36, %v4754_v35  ;;  %v4655_v7 = vcombine.high %v4653_v30, %v4653_v30 }
 0x305   : > { %v5685_v35 = vpack.c.bf16 %v3863_v11, %v3862_v14  ;;  %v5687_v36 = vpack.c.bf16 %v3881_v47, %v3880_v13  ;;  %v4258_v13 = vcombine.high %v8363_v9, %v8363_v9  ;;  %v3903_v9 = vld [vmem:[%s8826_s4 + $0x188] sm:$0xff] }
 0x306   : > { %v4572_v59 = vrot.slane %v4544_v48, %v8244_v46  ;;  %v4573_v62 = vcombine.low %v4551_v43, %v4565_v49  ;;  %5674 = vmatpush3.bf16.msra.mxu1 %v5673_v32  ;;  %4757 = vadd.xlane.f32.xlu0 %v4756_v50  ;;  %v3878_v46 = vld [vmem:[%s8826_s4 + $0xc0] sm:$0xff]  ;;  %v3865_v48 = vld [vmem:[%s8826_s4 + $0x58] sm:$0xff] }
 0x307   : > { %5676 = vmatprep.subr.bf16.mxu1 %v5675_v42  ;;  %v5683_v17 = vpack.c.bf16 %v3879_v5, %v3878_v46  ;;  %v3866_v46 = vld [vmem:[%s8826_s4 + $0x60] sm:$0xff]  ;;  %v3867_v5 = vld [vmem:[%s8826_s4 + $0x68] sm:$0xff] }
 0x308   : > { %v8443_v27 = vcombine.low %v4558_v12, %v4572_v59  ;;  %v4578_v6 = vrot.slane %v4573_v62, %v8011_v57  ;;  %v4582_v8 = vrot.slane %v4573_v62, %v8025_v61  ;;  %v4586_v58 = vrot.slane %v4573_v62, %v8224_v25 }
 0x309   : > { %v4590_v15 = vrot.slane %v4573_v62, %v8227_v37  ;;  %v4594_v51 = vrot.slane %v4573_v62, %v8355_v0  ;;  %v4598_v19 = vrot.slane %v4573_v62, %v8358_v1 }
 0x30a   : > { %5678 = vmatpush3.bf16.msra.mxu1 %v5677_v55  ;;  %v4701_v22 = vmul.f32 %v4646_v40, %v4578_v6  ;;  %v4702_v29 = vmul.f32 %v4654_v2, %v4582_v8  ;;  %v4703_v31 = vmul.f32 %v4653_v30, %v4586_v58  ;;  %v4602_v16 = vrot.slane %v8443_v27, %v8011_v57  ;;  %v3883_v55 = vld [vmem:[%s8826_s4 + $0xe8] sm:$0xff]  ;;  %v3884_v58 = vld [vmem:[%s8826_s4 + $0xf0] sm:$0xff] }
 0x30b   : > { %5680 = vmatprep.subr.bf16.mxu1 %v5679_v3  ;;  %v4606_v18 = vrot.slane %v8443_v27, %v8025_v61  ;;  %v4704_v20 = vmul.f32 %v4655_v7, %v4590_v15  ;;  %v4610_v34 = vrot.slane %v8443_v27, %v8224_v25  ;;  %v4680_v40 = vcombine.high %v4678_v23, %v4678_v23  ;;  %v3864_v25 = vld [vmem:[%s8826_s4 + $0x50] sm:$0xff] }
 0x30c   : > { %v4714_v32 = vsel %vm4713_vm9, %v4701_v22, 0.0  ;;  %v4715_v33 = vsel %vm4713_vm9, %v4702_v29, 0.0  ;;  %v4705_v41 = vmul.f32 %v5352_v54, %v4594_v51  ;;  %v4717_v42 = vsel %vm4713_vm9, %v4703_v31, 0.0  ;;  %v3868_v29 = vld [vmem:[%s8826_s4 + $0x70] sm:$0xff]  ;;  %v3869_v31 = vld [vmem:[%s8826_s4 + $0x78] sm:$0xff] }
 0x30d   : > { %v4716_v38 = vadd.f32 %v4715_v33, %v4714_v32  ;;  %v4614_v30 = vrot.slane %v8443_v27, %v8227_v37  ;;  %v4707_v43 = vmul.f32 %v4671_v21, %v4602_v16  ;;  %v4618_v50 = vrot.slane %v8443_v27, %v8355_v0  ;;  %v3882_v37 = vld [vmem:[%s8826_s4 + $0xe0] sm:$0xff] }
 0x30e   : > { %5682 = vmatpush3.bf16.msra.mxu1 %v5681_v44  ;;  %v4708_v52 = vmul.f32 %v4679_v26, %v4606_v18  ;;  %v4709_v53 = vmul.f32 %v4678_v23, %v4610_v34  ;;  %v4706_v54 = vmul.f32 %v4663_v10, %v4598_v19  ;;  %v4719_v12 = vsel %vm4713_vm9, %v4704_v20, 0.0  ;;  %v3885_v44 = vld [vmem:[%s8826_s4 + $0xf8] sm:$0xff]  ;;  %v3886_v33 = vld [vmem:[%s8826_s4 + $0x100] sm:$0xff]  ;;  %v3887_v34 = vld [vmem:[%s8826_s4 + $0x108] sm:$0xff] }
 0x30f   : > { %5684 = vmatprep.subr.bf16.mxu1 %v5683_v17  ;;  %v4718_v49 = vadd.f32 %v4717_v42, %v4716_v38  ;;  %v4727_v59 = vsel %vm4713_vm9, %v4707_v43, 0.0  ;;  %v4622_v0 = vrot.slane %v8443_v27, %v8358_v1  ;;  %v4710_v60 = vmul.f32 %v4680_v40, %v4614_v30  ;;  %v3902_v17 = vld [vmem:[%s8826_s4 + $0x180] sm:$0xff]  ;;  %v3888_v30 = vld [vmem:[%s8826_s4 + $0x110] sm:$0xff]  ;;  %v3889_v43 = vld [vmem:[%s8826_s4 + $0x118] sm:$0xff] }
 0x310   : > { %v4728_v63 = vsel %vm4713_vm9, %v4708_v52, 0.0  ;;  %v5689_v2 = vpack.c.bf16 %v3865_v48, %v3864_v25  ;;  %v4721_v3 = vsel %vm4713_vm9, %v4705_v41, 0.0  ;;  %v5691_v21 = vpack.c.bf16 %v3883_v55, %v3882_v37  ;;  %v3906_v25 = vld [vmem:[%s8826_s4 + $0x1a0] sm:$0xff]  ;;  %v3907_v48 = vld [vmem:[%s8826_s4 + $0x1a8] sm:$0xff]  ;;  %v3892_v55 = vld [vmem:[%s8826_s4 + $0x130] sm:$0xff] }
 0x311   : > { %v4720_v62 = vadd.f32 %v4719_v12, %v4718_v49  ;;  %v4729_v7 = vadd.f32 %v4728_v63, %v4727_v59  ;;  %v4711_v1 = vmul.f32 %v5353_v39, %v4618_v50  ;;  %v4730_v27 = vsel %vm4713_vm9, %v4709_v53, 0.0  ;;  %v3890_v52 = vld [vmem:[%s8826_s4 + $0x120] sm:$0xff]  ;;  %v3891_v53 = vld [vmem:[%s8826_s4 + $0x128] sm:$0xff] }
 0x312   : > { %5686 = vmatpush3.bf16.msra.mxu1 %v5685_v35  ;;  %v4723_v6 = vsel %vm4713_vm9, %v4706_v54, 0.0  ;;  %v4712_v15 = vmul.f32 %v4688_v56, %v4622_v0  ;;  %v4732_v51 = vsel %vm4713_vm9, %v4710_v60, 0.0  ;;  %v5693_v23 = vpack.c.bf16 %v3867_v5, %v3866_v46  ;;  %v3908_v54 = vld [vmem:[%s8826_s4 + $0x1b0] sm:$0xff]  ;;  %v3893_v56 = vld [vmem:[%s8826_s4 + $0x138] sm:$0xff]  ;;  %v3910_v59 = vld [vmem:[%s8826_s4 + $0x1c0] sm:$0xff] }
 0x313   : > { %5688 = vmatprep.subr.bf16.mxu1 %v5687_v36  ;;  %v4722_v10 = vadd.f32 %v4721_v3, %v4720_v62  ;;  %v4731_v8 = vadd.f32 %v4730_v27, %v4729_v7  ;;  %v4734_v47 = vsel %vm4713_vm9, %v4711_v1, 0.0  ;;  %v5695_v22 = vpack.c.bf16 %v3885_v44, %v3884_v58  ;;  %v3904_v36 = vld [vmem:[%s8826_s4 + $0x190] sm:$0xff]  ;;  %v3911_v62 = vld [vmem:[%s8826_s4 + $0x1c8] sm:$0xff]  ;;  %v3894_v63 = vld [vmem:[%s8826_s4 + $0x140] sm:$0xff] }
 0x314   : > { %v4736_v19 = vsel %vm4713_vm9, %v4712_v15, 0.0  ;;  %v5697_v26 = vpack.c.bf16 %v3869_v31, %v3868_v29  ;;  %v8536_v20 = vrot.slane %v4258_v13, %v6895_v45  ;;  %v5699_v32 = vpack.c.bf16 %v3903_v9, %v3902_v17  ;;  %v3905_v45 = vld [vmem:[%s8826_s4 + $0x198] sm:$0xff]  ;;  %v3912_v3 = vld [vmem:[%s8826_s4 + $0x1d0] sm:$0xff]  ;;  %v3914_v1 = vld [vmem:[%s8826_s4 + $0x1e0] sm:$0xff] }
 0x315   : > { %v4724_v14 = vadd.f32 %v4723_v6, %v4722_v10  ;;  %v4733_v11 = vadd.f32 %v4732_v51, %v4731_v8  ;;  %v5701_v40 = vpack.c.bf16 %v3887_v34, %v3886_v33  ;;  %v5703_v42 = vpack.c.bf16 %v3905_v45, %v3904_v36  ;;  %v3913_v7 = vld [vmem:[%s8826_s4 + $0x1d8] sm:$0xff]  ;;  %v3896_v46 = vld [vmem:[%s8826_s4 + $0x150] sm:$0xff]  ;;  %v3915_v27 = vld [vmem:[%s8826_s4 + $0x1e8] sm:$0xff] }
 0x316   : > { %5690 = vmatpush3.bf16.msra.mxu1 %v5689_v2  ;;  %v4274_v41 = vcombine.high %v8536_v20, %v8536_v20  ;;  %v5705_v49 = vpack.c.bf16 %v3889_v43, %v3888_v30  ;;  %v5707_v50 = vpack.c.bf16 %v3907_v48, %v3906_v25  ;;  %v5709_v12 = vpack.c.bf16 %v3891_v53, %v3890_v52  ;;  %v3895_v2 = vld [vmem:[%s8826_s4 + $0x148] sm:$0xff]  ;;  %v3897_v5 = vld [vmem:[%s8826_s4 + $0x158] sm:$0xff]  ;;  %v3898_v58 = vld [vmem:[%s8826_s4 + $0x160] sm:$0xff] }
 0x317   : > { %4725 = vadd.xlane.f32.xlu0 %v4724_v14  ;;  %5692 = vmatprep.subr.bf16.mxu1 %v5691_v21  ;;  %v4735_v16 = vadd.f32 %v4734_v47, %v4733_v11  ;;  %v5713_v0 = vpack.c.bf16 %v3893_v56, %v3892_v55  ;;  %v5715_v60 = vpack.c.bf16 %v3911_v62, %v3910_v59  ;;  %v3899_v44 = vld [vmem:[%s8826_s4 + $0x168] sm:$0xff]  ;;  %v3916_v14 = vld [vmem:[%s8826_s4 + $0x1f0] sm:$0xff]  ;;  %v3917_v15 = vld [vmem:[%s8826_s4 + $0x1f8] sm:$0xff] }
 0x318   : > { %v5717_v10 = vpack.c.bf16 %v3895_v2, %v3894_v63  ;;  %v5719_v21 = vpack.c.bf16 %v3913_v7, %v3912_v3  ;;  %v5721_v6 = vpack.c.bf16 %v3897_v5, %v3896_v46  ;;  %v5723_v8 = vpack.c.bf16 %v3915_v27, %v3914_v1  ;;  %v3900_v11 = vld [vmem:[%s8826_s4 + $0x170] sm:$0xff]  ;;  %v3901_v13 = vld [vmem:[%s8826_s4 + $0x178] sm:$0xff]  ;;  %v3934_v47 = vld [vmem:[%s8826_s4 + $0x280] sm:$0xff] }
 0x319   : > { %v4737_v18 = vadd.f32 %v4736_v19, %v4735_v16  ;;  %v5725_v51 = vpack.c.bf16 %v3899_v44, %v3898_v58  ;;  %v5729_v29 = vpack.c.bf16 %v3901_v13, %v3900_v11  ;;  %v3918_v16 = vld [vmem:[%s8826_s4 + $0x200] sm:$0xff]  ;;  %v3919_v17 = vld [vmem:[%s8826_s4 + $0x208] sm:$0xff]  ;;  %v3936_v19 = vld [vmem:[%s8826_s4 + $0x290] sm:$0xff]  ;;  %v6553_v11 = vmov 0  }
 0x31a   : > { %5694 = vmatpush3.bf16.msra.mxu1 %v5693_v23  ;;  %v5727_v23 = vpack.c.bf16 %v3917_v15, %v3916_v14  ;;  %v8648_v9 = vld.sshfl [vmem:[%s8822_s0 + $0x8] sm:$0x33 pattern:$0x76325410]  ;;  %v3920_v34 = vld [vmem:[%s8826_s4 + $0x210] sm:$0xff]  ;;  %v3938_v36 = vld [vmem:[%s8826_s4 + $0x2a0] sm:$0xff]  ;;  %5862 = vset.pattern.permute.xlu1 %v6553_v11 }
 0x31b   : > { %5696 = vmatprep.subr.bf16.mxu1 %v5695_v22  ;;  %4738 = vadd.xlane.f32.xlu1 %v4737_v18  ;;  %v3935_v22 = vld [vmem:[%s8826_s4 + $0x288] sm:$0xff]  ;;  %v3937_v18 = vld [vmem:[%s8826_s4 + $0x298] sm:$0xff]  ;;  %v3940_v30 = vld [vmem:[%s8826_s4 + $0x2b0] sm:$0xff] }
 0x31c   : > { %v5393_v35 = vpop.f32.mrb[8].mxu0  ;;  %v5731_v31 = vpack.c.bf16 %v3935_v22, %v3934_v47  ;;  %v5735_v33 = vpack.c.bf16 %v3937_v18, %v3936_v19  ;;  %v3939_v45 = vld [vmem:[%s8826_s4 + $0x2a8] sm:$0xff]  ;;  %v3924_v48 = vld [vmem:[%s8826_s4 + $0x230] sm:$0xff]  ;;  %v3945_v55 = vld [vmem:[%s8826_s4 + $0x2d8] sm:$0xff]  ;;  %5863 = vset.pattern.permute.xlu0 %v6553_v11 }
 0x31d   : > { %v5394_v38 = vpop.f32.mrb[9].mxu0  ;;  %v3943_v52 = vld [vmem:[%s8826_s4 + $0x2c8] sm:$0xff]  ;;  %v3928_v62 = vld [vmem:[%s8826_s4 + $0x250] sm:$0xff]  ;;  %v3949_v27 = vld [vmem:[%s8826_s4 + $0x2f8] sm:$0xff] }
 0x31e   : > { %v8550_v39 = vadd.f32 %v5394_v38, %v5393_v35  ;;  %5698 = vmatpush3.bf16.msra.mxu1 %v5697_v26  ;;  %v5733_v26 = vpack.c.bf16 %v3919_v17, %v3918_v16  ;;  %v3921_v35 = vld [vmem:[%s8826_s4 + $0x218] sm:$0xff]  ;;  %v3947_v63 = vld [vmem:[%s8826_s4 + $0x2e8] sm:$0xff]  ;;  %v3948_v1 = vld [vmem:[%s8826_s4 + $0x2f0] sm:$0xff] }
 0x31f   : > { %5700 = vmatprep.subr.bf16.mxu1 %v5699_v32  ;;  %v4282_v32 = vcombine.high %v8648_v9, %v8648_v9  ;;  %v5737_v38 = vpack.c.bf16 %v3921_v35, %v3920_v34  ;;  %v3931_v46 = vld [vmem:[%s8826_s4 + $0x268] sm:$0xff]  ;;  %v5759_v58 = vpack.c.bf16 %v3949_v27, %v3948_v1  ;;  %v3932_v44 = vld [vmem:[%s8826_s4 + $0x270] sm:$0xff]  ;;  %v3933_v14 = vld [vmem:[%s8826_s4 + $0x278] sm:$0xff] }
 0x320   : > { %v5761_v15 = vpack.c.bf16 %v3933_v14, %v3932_v44 }
 0x321   : > { %4354 = vmatmul.mubr.f32.vlgmr.msra.gmra.mrb[12].mxu1 %v8371_v24  ;;  %v3909_v24 = vld [vmem:[%s8826_s4 + $0x1b8] sm:$0xff] }
 0x322   : > { %5702 = vmatpush3.bf16.msra.mxu1 %v5701_v40  ;;  %4423 = vmatprep.mubr.f32.mxu1 %v4274_v41  ;;  %v5711_v37 = vpack.c.bf16 %v3909_v24, %v3908_v54  ;;  %v5739_v40 = vpack.c.bf16 %v3939_v45, %v3938_v36  ;;  %v3922_v41 = vld [vmem:[%s8826_s4 + $0x220] sm:$0xff] }
 0x323   : > { %5704 = vmatprep.subr.bf16.mxu1 %v5703_v42  ;;  %v3923_v42 = vld [vmem:[%s8826_s4 + $0x228] sm:$0xff]  ;;  %v3926_v24 = vld [vmem:[%s8826_s4 + $0x240] sm:$0xff] }
 0x324   : > { %v5741_v43 = vpack.c.bf16 %v3923_v42, %v3922_v41 }
 0x326   : > { %5706 = vmatpush3.bf16.msra.mxu1 %v5705_v49  ;;  %v3925_v49 = vld [vmem:[%s8826_s4 + $0x238] sm:$0xff] }
 0x327   : > { %5708 = vmatprep.subr.bf16.mxu1 %v5707_v50  ;;  %v3942_v50 = vld [vmem:[%s8826_s4 + $0x2c0] sm:$0xff]  ;;  %v5745_v53 = vpack.c.bf16 %v3925_v49, %v3924_v48 }
 0x328   : > { %v5747_v54 = vpack.c.bf16 %v3943_v52, %v3942_v50 }
 0x32a   : > { %5710 = vmatpush3.bf16.msra.mxu1 %v5709_v12  ;;  %v3927_v12 = vld [vmem:[%s8826_s4 + $0x248] sm:$0xff] }
 0x32b   : > { %5712 = vmatprep.subr.bf16.mxu1 %v5711_v37  ;;  %v3944_v37 = vld [vmem:[%s8826_s4 + $0x2d0] sm:$0xff]  ;;  %v5749_v56 = vpack.c.bf16 %v3927_v12, %v3926_v24 }
 0x32c   : > { %v5751_v59 = vpack.c.bf16 %v3945_v55, %v3944_v37  ;;  %v4800_v37 = vand.u32 127, %v723_v4 }
 0x32e   : > { %5714 = vmatpush3.bf16.msra.mxu1 %v5713_v0  ;;  %v3929_v0 = vld [vmem:[%s8826_s4 + $0x258] sm:$0xff] }
 0x32f   : > { %5716 = vmatprep.subr.bf16.mxu1 %v5715_v60  ;;  %v3946_v60 = vld [vmem:[%s8826_s4 + $0x2e0] sm:$0xff]  ;;  %v5753_v3 = vpack.c.bf16 %v3929_v0, %v3928_v62 }
 0x332   : > { %5718 = vmatpush3.bf16.msra.mxu1 %v5717_v10  ;;  %v5755_v10 = vpack.c.bf16 %v3947_v63, %v3946_v60 }
 0x333   : > { %5720 = vmatprep.subr.bf16.mxu1 %v5719_v21  ;;  %v3930_v21 = vld [vmem:[%s8826_s4 + $0x260] sm:$0xff] }
 0x336   : > { %5722 = vmatpush3.bf16.msra.mxu1 %v5721_v6 }
 0x337   : > { %5724 = vmatprep.subr.bf16.mxu1 %v5723_v8  ;;  %v5757_v8 = vpack.c.bf16 %v3931_v46, %v3930_v21 }
 0x33a   : > { %5726 = vmatpush3.bf16.msra.mxu1 %v5725_v51 }
 0x33b   : > { %5728 = vmatprep.subr.bf16.mxu1 %v5727_v23  ;;  %v4767_v23 = vld [vmem:[%s8830_s8] sm:$0x3] }
 0x33e   : > { %5730 = vmatpush3.bf16.msra.mxu1 %v5729_v29  ;;  %v4768_v29 = vmax.f32 %v4767_v23, 1e-08 }
 0x33f   : > { %5732 = vmatprep.subr.bf16.mxu1 %v5731_v31 }
 0x341   : > { %4424 = vmatmul.mubr.f32.vlgmr.msra.gmra.mrb[14].mxu1 %v8536_v20  ;;  %v3941_v20 = vld [vmem:[%s8826_s4 + $0x2b8] sm:$0xff] }
 0x342   : > { %5734 = vmatpush3.bf16.msra.mxu1 %v5733_v26  ;;  %4493 = vmatprep.mubr.f32.mxu1 %v4282_v32  ;;  %v5743_v25 = vpack.c.bf16 %v3941_v20, %v3940_v30 }
 0x343   : > { %5736 = vmatprep.subr.bf16.mxu1 %v5735_v33 }
 0x346   : > { %5738 = vmatpush3.bf16.msra.mxu1 %v5737_v38 }
 0x347   : > { %5740 = vmatprep.subr.bf16.mxu1 %v5739_v40 }
 0x34a   : > { %5742 = vmatpush3.bf16.msra.mxu1 %v5741_v43 }
 0x34b   : > { %5744 = vmatprep.subr.bf16.mxu1 %v5743_v25 }
 0x34e   : > { %5746 = vmatpush3.bf16.msra.mxu1 %v5745_v53 }
 0x34f   : > { %5748 = vmatprep.subr.bf16.mxu1 %v5747_v54  ;;  %v5351_v54 = vld [vmem:[%s8828_s6] ss:$0 sm:$0xff] }
 0x352   : > { %5750 = vmatpush3.bf16.msra.mxu1 %v5749_v56  ;;  %v5428_v2 = vpop.f32.mrb[8].mxu1  ;;  %v4803_v56 = vsub.s32 %v4800_v37, %v6852_v28 }
 0x353   : > { %5752 = vmatprep.subr.bf16.mxu1 %v5751_v59  ;;  %v5429_v7 = vpop.f32.mrb[9].mxu1 }
 0x354   : > { %v5430_v5 = vadd.f32 %v5429_v7, %v5428_v2 }
 0x356   : > { %v4183_v6 = vadd.f32 %v5430_v5, %v8550_v39  ;;  %5754 = vmatpush3.bf16.msra.mxu1 %v5753_v3 }
 0x357   : > { %5756 = vmatprep.subr.bf16.mxu1 %v5755_v10 }
 0x35a   : > { %5758 = vmatpush3.bf16.msra.mxu1 %v5757_v8 }
 0x35b   : > { %5760 = vmatprep.subr.bf16.mxu1 %v5759_v58 }
 0x35e   : > { %5762 = vmatpush3.bf16.msra.mxu1 %v5761_v15 }
 0x361   : > { %4494 = vmatmul.mubr.f32.vlgmr.msra.gmra.mrb[16].mxu1 %v8648_v9 }
 0x393   : > { %v4758_v51 = vpop.xlane.xlu0 %4757 }
 0x394   : > { %6443 = vrsqrt.f32 %v4758_v51  ;;  %vm4761_vm10 = vcmp.eq.f32.partialorder %v4758_v51, inf  ;;  %v4764_v47 = vand.u32 2147483648, %v4758_v51  ;;  %vm4763_vm11 = vcmp.eq.f32.partialorder %v4758_v51, 0.0 }
 0x39e   : > { %v6444_v39 = vpop.eup %6443 }
 0x39f   : > { %v4760_v13 = vmul.f32 %v6444_v39, %v4758_v51 }
 0x3a1   : > { %v4762_v22 = vsel %vm4761_vm10, %v4758_v51, %v4760_v13 }
 0x3a2   : > { %v4765_v31 = vsel %vm4763_vm11, %v4764_v47, %v4762_v22 }
 0x3a3   : > { %v4766_v16 = vmax.f32 %v4765_v31, 1e-08 }
 0x3a4   : > { %v4726_v42 = vpop.xlane.xlu0 %4725 }
 0x3a5   : > { %v4769_v17 = vmul.f32 %v4768_v29, %v4766_v16 }
 0x3a7   : > { %v4774_v9 = vrot.slane %v4769_v17, %v8011_v57  ;;  %v4781_v19 = vrot.slane %v4769_v17, %v8025_v61 }
 0x3a8   : > { %v4739_v30 = vpop.xlane.xlu1 %4738 }
 0x3a9   : > { %4776 = vbcast.lane.b32.xlu1 %v4774_v9, 256  ;;  %4783 = vbcast.lane.b32.xlu0 %v4781_v19, 256 }
 0x3d4   : > { %v5463_v18 = vpop.f32.mrb[10].mxu1 }
 0x3d5   : > { %v5464_v26 = vpop.f32.mrb[11].mxu1 }
 0x3d6   : > { %v5465_v32 = vadd.f32 %v5464_v26, %v5463_v18 }
 0x3d8   : > { %v4253_v33 = vadd.f32 %v5465_v32, %v4183_v6 }
 0x3f4   : > { %v5498_v34 = vpop.f32.mrb[12].mxu1 }
 0x3f5   : > { %v5499_v35 = vpop.f32.mrb[13].mxu1 }
 0x3f6   : > { %v5500_v36 = vadd.f32 %v5499_v35, %v5498_v34 }
 0x3f8   : > { %v4356_v45 = vadd.f32 %v5500_v36, %v4253_v33 }
 0x414   : > { %v5533_v38 = vpop.f32.mrb[14].mxu1 }
 0x415   : > { %v5534_v40 = vpop.f32.mrb[15].mxu1 }
 0x416   : > { %v5535_v41 = vadd.f32 %v5534_v40, %v5533_v38 }
 0x418   : > { %v4426_v20 = vadd.f32 %v5535_v41, %v4356_v45 }
 0x41b   : > { %v4777_v43 = vpop.permute.xlu1 %4776  ;;  %v4784_v57 = vpop.permute.xlu0 %4783 }
 0x41c   : > { %6445 = vrcp.f32 %v4777_v43 }
 0x41d   : > { %6447 = vrcp.f32 %v4784_v57 }
 0x426   : > { %v6446_v61 = vpop.eup %6445 }
 0x427   : > { %v4788_v25 = vmul.f32 %v6446_v61, %v4726_v42  ;;  %v6448_v48 = vpop.eup %6447 }
 0x428   : > { %v4790_v49 = vmul.f32 %v6448_v48, %v4739_v30 }
 0x429   : > { %4794 = vperm.xlu1 %5862, %v4788_v25  }
 0x42d   : > { %4797 = vperm.xlu1 %5862, %v4790_v49  }
 0x434   : > { %v5568_v50 = vpop.f32.mrb[16].mxu1 }
 0x435   : > { %v5569_v52 = vpop.f32.mrb[17].mxu1 }
 0x436   : > { %v5570_v53 = vadd.f32 %v5569_v52, %v5568_v50 }
 0x438   : > { %v4496_v24 = vadd.f32 %v5570_v53, %v4426_v20 }
 0x43a   : > { %v4506_v12 = vadd.f32 %v5351_v54, %v4496_v24 }
 0x43c   : > { %4507 = vst [vmem:[#allocation4] sm:$0x3] %v4506_v12 }
 0x4a8   : > { %v4795_v55 = vpop.permute.xlu1 %4794 }
 0x4a9   : > { %v4804_v62 = vrot.slane %v4795_v55, %v4803_v56 }
 0x4ac   : > { %v4798_v59 = vpop.permute.xlu1 %4797 }
 0x4ad   : > { %v4808_v0 = vrot.slane %v4798_v59, %v4803_v56 }
 0x4af   : > { %v4809_v60 = vsel %vm947_vm5, %v4808_v0, %v4804_v62 }
 0x4b0   : > { %4812 = vst.msk [vmem:[#allocation6] sm:$0x3] %vm4811_vm12, %v4809_v60 }
 0x4b1 PF: > { %p8752_p12 = scmp.eq.s32.totalorder %s4952_s18, 2  ;;  %s6554_s26 = smov [#allocation4]  }
 0x4b2   : > { %s4822_s27 = sshll.u32 %s6554_s26, 4  ;;  %s6555_s15 = smov [#allocation6]   ;;  %s4823_s27 = int_to_ptr.vmem [resolvable:$true] %s4822_s27 }
 0x4b3   : > { %s4835_s28 = sshll.u32 %s6555_s15, 4  ;;  %s6449_s29 = scalar_lea.vmem %s4823_s27, 32  ;;  %s8756_s28 = int_to_ptr.vmem [resolvable:$true] %s4835_s28 }
 0x4b4   : > { %p6450_p13 = scmp.ne.s32.totalorder %s4823_s27, %s6449_s29  ;;  %p6456_p2 = scmp.lt.s32.totalorder %s4823_s27, %s4823_s27 }
 0x4b5   : > { %p6457_p3 = scmp.lt.s32.totalorder %s6449_s29, %s6449_s29 }
 0x4b6   : > { %p6451_p0 = pnand %p6450_p13, %p8752_p12 }
 0x4b7   : > { %p6458_p4 = por %p6457_p3, %p6456_p2 }
 0x4b8   : > { %p6452_p1 = pneg %p6451_p0 }
 0x4ba   : > { %p6459_p5 = pnand %p6458_p4, %p6452_p1 }
 0x4bc   : > { %6462 = shalt.err (!%p6459_p5)
}
 0x4bd   : > { %s6463_s11 = scalar_lea.hbm %s8831_s9, 32 }
 0x4be   : > { %p6464_p6 = scmp.ne.s32.totalorder %s8831_s9, %s6463_s11  ;;  %p6469_p9 = scmp.lt.u32.totalorder %s6463_s11, %s8831_s9 }
 0x4c0   : > { %p6465_p7 = pnand %p6464_p6, %p8752_p12 }
 0x4c2   : > { %p6466_p8 = pneg %p6465_p7 }
 0x4c4   : > { %p6471_p10 = pnand %p6469_p9, %p6466_p8 }
 0x4c6   : > { %6474 = shalt.err (!%p6471_p10)
}
 0x4c7   : > { %5804 = dma.vmem_to_hbm [thread:$0]  (%p8752_p12), %s4823_s27, 32, %s8831_s9, [#allocation5]  }
 0x4c8   : > { %s6475_s26 = scalar_lea.vmem %s8756_s28, 32  ;;  %p6482_p1 = scmp.lt.s32.totalorder %s8756_s28, %s8756_s28 }
 0x4c9   : > { %p6476_p11 = scmp.ne.s32.totalorder %s8756_s28, %s6475_s26  ;;  %p6483_p2 = scmp.lt.s32.totalorder %s6475_s26, %s6475_s26 }
 0x4cb   : > { %p6477_p13 = pnand %p6476_p11, %p8752_p12  ;;  %p6484_p3 = por %p6483_p2, %p6482_p1 }
 0x4cd   : > { %p6478_p0 = pneg %p6477_p13 }
 0x4cf   : > { %p6485_p4 = pnand %p6484_p3, %p6478_p0 }
 0x4d1   : > { %6488 = shalt.err (!%p6485_p4)
}
 0x4d2   : > { %s6489_s18 = scalar_lea.hbm %s8832_s10, 32 }
 0x4d3   : > { %p6490_p5 = scmp.ne.s32.totalorder %s8832_s10, %s6489_s18  ;;  %p6495_p8 = scmp.lt.u32.totalorder %s6489_s18, %s8832_s10 }
 0x4d5   : > { %p6491_p6 = pnand %p6490_p5, %p8752_p12 }
 0x4d7   : > { %p6492_p7 = pneg %p6491_p6 }
 0x4d9   : > { %p6497_p9 = pnand %p6495_p8, %p6492_p7 }
 0x4db   : > { %6500 = shalt.err (!%p6497_p9)
}
 0x4dc   : > { %5806 = dma.vmem_to_hbm [thread:$0]  (%p8752_p12), %s8756_s28, 32, %s8832_s10, [#allocation7]  }
 0x4dd   : > { %6522 = dma.done.wait (%p8752_p12), [#allocation5], 32  }
 0x4de   : > { %6524 = vsyncadd (%p8752_p12), [#allocation5], 4294967264 }
 0x4df   : > { %6526 = dma.done.wait (%p8752_p12), [#allocation7], 32  }
 0x4e0   : > { %6528 = vsyncadd (%p8752_p12), [#allocation7], 4294967264 }
 0x4e1 PF: > { %s23_s17 = sadd.s32 1, %s6547_s17   ;;  %s8834_s13 = smov %s6535_s14 }
 0x4e2   : > { %p20_p10 = scmp.ge.s32.totalorder %s23_s17, 5   ;;  %s8835_s14 = smov %s6647_s22 }
 0x4e3   : > { %s8836_s15 = smov %s6543_s16  ;;  %s8837_s16 = smov %s8839_s19 }
 0x4e4   :  { %22 = sbr.rel (!%p20_p10) target bundleno = 4 (0x4), region = 142 }
 0x4eb   :  { %4852 = vsyncpa [#allocation5], 1 }
 0x4ec   :  { %4854 = vsyncpa [#allocation5 + $0x1], 1 }
 0x4ed   :  { %4855 = vsyncpa [#allocation7], 1 }

</bundles_post_ra>
